<compile_context>
chip_gen: v7x
topology: tpu7x:2x2x1
jax: 0.10.0
libtpu: 0.0.40
codegen_flags: <defaults>
</compile_context>

<pallas_src>
import jax
import jax.numpy as jnp
from jax.experimental import pallas as pl
from jax.experimental.pallas import tpu as pltpu


# ----------------------------- Pallas kernels -----------------------------

def _conv_pool_kernel(taps_ref, w_ref, b_ref, o_ref):
    """Fused conv (im2col matmul) + bias + ReLU + 2x2/2 max-pool.

    taps_ref: (4, tm, K) im2col columns, one slab per pool-tap position.
    w_ref:    (K, 128)   conv weight, output channels zero-padded to 128 lanes.
    b_ref:    (1, 128)   bias, zero-padded.
    o_ref:    (tm, 128)  pooled activation (lane-dense store; pad lanes stay 0).

    max-pool(relu(conv + b)) == relu(max_taps(conv) + b) because the epilogue
    is monotone, so we max-reduce the four tap matmuls before bias/ReLU and
    write only the pooled, 4x-smaller tile.
    """
    w = w_ref[...]
    s0 = jnp.dot(taps_ref[0], w, preferred_element_type=jnp.float32)
    s1 = jnp.dot(taps_ref[1], w, preferred_element_type=jnp.float32)
    s2 = jnp.dot(taps_ref[2], w, preferred_element_type=jnp.float32)
    s3 = jnp.dot(taps_ref[3], w, preferred_element_type=jnp.float32)
    s = jnp.maximum(jnp.maximum(s0, s1), jnp.maximum(s2, s3))
    o_ref[...] = jnp.maximum(s + b_ref[...], 0.0).astype(o_ref.dtype)


def _fc3_kernel(x_ref, w1_ref, b1_ref, w2_ref, b2_ref, w3_ref, b3_ref, o_ref):
    """fc1 -> ReLU -> fc2 -> ReLU -> fc3, all weights VMEM-resident.

    Weights/biases are zero-padded to 128 output lanes, so every intermediate
    and the output slab are lane-dense; padding columns stay exactly 0.
    """
    h = jnp.dot(x_ref[...], w1_ref[...], preferred_element_type=jnp.float32)
    h = jnp.maximum(h + b1_ref[...], 0.0)
    h = jnp.dot(h, w2_ref[...], preferred_element_type=jnp.float32)
    h = jnp.maximum(h + b2_ref[...], 0.0)
    h = jnp.dot(h, w3_ref[...], preferred_element_type=jnp.float32)
    o_ref[...] = (h + b3_ref[...]).astype(o_ref.dtype)


# --------------------------- tiling helpers ---------------------------------

_SPLIT_MIN_M = 1024  # below this, forcing >=2 grid steps (v7x 2nd TC) is pure overhead


def _round_up(x, m):
    return (x + m - 1) // m * m


def _pick_tm(M, tm_max):
    """Largest M-tile <= tm_max.  For large M, cap so the grid has >= 2 steps so
    dimension_semantics=("parallel",) can shard across v7x's two TensorCores;
    small M keeps a single big tile (v5e/v6e have one TC)."""
    if M <= _SPLIT_MIN_M:
        return min(M, tm_max)
    return min(tm_max, _round_up((M + 1) // 2, 8))


# --------------------------- pallas_call wrappers ---------------------------

def conv_pool(taps, w2d, b2d, *, tm_max=1024):
    """taps: (4, M, K); w2d: (K, 128); b2d: (1, 128) -> (M, 128) pooled relu conv.

    NOTE: when M % tm != 0 the last grid block computes on out-of-range tap
    rows; those output rows are never stored, which is safe as long as the
    kernel has no cross-row reduction (it doesn't).
    """
    T, M, K = taps.shape
    N = w2d.shape[1]
    tm = _pick_tm(M, tm_max)
    grid = (pl.cdiv(M, tm),)
    return pl.pallas_call(
        _conv_pool_kernel,
        out_shape=jax.ShapeDtypeStruct((M, N), jnp.float32),
        grid=grid,
        in_specs=[pl.BlockSpec((T, tm, K), lambda i: (0, i, 0)),
                  pl.BlockSpec((K, N), lambda i: (0, 0)),
                  pl.BlockSpec((1, N), lambda i: (0, 0))],
        out_specs=pl.BlockSpec((tm, N), lambda i: (i, 0)),
        compiler_params=pltpu.CompilerParams(
            dimension_semantics=("parallel",)),
    )(taps, w2d, b2d)


def fc_block(x, w1, b1, w2, b2, w3, b3, *, tm_max=512):
    """x: (M, 400); w*: (K*, 128) padded; b*: (1, 128) padded -> (M, 128)."""
    M, K = x.shape
    N3 = w3.shape[1]
    tm = _pick_tm(M, tm_max)
    grid = (pl.cdiv(M, tm),)

    def full(a):
        return pl.BlockSpec(a.shape, lambda i: (0, 0))

    return pl.pallas_call(
        _fc3_kernel,
        out_shape=jax.ShapeDtypeStruct((M, N3), jnp.float32),
        grid=grid,
        in_specs=[pl.BlockSpec((tm, K), lambda i: (i, 0)),
                  full(w1), full(b1), full(w2), full(b2), full(w3), full(b3)],
        out_specs=pl.BlockSpec((tm, N3), lambda i: (i, 0)),
        compiler_params=pltpu.CompilerParams(
            dimension_semantics=("parallel",)),
    )(x, w1, b1, w2, b2, w3, b3)


# ------------------------------ host-side glue ------------------------------

def pool_tap_cols(x_nhwc, k):
    """Build the four pool-tap im2col slabs for a k x k VALID conv followed by a
    2x2/2 max pool.

    x: (B, H, W, C) NHWC.  Returns ((4, B*Hp*Wp, k*k*C), (B, Hp, Wp)).
    Row order: (b, hp, wp); column order: (ki, kj, cin) -- matches the conv
    weight repacked with .transpose(2, 3, 1, 0) in prepare_params.
    The k*k pieces are contiguous strided NHWC slabs concatenated along the
    channel axis (near-memcpy in XLA; no interleaving transpose).  Total volume
    equals a full conv im2col (k*k x the activation bytes) split across 4 taps.
    """
    B, H, W, C = x_nhwc.shape
    Ho, Wo = H - k + 1, W - k + 1
    Hp, Wp = Ho // 2, Wo // 2
    taps = []
    for ph in range(2):
        for pw in range(2):
            pieces = []
            for i in range(k):
                for j in range(k):
                    hs, ws = ph + i, pw + j
                    sl = x_nhwc[:, hs:hs + 2 * Hp - 1:2, ws:ws + 2 * Wp - 1:2, :]
                    pieces.append(sl)                        # (B, Hp, Wp, C)
            arr = jnp.concatenate(pieces, axis=-1)           # (B, Hp, Wp, k*k*C)
            taps.append(arr.reshape(B * Hp * Wp, k * k * C))
    return jnp.stack(taps, axis=0), (B, Hp, Wp)              # (4, M, K)


# ------------------------------- parameters --------------------------------

def _uniform(key, shape, fan_in):
    bound = 1.0 / jnp.sqrt(jnp.float32(fan_in))
    return jax.random.uniform(key, shape, jnp.float32, -bound, bound)


def init_params(key):
    """PyTorch-layout parameters (Conv: (Cout,Cin,kh,kw), Linear: (out,in))."""
    ks = jax.random.split(key, 10)
    p = {}
    p["conv1_w"] = _uniform(ks[0], (6, 3, 5, 5), 3 * 5 * 5)
    p["conv1_b"] = _uniform(ks[1], (6,), 3 * 5 * 5)
    p["conv2_w"] = _uniform(ks[2], (16, 6, 5, 5), 6 * 5 * 5)
    p["conv2_b"] = _uniform(ks[3], (16,), 6 * 5 * 5)
    p["fc1_w"] = _uniform(ks[4], (120, 16 * 5 * 5), 16 * 5 * 5)
    p["fc1_b"] = _uniform(ks[5], (120,), 16 * 5 * 5)
    p["fc2_w"] = _uniform(ks[6], (84, 120), 120)
    p["fc2_b"] = _uniform(ks[7], (84,), 120)
    p["fc3_w"] = _uniform(ks[8], (10, 84), 84)
    p["fc3_b"] = _uniform(ks[9], (10,), 84)
    return p


def _pad_to(a, shape):
    return jnp.pad(a, [(0, s - d) for d, s in zip(a.shape, shape)])


def prepare_params(p):
    """One-time repack to kernel-friendly, lane-dense layouts.

    * Conv weights (Cout,Cin,kh,kw) -> (kh,kw,Cin,Cout) -> (kh*kw*Cin, Cout),
      matching the tap column order (ki, kj, cin); Cout zero-padded to 128 lanes
      so every conv-pool store is a full unmasked 128-lane vst.  Biases likewise.
    * fc1 consumes the pooled conv2 output flattened NHWC -> (hw, c); PyTorch
      flatten order is (c, hw), so fc1's K axis is permuted once here.
    * All fc weights transposed to (K, N) and N (plus fc2/fc3 K) zero-padded
      to 128 lanes.
    """
    NP = 128
    q = {}
    q["conv1_w"] = _pad_to(p["conv1_w"].transpose(2, 3, 1, 0).reshape(75, 6), (75, NP))
    q["conv1_b"] = _pad_to(p["conv1_b"].reshape(1, 6), (1, NP))
    q["conv2_w"] = _pad_to(p["conv2_w"].transpose(2, 3, 1, 0).reshape(150, 16), (150, NP))
    q["conv2_b"] = _pad_to(p["conv2_b"].reshape(1, 16), (1, NP))
    w1 = p["fc1_w"].reshape(120, 16, 25).transpose(2, 1, 0).reshape(400, 120)
    q["fc1_w"] = _pad_to(w1, (400, NP))
    q["fc1_b"] = _pad_to(p["fc1_b"].reshape(1, 120), (1, NP))
    q["fc2_w"] = _pad_to(p["fc2_w"].T, (NP, NP))                   # (120,84)->(128,128)
    q["fc2_b"] = _pad_to(p["fc2_b"].reshape(1, 84), (1, NP))
    q["fc3_w"] = _pad_to(p["fc3_w"].T, (NP, NP))                   # (84,10)->(128,128)
    q["fc3_b"] = _pad_to(p["fc3_b"].reshape(1, 10), (1, NP))
    return q


# -------------------------------- forward ----------------------------------

@jax.jit
def net_forward(params, x_nchw):
    """x: (B, 3, 32, 32) f32 NCHW (matches PyTorch); returns (B, 10) f32."""
    x = jnp.transpose(x_nchw, (0, 2, 3, 1))                         # NHWC
    taps1, (B, H1, W1) = pool_tap_cols(x, 5)                        # (4, B*196, 75)
    p1 = conv_pool(taps1, params["conv1_w"], params["conv1_b"])     # (B*196, 128)
    x2 = p1[:, :6].reshape(B, H1, W1, 6)                            # drop lane padding
    taps2, (_, H2, W2) = pool_tap_cols(x2, 5)                       # (4, B*25, 150)
    p2 = conv_pool(taps2, params["conv2_w"], params["conv2_b"])     # (B*25, 128)
    xf = p2[:, :16].reshape(B, H2 * W2 * 16)                        # (B, 400), (hw,c) order
    out = fc_block(xf,
                   params["fc1_w"], params["fc1_b"],
                   params["fc2_w"], params["fc2_b"],
                   params["fc3_w"], params["fc3_b"])                # (B, 128)
    return out[:, :10]


# --------------------------- pure-JAX reference -----------------------------

@jax.jit
def reference_forward(raw, x):
    def conv(x, w, b):
        y = jax.lax.conv_general_dilated(
            x, w, window_strides=(1, 1), padding="VALID",
            dimension_numbers=("NCHW", "OIHW", "NCHW"))
        return jax.nn.relu(y + b[None, :, None, None])

    def pool(x):
        return jnp.maximum(
            jnp.maximum(x[:, :, 0::2, 0::2], x[:, :, 0::2, 1::2]),
            jnp.maximum(x[:, :, 1::2, 0::2], x[:, :, 1::2, 1::2]))

    x = pool(conv(x, raw["conv1_w"], raw["conv1_b"]))
    x = pool(conv(x, raw["conv2_w"], raw["conv2_b"]))
    x = x.reshape(x.shape[0], -1)
    x = jax.nn.relu(x @ raw["fc1_w"].T + raw["fc1_b"])
    x = jax.nn.relu(x @ raw["fc2_w"].T + raw["fc2_b"])
    return x @ raw["fc3_w"].T + raw["fc3_b"]


if __name__ == "__main__":
    key = jax.random.PRNGKey(0)
    pkey, xkey = jax.random.split(key)
    raw_params = init_params(pkey)
    params = prepare_params(raw_params)
    x = jax.random.normal(xkey, (2, 3, 32, 32), jnp.float32)  # B=2, CIFAR-sized

    out = jax.block_until_ready(net_forward(params, x))
    assert out.shape == (2, 10) and out.dtype == jnp.float32

    ref = jax.block_until_ready(reference_forward(raw_params, x))
    max_err = float(jnp.max(jnp.abs(out - ref)))
    # Tolerance covers differing reduction orders/groupings between the im2col
    # kernel and lax.conv under the TPU's default (bf16-pass) f32 matmul
    # precision; with jax_default_matmul_precision="highest" both paths agree
    # to ~1e-5 but default precision is kept here for MXU throughput.
    assert max_err < 2e-2, f"mismatch vs reference: max abs err {max_err}"

    print("KERNEL_OK")
</pallas_src>

<mosaic_0001>
module attributes {stable_mosaic.version = 11 : i64} {
  func.func @_conv_pool_kernel(%arg0: i32, %arg1: memref<4x392x75xf32, #tpu.memory_space<vmem>>, %arg2: memref<75x128xf32, #tpu.memory_space<vmem>>, %arg3: memref<1x128xf32, #tpu.memory_space<vmem>>, %arg4: memref<392x128xf32, #tpu.memory_space<vmem>>) attributes {dimension_semantics = [#tpu.dimension_semantics<parallel>], iteration_bounds = array<i64: 1>, scalar_prefetch = 0 : i64, scratch_operands = 0 : i64, tpu.core_type = #tpu.core_type<tc>, window_params = [{transform_indices = @transform_0, window_bounds = array<i64: 4, 392, 75>}, {pipeline_mode = #tpu.pipeline_mode<synchronous>, transform_indices = @transform_1, window_bounds = array<i64: 75, 128>}, {pipeline_mode = #tpu.pipeline_mode<synchronous>, transform_indices = @transform_2, window_bounds = array<i64: 1, 128>}, {transform_indices = @transform_3, window_bounds = array<i64: 392, 128>}]} {
    %c0 = arith.constant 0 : index
    %c0_0 = arith.constant 0 : index
    %0 = vector.load %arg2[%c0, %c0_0] : memref<75x128xf32, #tpu.memory_space<vmem>>, vector<75x128xf32>
    %c0_1 = arith.constant 0 : index
    %c0_2 = arith.constant 0 : index
    %c0_3 = arith.constant 0 : index
    %1 = vector.load %arg1[%c0_1, %c0_2, %c0_3] : memref<4x392x75xf32, #tpu.memory_space<vmem>>, vector<1x392x75xf32>
    %2 = vector.shape_cast %1 : vector<1x392x75xf32> to vector<392x75xf32>
    %cst = arith.constant dense<0.000000e+00> : vector<392x128xf32>
    %3 = tpu.matmul %2, %0, %cst {dimension_numbers = #tpu.dot_dimension_numbers<[1], [0], [0], [1], [0, 0, 1, 1], [], []>} : vector<392x75xf32>, vector<75x128xf32>, vector<392x128xf32> -> vector<392x128xf32>
    %c1 = arith.constant 1 : index
    %c0_4 = arith.constant 0 : index
    %c0_5 = arith.constant 0 : index
    %4 = vector.load %arg1[%c1, %c0_4, %c0_5] : memref<4x392x75xf32, #tpu.memory_space<vmem>>, vector<1x392x75xf32>
    %5 = vector.shape_cast %4 : vector<1x392x75xf32> to vector<392x75xf32>
    %cst_6 = arith.constant dense<0.000000e+00> : vector<392x128xf32>
    %6 = tpu.matmul %5, %0, %cst_6 {dimension_numbers = #tpu.dot_dimension_numbers<[1], [0], [0], [1], [0, 0, 1, 1], [], []>} : vector<392x75xf32>, vector<75x128xf32>, vector<392x128xf32> -> vector<392x128xf32>
    %c2 = arith.constant 2 : index
    %c0_7 = arith.constant 0 : index
    %c0_8 = arith.constant 0 : index
    %7 = vector.load %arg1[%c2, %c0_7, %c0_8] : memref<4x392x75xf32, #tpu.memory_space<vmem>>, vector<1x392x75xf32>
    %8 = vector.shape_cast %7 : vector<1x392x75xf32> to vector<392x75xf32>
    %cst_9 = arith.constant dense<0.000000e+00> : vector<392x128xf32>
    %9 = tpu.matmul %8, %0, %cst_9 {dimension_numbers = #tpu.dot_dimension_numbers<[1], [0], [0], [1], [0, 0, 1, 1], [], []>} : vector<392x75xf32>, vector<75x128xf32>, vector<392x128xf32> -> vector<392x128xf32>
    %c3 = arith.constant 3 : index
    %c0_10 = arith.constant 0 : index
    %c0_11 = arith.constant 0 : index
    %10 = vector.load %arg1[%c3, %c0_10, %c0_11] : memref<4x392x75xf32, #tpu.memory_space<vmem>>, vector<1x392x75xf32>
    %11 = vector.shape_cast %10 : vector<1x392x75xf32> to vector<392x75xf32>
    %cst_12 = arith.constant dense<0.000000e+00> : vector<392x128xf32>
    %12 = tpu.matmul %11, %0, %cst_12 {dimension_numbers = #tpu.dot_dimension_numbers<[1], [0], [0], [1], [0, 0, 1, 1], [], []>} : vector<392x75xf32>, vector<75x128xf32>, vector<392x128xf32> -> vector<392x128xf32>
    %13 = arith.maximumf %3, %6 : vector<392x128xf32>
    %14 = arith.maximumf %9, %12 : vector<392x128xf32>
    %15 = arith.maximumf %13, %14 : vector<392x128xf32>
    %c0_13 = arith.constant 0 : index
    %c0_14 = arith.constant 0 : index
    %16 = vector.load %arg3[%c0_13, %c0_14] : memref<1x128xf32, #tpu.memory_space<vmem>>, vector<1x128xf32>
    %17 = vector.broadcast %16 : vector<1x128xf32> to vector<392x128xf32>
    %18 = arith.addf %15, %17 : vector<392x128xf32>
    %cst_15 = arith.constant 0.000000e+00 : f32
    %19 = vector.broadcast %cst_15 : f32 to vector<392x128xf32>
    %20 = arith.maximumf %18, %19 : vector<392x128xf32>
    %c0_16 = arith.constant 0 : index
    %c0_17 = arith.constant 0 : index
    %21 = vector.load %arg4[%c0_16, %c0_17] : memref<392x128xf32, #tpu.memory_space<vmem>>, vector<392x128xf32>
    tpu.vector_store %arg4[%c0_16, %c0_17], %20 {strides = array<i32>} : memref<392x128xf32, #tpu.memory_space<vmem>>, vector<392x128xf32>,
    return
  }
  func.func @transform_0(%arg0: i32) -> (i32, i32, i32) {
    %c0_i32 = arith.constant 0 : i32
    %c0_i32_0 = arith.constant 0 : i32
    %c0_i32_1 = arith.constant 0 : i32
    return %c0_i32, %arg0, %c0_i32_0 : i32, i32, i32
  }
  func.func @transform_1(%arg0: i32) -> (i32, i32) {
    %c0_i32 = arith.constant 0 : i32
    %c0_i32_0 = arith.constant 0 : i32
    %c0_i32_1 = arith.constant 0 : i32
    return %c0_i32, %c0_i32_0 : i32, i32
  }
  func.func @transform_2(%arg0: i32) -> (i32, i32) {
    %c0_i32 = arith.constant 0 : i32
    %c0_i32_0 = arith.constant 0 : i32
    %c0_i32_1 = arith.constant 0 : i32
    return %c0_i32, %c0_i32_0 : i32, i32
  }
  func.func @transform_3(%arg0: i32) -> (i32, i32) {
    %c0_i32 = arith.constant 0 : i32
    %c0_i32_0 = arith.constant 0 : i32
    return %arg0, %c0_i32 : i32, i32
  }
}

module attributes {stable_mosaic.version = 11 : i64} {
  func.func @_conv_pool_kernel(%arg0: i32, %arg1: memref<4x50x150xf32, #tpu.memory_space<vmem>>, %arg2: memref<150x128xf32, #tpu.memory_space<vmem>>, %arg3: memref<1x128xf32, #tpu.memory_space<vmem>>, %arg4: memref<50x128xf32, #tpu.memory_space<vmem>>) attributes {dimension_semantics = [#tpu.dimension_semantics<parallel>], iteration_bounds = array<i64: 1>, scalar_prefetch = 0 : i64, scratch_operands = 0 : i64, tpu.core_type = #tpu.core_type<tc>, window_params = [{transform_indices = @transform_0, window_bounds = array<i64: 4, 50, 150>}, {pipeline_mode = #tpu.pipeline_mode<synchronous>, transform_indices = @transform_1, window_bounds = array<i64: 150, 128>}, {pipeline_mode = #tpu.pipeline_mode<synchronous>, transform_indices = @transform_2, window_bounds = array<i64: 1, 128>}, {transform_indices = @transform_3, window_bounds = array<i64: 50, 128>}]} {
    %c0 = arith.constant 0 : index
    %c0_0 = arith.constant 0 : index
    %0 = vector.load %arg2[%c0, %c0_0] : memref<150x128xf32, #tpu.memory_space<vmem>>, vector<150x128xf32>
    %c0_1 = arith.constant 0 : index
    %c0_2 = arith.constant 0 : index
    %c0_3 = arith.constant 0 : index
    %1 = vector.load %arg1[%c0_1, %c0_2, %c0_3] : memref<4x50x150xf32, #tpu.memory_space<vmem>>, vector<1x50x150xf32>
    %2 = vector.shape_cast %1 : vector<1x50x150xf32> to vector<50x150xf32>
    %cst = arith.constant dense<0.000000e+00> : vector<50x128xf32>
    %3 = tpu.matmul %2, %0, %cst {dimension_numbers = #tpu.dot_dimension_numbers<[1], [0], [0], [1], [0, 0, 1, 1], [], []>} : vector<50x150xf32>, vector<150x128xf32>, vector<50x128xf32> -> vector<50x128xf32>
    %c1 = arith.constant 1 : index
    %c0_4 = arith.constant 0 : index
    %c0_5 = arith.constant 0 : index
    %4 = vector.load %arg1[%c1, %c0_4, %c0_5] : memref<4x50x150xf32, #tpu.memory_space<vmem>>, vector<1x50x150xf32>
    %5 = vector.shape_cast %4 : vector<1x50x150xf32> to vector<50x150xf32>
    %cst_6 = arith.constant dense<0.000000e+00> : vector<50x128xf32>
    %6 = tpu.matmul %5, %0, %cst_6 {dimension_numbers = #tpu.dot_dimension_numbers<[1], [0], [0], [1], [0, 0, 1, 1], [], []>} : vector<50x150xf32>, vector<150x128xf32>, vector<50x128xf32> -> vector<50x128xf32>
    %c2 = arith.constant 2 : index
    %c0_7 = arith.constant 0 : index
    %c0_8 = arith.constant 0 : index
    %7 = vector.load %arg1[%c2, %c0_7, %c0_8] : memref<4x50x150xf32, #tpu.memory_space<vmem>>, vector<1x50x150xf32>
    %8 = vector.shape_cast %7 : vector<1x50x150xf32> to vector<50x150xf32>
    %cst_9 = arith.constant dense<0.000000e+00> : vector<50x128xf32>
    %9 = tpu.matmul %8, %0, %cst_9 {dimension_numbers = #tpu.dot_dimension_numbers<[1], [0], [0], [1], [0, 0, 1, 1], [], []>} : vector<50x150xf32>, vector<150x128xf32>, vector<50x128xf32> -> vector<50x128xf32>
    %c3 = arith.constant 3 : index
    %c0_10 = arith.constant 0 : index
    %c0_11 = arith.constant 0 : index
    %10 = vector.load %arg1[%c3, %c0_10, %c0_11] : memref<4x50x150xf32, #tpu.memory_space<vmem>>, vector<1x50x150xf32>
    %11 = vector.shape_cast %10 : vector<1x50x150xf32> to vector<50x150xf32>
    %cst_12 = arith.constant dense<0.000000e+00> : vector<50x128xf32>
    %12 = tpu.matmul %11, %0, %cst_12 {dimension_numbers = #tpu.dot_dimension_numbers<[1], [0], [0], [1], [0, 0, 1, 1], [], []>} : vector<50x150xf32>, vector<150x128xf32>, vector<50x128xf32> -> vector<50x128xf32>
    %13 = arith.maximumf %3, %6 : vector<50x128xf32>
    %14 = arith.maximumf %9, %12 : vector<50x128xf32>
    %15 = arith.maximumf %13, %14 : vector<50x128xf32>
    %c0_13 = arith.constant 0 : index
    %c0_14 = arith.constant 0 : index
    %16 = vector.load %arg3[%c0_13, %c0_14] : memref<1x128xf32, #tpu.memory_space<vmem>>, vector<1x128xf32>
    %17 = vector.broadcast %16 : vector<1x128xf32> to vector<50x128xf32>
    %18 = arith.addf %15, %17 : vector<50x128xf32>
    %cst_15 = arith.constant 0.000000e+00 : f32
    %19 = vector.broadcast %cst_15 : f32 to vector<50x128xf32>
    %20 = arith.maximumf %18, %19 : vector<50x128xf32>
    %c0_16 = arith.constant 0 : index
    %c0_17 = arith.constant 0 : index
    %21 = vector.load %arg4[%c0_16, %c0_17] : memref<50x128xf32, #tpu.memory_space<vmem>>, vector<50x128xf32>
    tpu.vector_store %arg4[%c0_16, %c0_17], %20 {strides = array<i32>} : memref<50x128xf32, #tpu.memory_space<vmem>>, vector<50x128xf32>,
    return
  }
  func.func @transform_0(%arg0: i32) -> (i32, i32, i32) {
    %c0_i32 = arith.constant 0 : i32
    %c0_i32_0 = arith.constant 0 : i32
    %c0_i32_1 = arith.constant 0 : i32
    return %c0_i32, %arg0, %c0_i32_0 : i32, i32, i32
  }
  func.func @transform_1(%arg0: i32) -> (i32, i32) {
    %c0_i32 = arith.constant 0 : i32
    %c0_i32_0 = arith.constant 0 : i32
    %c0_i32_1 = arith.constant 0 : i32
    return %c0_i32, %c0_i32_0 : i32, i32
  }
  func.func @transform_2(%arg0: i32) -> (i32, i32) {
    %c0_i32 = arith.constant 0 : i32
    %c0_i32_0 = arith.constant 0 : i32
    %c0_i32_1 = arith.constant 0 : i32
    return %c0_i32, %c0_i32_0 : i32, i32
  }
  func.func @transform_3(%arg0: i32) -> (i32, i32) {
    %c0_i32 = arith.constant 0 : i32
    %c0_i32_0 = arith.constant 0 : i32
    return %arg0, %c0_i32 : i32, i32
  }
}

module attributes {stable_mosaic.version = 11 : i64} {
  func.func @_fc3_kernel(%arg0: i32, %arg1: memref<2x400xf32, #tpu.memory_space<vmem>>, %arg2: memref<400x128xf32, #tpu.memory_space<vmem>>, %arg3: memref<1x128xf32, #tpu.memory_space<vmem>>, %arg4: memref<128x128xf32, #tpu.memory_space<vmem>>, %arg5: memref<1x128xf32, #tpu.memory_space<vmem>>, %arg6: memref<128x128xf32, #tpu.memory_space<vmem>>, %arg7: memref<1x128xf32, #tpu.memory_space<vmem>>, %arg8: memref<2x128xf32, #tpu.memory_space<vmem>>) attributes {dimension_semantics = [#tpu.dimension_semantics<parallel>], iteration_bounds = array<i64: 1>, scalar_prefetch = 0 : i64, scratch_operands = 0 : i64, tpu.core_type = #tpu.core_type<tc>, window_params = [{transform_indices = @transform_0, window_bounds = array<i64: 2, 400>}, {pipeline_mode = #tpu.pipeline_mode<synchronous>, transform_indices = @transform_1, window_bounds = array<i64: 400, 128>}, {pipeline_mode = #tpu.pipeline_mode<synchronous>, transform_indices = @transform_2, window_bounds = array<i64: 1, 128>}, {pipeline_mode = #tpu.pipeline_mode<synchronous>, transform_indices = @transform_3, window_bounds = array<i64: 128, 128>}, {pipeline_mode = #tpu.pipeline_mode<synchronous>, transform_indices = @transform_4, window_bounds = array<i64: 1, 128>}, {pipeline_mode = #tpu.pipeline_mode<synchronous>, transform_indices = @transform_5, window_bounds = array<i64: 128, 128>}, {pipeline_mode = #tpu.pipeline_mode<synchronous>, transform_indices = @transform_6, window_bounds = array<i64: 1, 128>}, {transform_indices = @transform_7, window_bounds = array<i64: 2, 128>}]} {
    %c0 = arith.constant 0 : index
    %c0_0 = arith.constant 0 : index
    %0 = vector.load %arg1[%c0, %c0_0] : memref<2x400xf32, #tpu.memory_space<vmem>>, vector<2x400xf32>
    %c0_1 = arith.constant 0 : index
    %c0_2 = arith.constant 0 : index
    %1 = vector.load %arg2[%c0_1, %c0_2] : memref<400x128xf32, #tpu.memory_space<vmem>>, vector<400x128xf32>
    %cst = arith.constant dense<0.000000e+00> : vector<2x128xf32>
    %2 = tpu.matmul %0, %1, %cst {dimension_numbers = #tpu.dot_dimension_numbers<[1], [0], [0], [1], [0, 0, 1, 1], [], []>} : vector<2x400xf32>, vector<400x128xf32>, vector<2x128xf32> -> vector<2x128xf32>
    %c0_3 = arith.constant 0 : index
    %c0_4 = arith.constant 0 : index
    %3 = vector.load %arg3[%c0_3, %c0_4] : memref<1x128xf32, #tpu.memory_space<vmem>>, vector<1x128xf32>
    %4 = vector.broadcast %3 : vector<1x128xf32> to vector<2x128xf32>
    %5 = arith.addf %2, %4 : vector<2x128xf32>
    %cst_5 = arith.constant 0.000000e+00 : f32
    %6 = vector.broadcast %cst_5 : f32 to vector<2x128xf32>
    %7 = arith.maximumf %5, %6 : vector<2x128xf32>
    %c0_6 = arith.constant 0 : index
    %c0_7 = arith.constant 0 : index
    %8 = vector.load %arg4[%c0_6, %c0_7] : memref<128x128xf32, #tpu.memory_space<vmem>>, vector<128x128xf32>
    %cst_8 = arith.constant dense<0.000000e+00> : vector<2x128xf32>
    %9 = tpu.matmul %7, %8, %cst_8 {dimension_numbers = #tpu.dot_dimension_numbers<[1], [0], [0], [1], [0, 0, 1, 1], [], []>} : vector<2x128xf32>, vector<128x128xf32>, vector<2x128xf32> -> vector<2x128xf32>
    %c0_9 = arith.constant 0 : index
    %c0_10 = arith.constant 0 : index
    %10 = vector.load %arg5[%c0_9, %c0_10] : memref<1x128xf32, #tpu.memory_space<vmem>>, vector<1x128xf32>
    %11 = vector.broadcast %10 : vector<1x128xf32> to vector<2x128xf32>
    %12 = arith.addf %9, %11 : vector<2x128xf32>
    %cst_11 = arith.constant 0.000000e+00 : f32
    %13 = vector.broadcast %cst_11 : f32 to vector<2x128xf32>
    %14 = arith.maximumf %12, %13 : vector<2x128xf32>
    %c0_12 = arith.constant 0 : index
    %c0_13 = arith.constant 0 : index
    %15 = vector.load %arg6[%c0_12, %c0_13] : memref<128x128xf32, #tpu.memory_space<vmem>>, vector<128x128xf32>
    %cst_14 = arith.constant dense<0.000000e+00> : vector<2x128xf32>
    %16 = tpu.matmul %14, %15, %cst_14 {dimension_numbers = #tpu.dot_dimension_numbers<[1], [0], [0], [1], [0, 0, 1, 1], [], []>} : vector<2x128xf32>, vector<128x128xf32>, vector<2x128xf32> -> vector<2x128xf32>
    %c0_15 = arith.constant 0 : index
    %c0_16 = arith.constant 0 : index
    %17 = vector.load %arg7[%c0_15, %c0_16] : memref<1x128xf32, #tpu.memory_space<vmem>>, vector<1x128xf32>
    %18 = vector.broadcast %17 : vector<1x128xf32> to vector<2x128xf32>
    %19 = arith.addf %16, %18 : vector<2x128xf32>
    %c0_17 = arith.constant 0 : index
    %c0_18 = arith.constant 0 : index
    %20 = vector.load %arg8[%c0_17, %c0_18] : memref<2x128xf32, #tpu.memory_space<vmem>>, vector<2x128xf32>
    tpu.vector_store %arg8[%c0_17, %c0_18], %19 {strides = array<i32>} : memref<2x128xf32, #tpu.memory_space<vmem>>, vector<2x128xf32>,
    return
  }
  func.func @transform_0(%arg0: i32) -> (i32, i32) {
    %c0_i32 = arith.constant 0 : i32
    %c0_i32_0 = arith.constant 0 : i32
    return %arg0, %c0_i32 : i32, i32
  }
  func.func @transform_1(%arg0: i32) -> (i32, i32) {
    %c0_i32 = arith.constant 0 : i32
    %c0_i32_0 = arith.constant 0 : i32
    %c0_i32_1 = arith.constant 0 : i32
    return %c0_i32, %c0_i32_0 : i32, i32
  }
  func.func @transform_2(%arg0: i32) -> (i32, i32) {
    %c0_i32 = arith.constant 0 : i32
    %c0_i32_0 = arith.constant 0 : i32
    %c0_i32_1 = arith.constant 0 : i32
    return %c0_i32, %c0_i32_0 : i32, i32
  }
  func.func @transform_3(%arg0: i32) -> (i32, i32) {
    %c0_i32 = arith.constant 0 : i32
    %c0_i32_0 = arith.constant 0 : i32
    %c0_i32_1 = arith.constant 0 : i32
    return %c0_i32, %c0_i32_0 : i32, i32
  }
  func.func @transform_4(%arg0: i32) -> (i32, i32) {
    %c0_i32 = arith.constant 0 : i32
    %c0_i32_0 = arith.constant 0 : i32
    %c0_i32_1 = arith.constant 0 : i32
    return %c0_i32, %c0_i32_0 : i32, i32
  }
  func.func @transform_5(%arg0: i32) -> (i32, i32) {
    %c0_i32 = arith.constant 0 : i32
    %c0_i32_0 = arith.constant 0 : i32
    %c0_i32_1 = arith.constant 0 : i32
    return %c0_i32, %c0_i32_0 : i32, i32
  }
  func.func @transform_6(%arg0: i32) -> (i32, i32) {
    %c0_i32 = arith.constant 0 : i32
    %c0_i32_0 = arith.constant 0 : i32
    %c0_i32_1 = arith.constant 0 : i32
    return %c0_i32, %c0_i32_0 : i32, i32
  }
  func.func @transform_7(%arg0: i32) -> (i32, i32) {
    %c0_i32 = arith.constant 0 : i32
    %c0_i32_0 = arith.constant 0 : i32
    return %arg0, %c0_i32 : i32, i32
  }
}

</mosaic_0001>

<bundles_post_ra>
// kernel: net_forward.3
= control target key start
LH: loop header
LB: loop body
LE: loop exit
PB: predicated region body
PF: predicated region fallthrough
CT: control target
= control target key end

     0   :  { %v3681_v0 = vmov 0.0|0.0   ;;  %vm3682_vm0 = vmmov 0   ;;  %v3683_v6 = vmov 0.0   ;;  %vm221_vm1 = vcmask 1042432   ;;  %s5585_s1 = inlined_call_operand.vmem [shape: f32[75,128], index: 1, kind: input, shape index: {}]   ;;  %s5586_s0 = inlined_call_operand.vmem [shape: f32[4,392,75], index: 0, kind: input, shape index: {}]   ;;  %s5587_s2 = inlined_call_operand.vmem [shape: f32[1,128], index: 2, kind: input, shape index: {}]   ;;  %s5588_s3 = inlined_call_operand.vmem [shape: f32[392,128], index: 3, kind: output, shape index: {}]  }
   0x1   :  { %3613 = vmatprep.subr.bf16.mxu0 %v3681_v0  ;;  %3629 = vmatprep.subr.bf16.mxu1 %v3681_v0  ;;  %v14_v1 = vld [vmem:[%s5585_s1] sm:$0xff]  ;;  %v15_v2 = vld [vmem:[%s5585_s1 + $0x8] sm:$0xff]  ;;  %v16_v3 = vld [vmem:[%s5585_s1 + $0x10] sm:$0xff]  ;;  %vm3684_vm2 = vmmov 1   ;;  %vm73_vm4 = vcmask 613376  }
   0x2   :  { %v3614_v4 = vpack.c.bf16 %v15_v2, %v14_v1  ;;  %v17_v5 = vld [vmem:[%s5585_s1 + $0x18] sm:$0xff]  ;;  %2965 = vmatprep.mubr.msk.f32.mxu0 %vm3682_vm0, %v3683_v6  ;;  %3132 = vmatprep.mubr.msk.f32.mxu1 %vm3682_vm0, %v3683_v6  ;;  %v18_v8 = vld [vmem:[%s5585_s1 + $0x20] sm:$0xff]  ;;  %v19_v9 = vld [vmem:[%s5585_s1 + $0x28] sm:$0xff] }
   0x3   :  { %v3617_v7 = vpack.c.bf16 %v17_v5, %v16_v3  ;;  %v3620_v10 = vpack.c.bf16 %v19_v9, %v18_v8  ;;  %v20_v11 = vld [vmem:[%s5585_s1 + $0x30] sm:$0xff]  ;;  %v21_v12 = vld [vmem:[%s5585_s1 + $0x38] sm:$0xff]  ;;  %v22_v14 = vld [vmem:[%s5585_s1 + $0x40] sm:$0xff] }
   0x4   :  { %3615 = vmatpush3.bf16.msra.mxu0 %v3614_v4  ;;  %3631 = vmatpush3.bf16.msra.mxu1 %v3614_v4  ;;  %v3623_v13 = vpack.c.bf16 %v21_v12, %v20_v11  ;;  %v23_v15 = vld [vmem:[%s5585_s1 + $0x48] sm:$0x7]  ;;  %vm3749_vm3 = vmpackc.low %vm221_vm1, %vm3684_vm2  ;;  %v24_v18 = vld [vmem:[%s5586_s0] sm:$0xff] }
   0x5   :  { %3616 = vmatprep.subr.bf16.mxu0 %v3681_v0  ;;  %3632 = vmatprep.subr.bf16.mxu1 %v3681_v0  ;;  %v3626_v16 = vpack.c.bf16 %v23_v15, %v22_v14  ;;  %v2411_v19 = vld [vmem:[%s5586_s0 + $0x188] sm:$0xff]  ;;  %v2412_v21 = vld [vmem:[%s5586_s0 + $0x190] sm:$0xff]  ;;  %v2413_v23 = vld [vmem:[%s5586_s0 + $0x198] sm:$0xff] }
   0x6   :  { %v25_v20 = vld [vmem:[%s5586_s0 + $0x8] sm:$0xff]  ;;  %v26_v22 = vld [vmem:[%s5586_s0 + $0x10] sm:$0xff]  ;;  %v27_v24 = vld [vmem:[%s5586_s0 + $0x18] sm:$0xff] }
   0x7   :  { %v2414_v25 = vld [vmem:[%s5586_s0 + $0x1a0] sm:$0xff]  ;;  %v2415_v27 = vld [vmem:[%s5586_s0 + $0x1a8] sm:$0xff]  ;;  %v2416_v29 = vld [vmem:[%s5586_s0 + $0x1b0] sm:$0xff] }
   0x8   :  { %3618 = vmatpush3.bf16.msra.mxu0 %v3617_v7  ;;  %3634 = vmatpush3.bf16.msra.mxu1 %v3617_v7  ;;  %v28_v26 = vld [vmem:[%s5586_s0 + $0x20] sm:$0xff]  ;;  %v29_v28 = vld [vmem:[%s5586_s0 + $0x28] sm:$0xff]  ;;  %v30_v30 = vld [vmem:[%s5586_s0 + $0x30] sm:$0xff] }
   0x9   :  { %3619 = vmatprep.subr.bf16.mxu0 %v3681_v0  ;;  %3635 = vmatprep.subr.bf16.mxu1 %v3681_v0  ;;  %v2417_v31 = vld [vmem:[%s5586_s0 + $0x1b8] sm:$0xff]  ;;  %v2418_v33 = vld [vmem:[%s5586_s0 + $0x1c0] sm:$0xff]  ;;  %v2419_v35 = vld [vmem:[%s5586_s0 + $0x1c8] sm:$0xff] }
   0xa   :  { %v31_v32 = vld [vmem:[%s5586_s0 + $0x38] sm:$0xff]  ;;  %v32_v34 = vld [vmem:[%s5586_s0 + $0x40] sm:$0xff]  ;;  %v33_v36 = vld [vmem:[%s5586_s0 + $0x48] sm:$0xff] }
   0xb   :  { %v2420_v37 = vld [vmem:[%s5586_s0 + $0x1d0] sm:$0xff]  ;;  %v2421_v39 = vld [vmem:[%s5586_s0 + $0x1d8] sm:$0xff]  ;;  %v2422_v41 = vld [vmem:[%s5586_s0 + $0x1e0] sm:$0xff] }
   0xc   :  { %3621 = vmatpush3.bf16.msra.mxu0 %v3620_v10  ;;  %3637 = vmatpush3.bf16.msra.mxu1 %v3620_v10  ;;  %v34_v38 = vld [vmem:[%s5586_s0 + $0x50] sm:$0xff]  ;;  %v35_v40 = vld [vmem:[%s5586_s0 + $0x58] sm:$0xff]  ;;  %v36_v42 = vld [vmem:[%s5586_s0 + $0x60] sm:$0xff] }
   0xd   :  { %3622 = vmatprep.subr.bf16.mxu0 %v3681_v0  ;;  %3638 = vmatprep.subr.bf16.mxu1 %v3681_v0  ;;  %v2423_v43 = vld [vmem:[%s5586_s0 + $0x1e8] sm:$0xff]  ;;  %v2424_v45 = vld [vmem:[%s5586_s0 + $0x1f0] sm:$0xff]  ;;  %v2425_v47 = vld [vmem:[%s5586_s0 + $0x1f8] sm:$0xff] }
   0xe   :  { %v37_v44 = vld [vmem:[%s5586_s0 + $0x68] sm:$0xff]  ;;  %v38_v46 = vld [vmem:[%s5586_s0 + $0x70] sm:$0xff]  ;;  %v39_v48 = vld [vmem:[%s5586_s0 + $0x78] sm:$0xff] }
   0xf   :  { %v2426_v49 = vld [vmem:[%s5586_s0 + $0x200] sm:$0xff]  ;;  %v2427_v51 = vld [vmem:[%s5586_s0 + $0x208] sm:$0xff]  ;;  %v2428_v53 = vld [vmem:[%s5586_s0 + $0x210] sm:$0xff] }
  0x10   :  { %3624 = vmatpush3.bf16.msra.mxu0 %v3623_v13  ;;  %3640 = vmatpush3.bf16.msra.mxu1 %v3623_v13  ;;  %v40_v50 = vld [vmem:[%s5586_s0 + $0x80] sm:$0xff]  ;;  %v41_v52 = vld [vmem:[%s5586_s0 + $0x88] sm:$0xff]  ;;  %v42_v54 = vld [vmem:[%s5586_s0 + $0x90] sm:$0xff] }
  0x11   :  { %3625 = vmatprep.subr.bf16.mxu0 %v3681_v0  ;;  %3641 = vmatprep.subr.bf16.mxu1 %v3681_v0  ;;  %v2429_v55 = vld [vmem:[%s5586_s0 + $0x218] sm:$0xff]  ;;  %v2430_v57 = vld [vmem:[%s5586_s0 + $0x220] sm:$0xff]  ;;  %v2431_v59 = vld [vmem:[%s5586_s0 + $0x228] sm:$0xff] }
  0x12   :  { %v43_v56 = vld [vmem:[%s5586_s0 + $0x98] sm:$0xff]  ;;  %v44_v58 = vld [vmem:[%s5586_s0 + $0xa0] sm:$0xff]  ;;  %v45_v60 = vld [vmem:[%s5586_s0 + $0xa8] sm:$0xff] }
  0x13   :  { %v2432_v61 = vld [vmem:[%s5586_s0 + $0x230] sm:$0xff]  ;;  %v2433_v63 = vld [vmem:[%s5586_s0 + $0x238] sm:$0xff]  ;;  %v2434_v1 = vld [vmem:[%s5586_s0 + $0x240] sm:$0xff] }
  0x14   :  { %3628 = vmatpush3.bf16.msk.msra.mxu0 %vm3749_vm3, %v3626_v16  ;;  %3644 = vmatpush3.bf16.msk.msra.mxu1 %vm3749_vm3, %v3626_v16  ;;  %v46_v62 = vld [vmem:[%s5586_s0 + $0xb0] sm:$0xff]  ;;  %v48_v2 = vld [vmem:[%s5586_s0 + $0xc0] sm:$0xff]  ;;  %v2435_v3 = vld [vmem:[%s5586_s0 + $0x248] sm:$0xff] }
  0x15   :  { %3645 = vmatprep.subr.bf16.mxu0 %v3681_v0  ;;  %3661 = vmatprep.subr.bf16.mxu1 %v3681_v0  ;;  %v2436_v5 = vld [vmem:[%s5586_s0 + $0x250] sm:$0xff]  ;;  %v2437_v8 = vld [vmem:[%s5586_s0 + $0x258] sm:$0xff]  ;;  %v52_v11 = vld [vmem:[%s5586_s0 + $0xe0] sm:$0xff] }
  0x16   :  { %v51_v9 = vld [vmem:[%s5586_s0 + $0xd8] sm:$0xff]  ;;  %v2439_v12 = vld [vmem:[%s5586_s0 + $0x268] sm:$0xff]  ;;  %v2440_v14 = vld [vmem:[%s5586_s0 + $0x270] sm:$0xff] }
  0x17   :  { %2966 = vmatmul.mubr.msk.f32.vlgmr.msra.gmra.mrb[0].mxu0 %vm73_vm4, %v24_v18  ;;  %3133 = vmatmul.mubr.msk.f32.vlgmr.msra.gmra.mrb[0].mxu1 %vm73_vm4, %v2411_v19  ;;  %v54_v15 = vld [vmem:[%s5586_s0 + $0xf0] sm:$0xff]  ;;  %v55_v17 = vld [vmem:[%s5586_s0 + $0xf8] sm:$0xff]  ;;  %v2442_v18 = vld [vmem:[%s5586_s0 + $0x280] sm:$0xff] }
  0x18   :  { %3647 = vmatpush3.bf16.msra.mxu0 %v3614_v4  ;;  %3663 = vmatpush3.bf16.msra.mxu1 %v3614_v4  ;;  %v49_v4 = vld [vmem:[%s5586_s0 + $0xc8] sm:$0xff]  ;;  %v56_v19 = vld [vmem:[%s5586_s0 + $0x100] sm:$0xff] }
  0x19   :  { %2968 = vmatprep.mubr.msk.f32.mxu0 %vm3682_vm0, %v3683_v6  ;;  %3135 = vmatprep.mubr.msk.f32.mxu1 %vm3682_vm0, %v3683_v6 }
  0x1a   :  { %3648 = vmatprep.subr.bf16.mxu0 %v3681_v0  ;;  %3664 = vmatprep.subr.bf16.mxu1 %v3681_v0 }
  0x1b   :  { %2969 = vmatmul.mubr.msk.f32.gmra.mrb[2].mxu0 %vm73_vm4, %v25_v20  ;;  %3136 = vmatmul.mubr.msk.f32.gmra.mrb[2].mxu1 %vm73_vm4, %v2412_v21  ;;  %v2443_v20 = vld [vmem:[%s5586_s0 + $0x288] sm:$0xff] }
  0x1c   :  { %2971 = vmatprep.mubr.msk.f32.mxu0 %vm3682_vm0, %v3683_v6  ;;  %3138 = vmatprep.mubr.msk.f32.mxu1 %vm3682_vm0, %v3683_v6  ;;  %v57_v21 = vld [vmem:[%s5586_s0 + $0x108] sm:$0xff] }
  0x1d   :  { %3650 = vmatpush3.bf16.msra.mxu0 %v3617_v7  ;;  %3666 = vmatpush3.bf16.msra.mxu1 %v3617_v7  ;;  %v50_v7 = vld [vmem:[%s5586_s0 + $0xd0] sm:$0xff] }
  0x1e   :  { %3651 = vmatprep.subr.bf16.mxu0 %v3681_v0  ;;  %3667 = vmatprep.subr.bf16.mxu1 %v3681_v0 }
  0x1f   :  { %2972 = vmatmul.mubr.msk.f32.gmra.mrb[4].mxu0 %vm73_vm4, %v26_v22  ;;  %3139 = vmatmul.mubr.msk.f32.gmra.mrb[4].mxu1 %vm73_vm4, %v2413_v23  ;;  %v2444_v22 = vld [vmem:[%s5586_s0 + $0x290] sm:$0xff] }
  0x20   :  { %2974 = vmatprep.mubr.msk.f32.mxu0 %vm3682_vm0, %v3683_v6  ;;  %3141 = vmatprep.mubr.msk.f32.mxu1 %vm3682_vm0, %v3683_v6  ;;  %v58_v23 = vld [vmem:[%s5586_s0 + $0x110] sm:$0xff] }
  0x21   :  { %3653 = vmatpush3.bf16.msra.mxu0 %v3620_v10  ;;  %3669 = vmatpush3.bf16.msra.mxu1 %v3620_v10  ;;  %v2438_v10 = vld [vmem:[%s5586_s0 + $0x260] sm:$0xff] }
  0x22   :  { %3654 = vmatprep.subr.bf16.mxu0 %v3681_v0  ;;  %3670 = vmatprep.subr.bf16.mxu1 %v3681_v0 }
  0x23   :  { %2975 = vmatmul.mubr.msk.f32.gmra.mrb[6].mxu0 %vm73_vm4, %v27_v24  ;;  %3142 = vmatmul.mubr.msk.f32.gmra.mrb[6].mxu1 %vm73_vm4, %v2414_v25  ;;  %v2445_v24 = vld [vmem:[%s5586_s0 + $0x298] sm:$0xff] }
  0x24   :  { %2977 = vmatprep.mubr.msk.f32.mxu0 %vm3682_vm0, %v3683_v6  ;;  %3144 = vmatprep.mubr.msk.f32.mxu1 %vm3682_vm0, %v3683_v6  ;;  %v59_v25 = vld [vmem:[%s5586_s0 + $0x118] sm:$0xff] }
  0x25   :  { %3656 = vmatpush3.bf16.msra.mxu0 %v3623_v13  ;;  %3672 = vmatpush3.bf16.msra.mxu1 %v3623_v13  ;;  %v53_v13 = vld [vmem:[%s5586_s0 + $0xe8] sm:$0xff] }
  0x26   :  { %3657 = vmatprep.subr.bf16.mxu0 %v3681_v0  ;;  %3673 = vmatprep.subr.bf16.mxu1 %v3681_v0  ;;  %v47_v0 = vld [vmem:[%s5586_s0 + $0xb8] sm:$0xff] }
  0x27   :  { %2978 = vmatmul.mubr.msk.f32.gmra.mrb[8].mxu0 %vm73_vm4, %v28_v26  ;;  %3145 = vmatmul.mubr.msk.f32.gmra.mrb[8].mxu1 %vm73_vm4, %v2415_v27  ;;  %v2446_v26 = vld [vmem:[%s5586_s0 + $0x2a0] sm:$0xff] }
  0x28   :  { %2980 = vmatprep.mubr.msk.f32.mxu0 %vm3682_vm0, %v3683_v6  ;;  %3147 = vmatprep.mubr.msk.f32.mxu1 %vm3682_vm0, %v3683_v6  ;;  %v60_v27 = vld [vmem:[%s5586_s0 + $0x120] sm:$0xff] }
  0x29   :  { %3660 = vmatpush3.bf16.msk.msra.mxu0 %vm3749_vm3, %v3626_v16  ;;  %3676 = vmatpush3.bf16.msk.msra.mxu1 %vm3749_vm3, %v3626_v16  ;;  %v2441_v16 = vld [vmem:[%s5586_s0 + $0x278] sm:$0xff] }
  0x2b   :  { %2981 = vmatmul.mubr.msk.f32.gmra.mrb[10].mxu0 %vm73_vm4, %v29_v28  ;;  %3148 = vmatmul.mubr.msk.f32.gmra.mrb[10].mxu1 %vm73_vm4, %v2416_v29  ;;  %v2447_v28 = vld [vmem:[%s5586_s0 + $0x2a8] sm:$0xff] }
  0x2c   :  { %2983 = vmatprep.mubr.msk.f32.mxu0 %vm3682_vm0, %v3683_v6  ;;  %3150 = vmatprep.mubr.msk.f32.mxu1 %vm3682_vm0, %v3683_v6  ;;  %v61_v29 = vld [vmem:[%s5586_s0 + $0x128] sm:$0xff] }
  0x2f   :  { %2984 = vmatmul.mubr.msk.f32.gmra.mrb[12].mxu0 %vm73_vm4, %v30_v30  ;;  %3151 = vmatmul.mubr.msk.f32.gmra.mrb[12].mxu1 %vm73_vm4, %v2417_v31  ;;  %v2448_v30 = vld [vmem:[%s5586_s0 + $0x2b0] sm:$0xff] }
  0x30   :  { %2986 = vmatprep.mubr.msk.f32.mxu0 %vm3682_vm0, %v3683_v6  ;;  %3153 = vmatprep.mubr.msk.f32.mxu1 %vm3682_vm0, %v3683_v6  ;;  %v62_v31 = vld [vmem:[%s5586_s0 + $0x130] sm:$0xff] }
  0x33   :  { %2987 = vmatmul.mubr.msk.f32.gmra.mrb[14].mxu0 %vm73_vm4, %v31_v32  ;;  %3154 = vmatmul.mubr.msk.f32.gmra.mrb[14].mxu1 %vm73_vm4, %v2418_v33  ;;  %v2449_v32 = vld [vmem:[%s5586_s0 + $0x2b8] sm:$0xff] }
  0x34   :  { %2989 = vmatprep.mubr.msk.f32.mxu0 %vm3682_vm0, %v3683_v6  ;;  %3156 = vmatprep.mubr.msk.f32.mxu1 %vm3682_vm0, %v3683_v6  ;;  %v63_v33 = vld [vmem:[%s5586_s0 + $0x138] sm:$0xff] }
  0x37   :  { %2990 = vmatmul.mubr.msk.f32.gmra.mrb[16].mxu0 %vm73_vm4, %v32_v34  ;;  %3157 = vmatmul.mubr.msk.f32.gmra.mrb[16].mxu1 %vm73_vm4, %v2419_v35  ;;  %v2450_v34 = vld [vmem:[%s5586_s0 + $0x2c0] sm:$0xff] }
  0x38   :  { %2992 = vmatprep.mubr.msk.f32.mxu0 %vm3682_vm0, %v3683_v6  ;;  %3159 = vmatprep.mubr.msk.f32.mxu1 %vm3682_vm0, %v3683_v6  ;;  %v64_v35 = vld [vmem:[%s5586_s0 + $0x140] sm:$0xff] }
  0x3b   :  { %2993 = vmatmul.mubr.msk.f32.gmra.mrb[18].mxu0 %vm73_vm4, %v33_v36  ;;  %3160 = vmatmul.mubr.msk.f32.gmra.mrb[18].mxu1 %vm73_vm4, %v2420_v37  ;;  %v2451_v36 = vld [vmem:[%s5586_s0 + $0x2c8] sm:$0xff] }
  0x3c   :  { %2995 = vmatprep.mubr.msk.f32.mxu0 %vm3682_vm0, %v3683_v6  ;;  %3162 = vmatprep.mubr.msk.f32.mxu1 %vm3682_vm0, %v3683_v6  ;;  %v65_v37 = vld [vmem:[%s5586_s0 + $0x148] sm:$0xff] }
  0x3f   :  { %2996 = vmatmul.mubr.msk.f32.gmra.mrb[20].mxu0 %vm73_vm4, %v34_v38  ;;  %3163 = vmatmul.mubr.msk.f32.gmra.mrb[20].mxu1 %vm73_vm4, %v2421_v39  ;;  %v2452_v38 = vld [vmem:[%s5586_s0 + $0x2d0] sm:$0xff] }
  0x40   :  { %2998 = vmatprep.mubr.msk.f32.mxu0 %vm3682_vm0, %v3683_v6  ;;  %3165 = vmatprep.mubr.msk.f32.mxu1 %vm3682_vm0, %v3683_v6  ;;  %v66_v39 = vld [vmem:[%s5586_s0 + $0x150] sm:$0xff] }
  0x43   :  { %2999 = vmatmul.mubr.msk.f32.gmra.mrb[22].mxu0 %vm73_vm4, %v35_v40  ;;  %3166 = vmatmul.mubr.msk.f32.gmra.mrb[22].mxu1 %vm73_vm4, %v2422_v41  ;;  %v2453_v40 = vld [vmem:[%s5586_s0 + $0x2d8] sm:$0xff] }
  0x44   :  { %3001 = vmatprep.mubr.msk.f32.mxu0 %vm3682_vm0, %v3683_v6  ;;  %3168 = vmatprep.mubr.msk.f32.mxu1 %vm3682_vm0, %v3683_v6  ;;  %v67_v41 = vld [vmem:[%s5586_s0 + $0x158] sm:$0xff] }
  0x47   :  { %3002 = vmatmul.mubr.msk.f32.gmra.mrb[24].mxu0 %vm73_vm4, %v36_v42  ;;  %3169 = vmatmul.mubr.msk.f32.gmra.mrb[24].mxu1 %vm73_vm4, %v2423_v43  ;;  %v2454_v42 = vld [vmem:[%s5586_s0 + $0x2e0] sm:$0xff] }
  0x48   :  { %3004 = vmatprep.mubr.msk.f32.mxu0 %vm3682_vm0, %v3683_v6  ;;  %3171 = vmatprep.mubr.msk.f32.mxu1 %vm3682_vm0, %v3683_v6  ;;  %v68_v43 = vld [vmem:[%s5586_s0 + $0x160] sm:$0xff] }
  0x4b   :  { %3005 = vmatmul.mubr.msk.f32.gmra.mrb[26].mxu0 %vm73_vm4, %v37_v44  ;;  %3172 = vmatmul.mubr.msk.f32.gmra.mrb[26].mxu1 %vm73_vm4, %v2424_v45  ;;  %v2455_v44 = vld [vmem:[%s5586_s0 + $0x2e8] sm:$0xff] }
  0x4c   :  { %3007 = vmatprep.mubr.msk.f32.mxu0 %vm3682_vm0, %v3683_v6  ;;  %3174 = vmatprep.mubr.msk.f32.mxu1 %vm3682_vm0, %v3683_v6  ;;  %v69_v45 = vld [vmem:[%s5586_s0 + $0x168] sm:$0xff] }
  0x4f   :  { %3008 = vmatmul.mubr.msk.f32.gmra.mrb[28].mxu0 %vm73_vm4, %v38_v46  ;;  %3175 = vmatmul.mubr.msk.f32.gmra.mrb[28].mxu1 %vm73_vm4, %v2425_v47  ;;  %v2456_v46 = vld [vmem:[%s5586_s0 + $0x2f0] sm:$0xff] }
  0x50   :  { %3010 = vmatprep.mubr.msk.f32.mxu0 %vm3682_vm0, %v3683_v6  ;;  %3177 = vmatprep.mubr.msk.f32.mxu1 %vm3682_vm0, %v3683_v6  ;;  %v70_v47 = vld [vmem:[%s5586_s0 + $0x170] sm:$0xff] }
  0x53   :  { %3011 = vmatmul.mubr.msk.f32.gmra.mrb[30].mxu0 %vm73_vm4, %v39_v48  ;;  %3178 = vmatmul.mubr.msk.f32.gmra.mrb[30].mxu1 %vm73_vm4, %v2426_v49  ;;  %v2457_v48 = vld [vmem:[%s5586_s0 + $0x2f8] sm:$0xff] }
  0x54   :  { %3013 = vmatprep.mubr.msk.f32.mxu0 %vm3682_vm0, %v3683_v6  ;;  %3180 = vmatprep.mubr.msk.f32.mxu1 %vm3682_vm0, %v3683_v6  ;;  %v71_v49 = vld [vmem:[%s5586_s0 + $0x178] sm:$0xff] }
  0x57   :  { %3014 = vmatmul.mubr.msk.f32.gmra.mrb[32].mxu0 %vm73_vm4, %v40_v50  ;;  %3181 = vmatmul.mubr.msk.f32.gmra.mrb[32].mxu1 %vm73_vm4, %v2427_v51  ;;  %v2458_v50 = vld [vmem:[%s5586_s0 + $0x300] sm:$0xff] }
  0x58   :  { %3016 = vmatprep.mubr.msk.f32.mxu0 %vm3682_vm0, %v3683_v6  ;;  %3183 = vmatprep.mubr.msk.f32.mxu1 %vm3682_vm0, %v3683_v6  ;;  %v72_v51 = vld [vmem:[%s5586_s0 + $0x180] sm:$0xff] }
  0x5b   :  { %3017 = vmatmul.mubr.msk.f32.gmra.mrb[34].mxu0 %vm73_vm4, %v41_v52  ;;  %3184 = vmatmul.mubr.msk.f32.gmra.mrb[34].mxu1 %vm73_vm4, %v2428_v53  ;;  %v2459_v52 = vld [vmem:[%s5586_s0 + $0x308] sm:$0xff]  ;;  %v2510_v53 = vld [vmem:[%s5586_s0 + $0x310] sm:$0xff] }
  0x5c   :  { %3019 = vmatprep.mubr.msk.f32.mxu0 %vm3682_vm0, %v3683_v6  ;;  %3186 = vmatprep.mubr.msk.f32.mxu1 %vm3682_vm0, %v3683_v6 }
  0x5f   :  { %3020 = vmatmul.mubr.msk.f32.gmra.mrb[36].mxu0 %vm73_vm4, %v42_v54  ;;  %3187 = vmatmul.mubr.msk.f32.gmra.mrb[36].mxu1 %vm73_vm4, %v2429_v55  ;;  %v2609_v54 = vld [vmem:[%s5586_s0 + $0x498] sm:$0xff] }
  0x60   :  { %3022 = vmatprep.mubr.msk.f32.mxu0 %vm3682_vm0, %v3683_v6  ;;  %3189 = vmatprep.mubr.msk.f32.mxu1 %vm3682_vm0, %v3683_v6  ;;  %v2511_v55 = vld [vmem:[%s5586_s0 + $0x318] sm:$0xff] }
  0x63   :  { %3023 = vmatmul.mubr.msk.f32.gmra.mrb[38].mxu0 %vm73_vm4, %v43_v56  ;;  %3190 = vmatmul.mubr.msk.f32.gmra.mrb[38].mxu1 %vm73_vm4, %v2430_v57  ;;  %v2610_v56 = vld [vmem:[%s5586_s0 + $0x4a0] sm:$0xff] }
  0x64   :  { %3025 = vmatprep.mubr.msk.f32.mxu0 %vm3682_vm0, %v3683_v6  ;;  %3192 = vmatprep.mubr.msk.f32.mxu1 %vm3682_vm0, %v3683_v6  ;;  %v2512_v57 = vld [vmem:[%s5586_s0 + $0x320] sm:$0xff] }
  0x67   :  { %3026 = vmatmul.mubr.msk.f32.gmra.mrb[40].mxu0 %vm73_vm4, %v44_v58  ;;  %3193 = vmatmul.mubr.msk.f32.gmra.mrb[40].mxu1 %vm73_vm4, %v2431_v59  ;;  %v2611_v58 = vld [vmem:[%s5586_s0 + $0x4a8] sm:$0xff] }
  0x68   :  { %3028 = vmatprep.mubr.msk.f32.mxu0 %vm3682_vm0, %v3683_v6  ;;  %3195 = vmatprep.mubr.msk.f32.mxu1 %vm3682_vm0, %v3683_v6  ;;  %v2513_v59 = vld [vmem:[%s5586_s0 + $0x328] sm:$0xff] }
  0x6b   :  { %3029 = vmatmul.mubr.msk.f32.gmra.mrb[42].mxu0 %vm73_vm4, %v45_v60  ;;  %3196 = vmatmul.mubr.msk.f32.gmra.mrb[42].mxu1 %vm73_vm4, %v2432_v61  ;;  %v2612_v60 = vld [vmem:[%s5586_s0 + $0x4b0] sm:$0xff] }
  0x6c   :  { %3031 = vmatprep.mubr.msk.f32.mxu0 %vm3682_vm0, %v3683_v6  ;;  %3198 = vmatprep.mubr.msk.f32.mxu1 %vm3682_vm0, %v3683_v6  ;;  %v2514_v61 = vld [vmem:[%s5586_s0 + $0x330] sm:$0xff] }
  0x6f   :  { %3032 = vmatmul.mubr.msk.f32.gmra.mrb[44].mxu0 %vm73_vm4, %v46_v62  ;;  %3199 = vmatmul.mubr.msk.f32.gmra.mrb[44].mxu1 %vm73_vm4, %v2433_v63  ;;  %v2613_v62 = vld [vmem:[%s5586_s0 + $0x4b8] sm:$0xff] }
  0x70   :  { %3034 = vmatprep.mubr.msk.f32.mxu0 %vm3682_vm0, %v3683_v6  ;;  %3201 = vmatprep.mubr.msk.f32.mxu1 %vm3682_vm0, %v3683_v6 }
  0x73   :  { %3035 = vmatmul.mubr.msk.f32.gmra.mrb[46].mxu0 %vm73_vm4, %v47_v0  ;;  %3202 = vmatmul.mubr.msk.f32.gmra.mrb[46].mxu1 %vm73_vm4, %v2434_v1 }
  0x74   :  { %3037 = vmatprep.mubr.msk.f32.mxu0 %vm3682_vm0, %v3683_v6  ;;  %3204 = vmatprep.mubr.msk.f32.mxu1 %vm3682_vm0, %v3683_v6 }
  0x77   :  { %3038 = vmatmul.mubr.msk.f32.gmra.mrb[48].mxu0 %vm73_vm4, %v48_v2  ;;  %3205 = vmatmul.mubr.msk.f32.gmra.mrb[48].mxu1 %vm73_vm4, %v2435_v3 }
  0x78   :  { %3040 = vmatprep.mubr.msk.f32.mxu0 %vm3682_vm0, %v3683_v6  ;;  %3207 = vmatprep.mubr.msk.f32.mxu1 %vm3682_vm0, %v3683_v6 }
  0x7b   :  { %3041 = vmatmul.mubr.msk.f32.gmra.mrb[50].mxu0 %vm73_vm4, %v49_v4  ;;  %3208 = vmatmul.mubr.msk.f32.gmra.mrb[50].mxu1 %vm73_vm4, %v2436_v5  ;;  %v2515_v4 = vld [vmem:[%s5586_s0 + $0x338] sm:$0xff]  ;;  %v2614_v5 = vld [vmem:[%s5586_s0 + $0x4c0] sm:$0xff] }
  0x7c   :  { %3043 = vmatprep.mubr.msk.f32.mxu0 %vm3682_vm0, %v3683_v6  ;;  %3210 = vmatprep.mubr.msk.f32.mxu1 %vm3682_vm0, %v3683_v6 }
  0x7f   :  { %3044 = vmatmul.mubr.msk.f32.gmra.mrb[52].mxu0 %vm73_vm4, %v50_v7  ;;  %3211 = vmatmul.mubr.msk.f32.gmra.mrb[52].mxu1 %vm73_vm4, %v2437_v8 }
  0x80   :  { %3046 = vmatprep.mubr.msk.f32.mxu0 %vm3682_vm0, %v3683_v6  ;;  %3213 = vmatprep.mubr.msk.f32.mxu1 %vm3682_vm0, %v3683_v6 }
  0x83   :  { %3047 = vmatmul.mubr.msk.f32.gmra.mrb[54].mxu0 %vm73_vm4, %v51_v9  ;;  %3214 = vmatmul.mubr.msk.f32.gmra.mrb[54].mxu1 %vm73_vm4, %v2438_v10  ;;  %v2542_v9 = vld [vmem:[%s5586_s0 + $0x410] sm:$0xff] }
  0x84   :  { %3049 = vmatprep.mubr.msk.f32.mxu0 %vm3682_vm0, %v3683_v6  ;;  %3216 = vmatprep.mubr.msk.f32.mxu1 %vm3682_vm0, %v3683_v6 }
  0x87   :  { %3050 = vmatmul.mubr.msk.f32.gmra.mrb[56].mxu0 %vm73_vm4, %v52_v11  ;;  %3217 = vmatmul.mubr.msk.f32.gmra.mrb[56].mxu1 %vm73_vm4, %v2439_v12  ;;  %v2516_v12 = vld [vmem:[%s5586_s0 + $0x340] sm:$0xff] }
  0x88   :  { %3052 = vmatprep.mubr.msk.f32.mxu0 %vm3682_vm0, %v3683_v6  ;;  %3219 = vmatprep.mubr.msk.f32.mxu1 %vm3682_vm0, %v3683_v6 }
  0x8b   :  { %3053 = vmatmul.mubr.msk.f32.gmra.mrb[58].mxu0 %vm73_vm4, %v53_v13  ;;  %3220 = vmatmul.mubr.msk.f32.gmra.mrb[58].mxu1 %vm73_vm4, %v2440_v14  ;;  %v2615_v13 = vld [vmem:[%s5586_s0 + $0x4c8] sm:$0xff] }
  0x8c   :  { %3055 = vmatprep.mubr.msk.f32.mxu0 %vm3682_vm0, %v3683_v6  ;;  %3222 = vmatprep.mubr.msk.f32.mxu1 %vm3682_vm0, %v3683_v6 }
  0x8f   :  { %3056 = vmatmul.mubr.msk.f32.gmra.mrb[60].mxu0 %vm73_vm4, %v54_v15  ;;  %3223 = vmatmul.mubr.msk.f32.gmra.mrb[60].mxu1 %vm73_vm4, %v2441_v16 }
  0x90   :  { %3058 = vmatprep.mubr.msk.f32.mxu0 %vm3682_vm0, %v3683_v6  ;;  %3225 = vmatprep.mubr.msk.f32.mxu1 %vm3682_vm0, %v3683_v6 }
  0x93   :  { %3059 = vmatmul.mubr.msk.f32.gmra.mrb[62].mxu0 %vm73_vm4, %v55_v17  ;;  %3226 = vmatmul.mubr.msk.f32.gmra.mrb[62].mxu1 %vm73_vm4, %v2442_v18 }
  0x94   :  { %3061 = vmatprep.mubr.msk.f32.mxu0 %vm3682_vm0, %v3683_v6  ;;  %3228 = vmatprep.mubr.msk.f32.mxu1 %vm3682_vm0, %v3683_v6 }
  0x97   :  { %3062 = vmatmul.mubr.msk.f32.gmra.mrb[64].mxu0 %vm73_vm4, %v56_v19  ;;  %3229 = vmatmul.mubr.msk.f32.gmra.mrb[64].mxu1 %vm73_vm4, %v2443_v20  ;;  %v2517_v19 = vld [vmem:[%s5586_s0 + $0x348] sm:$0xff]  ;;  %v2616_v20 = vld [vmem:[%s5586_s0 + $0x4d0] sm:$0xff] }
  0x98   :  { %3064 = vmatprep.mubr.msk.f32.mxu0 %vm3682_vm0, %v3683_v6  ;;  %3231 = vmatprep.mubr.msk.f32.mxu1 %vm3682_vm0, %v3683_v6 }
  0x9b   :  { %3065 = vmatmul.mubr.msk.f32.gmra.mrb[66].mxu0 %vm73_vm4, %v57_v21  ;;  %3232 = vmatmul.mubr.msk.f32.gmra.mrb[66].mxu1 %vm73_vm4, %v2444_v22 }
  0x9c   :  { %3067 = vmatprep.mubr.msk.f32.mxu0 %vm3682_vm0, %v3683_v6  ;;  %3234 = vmatprep.mubr.msk.f32.mxu1 %vm3682_vm0, %v3683_v6 }
  0x9f   :  { %3068 = vmatmul.mubr.msk.f32.gmra.mrb[68].mxu0 %vm73_vm4, %v58_v23  ;;  %3235 = vmatmul.mubr.msk.f32.gmra.mrb[68].mxu1 %vm73_vm4, %v2445_v24  ;;  %v2541_v23 = vld [vmem:[%s5586_s0 + $0x408] sm:$0xff] }
  0xa0   :  { %3070 = vmatprep.mubr.msk.f32.mxu0 %vm3682_vm0, %v3683_v6  ;;  %3237 = vmatprep.mubr.msk.f32.mxu1 %vm3682_vm0, %v3683_v6 }
  0xa3   :  { %3071 = vmatmul.mubr.msk.f32.gmra.mrb[70].mxu0 %vm73_vm4, %v59_v25  ;;  %3238 = vmatmul.mubr.msk.f32.gmra.mrb[70].mxu1 %vm73_vm4, %v2446_v26  ;;  %v2518_v26 = vld [vmem:[%s5586_s0 + $0x350] sm:$0xff] }
  0xa4   :  { %3073 = vmatprep.mubr.msk.f32.mxu0 %vm3682_vm0, %v3683_v6  ;;  %3240 = vmatprep.mubr.msk.f32.mxu1 %vm3682_vm0, %v3683_v6 }
  0xa7   :  { %3074 = vmatmul.mubr.msk.f32.gmra.mrb[72].mxu0 %vm73_vm4, %v60_v27  ;;  %3241 = vmatmul.mubr.msk.f32.gmra.mrb[72].mxu1 %vm73_vm4, %v2447_v28  ;;  %v2617_v27 = vld [vmem:[%s5586_s0 + $0x4d8] sm:$0xff] }
  0xa8   :  { %3076 = vmatprep.mubr.msk.f32.mxu0 %vm3682_vm0, %v3683_v6  ;;  %3243 = vmatprep.mubr.msk.f32.mxu1 %vm3682_vm0, %v3683_v6 }
  0xab   :  { %3077 = vmatmul.mubr.msk.f32.gmra.mrb[74].mxu0 %vm73_vm4, %v61_v29  ;;  %3244 = vmatmul.mubr.msk.f32.gmra.mrb[74].mxu1 %vm73_vm4, %v2448_v30 }
  0xac   :  { %3079 = vmatprep.mubr.msk.f32.mxu0 %vm3682_vm0, %v3683_v6  ;;  %3246 = vmatprep.mubr.msk.f32.mxu1 %vm3682_vm0, %v3683_v6 }
  0xaf   :  { %3080 = vmatmul.mubr.msk.f32.gmra.mrb[76].mxu0 %vm73_vm4, %v62_v31  ;;  %3247 = vmatmul.mubr.msk.f32.gmra.mrb[76].mxu1 %vm73_vm4, %v2449_v32 }
  0xb0   :  { %3082 = vmatprep.mubr.msk.f32.mxu0 %vm3682_vm0, %v3683_v6  ;;  %3249 = vmatprep.mubr.msk.f32.mxu1 %vm3682_vm0, %v3683_v6 }
  0xb3   :  { %3083 = vmatmul.mubr.msk.f32.gmra.mrb[78].mxu0 %vm73_vm4, %v63_v33  ;;  %3250 = vmatmul.mubr.msk.f32.gmra.mrb[78].mxu1 %vm73_vm4, %v2450_v34  ;;  %v2519_v33 = vld [vmem:[%s5586_s0 + $0x358] sm:$0xff]  ;;  %v2618_v34 = vld [vmem:[%s5586_s0 + $0x4e0] sm:$0xff] }
  0xb4   :  { %3085 = vmatprep.mubr.msk.f32.mxu0 %vm3682_vm0, %v3683_v6  ;;  %3252 = vmatprep.mubr.msk.f32.mxu1 %vm3682_vm0, %v3683_v6 }
  0xb7   :  { %3086 = vmatmul.mubr.msk.f32.gmra.mrb[80].mxu0 %vm73_vm4, %v64_v35  ;;  %3253 = vmatmul.mubr.msk.f32.gmra.mrb[80].mxu1 %vm73_vm4, %v2451_v36 }
  0xb8   :  { %3088 = vmatprep.mubr.msk.f32.mxu0 %vm3682_vm0, %v3683_v6  ;;  %3255 = vmatprep.mubr.msk.f32.mxu1 %vm3682_vm0, %v3683_v6 }
  0xbb   :  { %3089 = vmatmul.mubr.msk.f32.gmra.mrb[82].mxu0 %vm73_vm4, %v65_v37  ;;  %3256 = vmatmul.mubr.msk.f32.gmra.mrb[82].mxu1 %vm73_vm4, %v2452_v38  ;;  %v2540_v37 = vld [vmem:[%s5586_s0 + $0x400] sm:$0xff] }
  0xbc   :  { %3091 = vmatprep.mubr.msk.f32.mxu0 %vm3682_vm0, %v3683_v6  ;;  %3258 = vmatprep.mubr.msk.f32.mxu1 %vm3682_vm0, %v3683_v6 }
  0xbf   :  { %3092 = vmatmul.mubr.msk.f32.gmra.mrb[84].mxu0 %vm73_vm4, %v66_v39  ;;  %3259 = vmatmul.mubr.msk.f32.gmra.mrb[84].mxu1 %vm73_vm4, %v2453_v40  ;;  %v2520_v40 = vld [vmem:[%s5586_s0 + $0x360] sm:$0xff] }
  0xc0   :  { %3094 = vmatprep.mubr.msk.f32.mxu0 %vm3682_vm0, %v3683_v6  ;;  %3261 = vmatprep.mubr.msk.f32.mxu1 %vm3682_vm0, %v3683_v6 }
  0xc3   :  { %3095 = vmatmul.mubr.msk.f32.gmra.mrb[86].mxu0 %vm73_vm4, %v67_v41  ;;  %3262 = vmatmul.mubr.msk.f32.gmra.mrb[86].mxu1 %vm73_vm4, %v2454_v42  ;;  %v2619_v41 = vld [vmem:[%s5586_s0 + $0x4e8] sm:$0xff] }
  0xc4   :  { %3097 = vmatprep.mubr.msk.f32.mxu0 %vm3682_vm0, %v3683_v6  ;;  %3264 = vmatprep.mubr.msk.f32.mxu1 %vm3682_vm0, %v3683_v6 }
  0xc7   :  { %3098 = vmatmul.mubr.msk.f32.gmra.mrb[88].mxu0 %vm73_vm4, %v68_v43  ;;  %3265 = vmatmul.mubr.msk.f32.gmra.mrb[88].mxu1 %vm73_vm4, %v2455_v44 }
  0xc8   :  { %3100 = vmatprep.mubr.msk.f32.mxu0 %vm3682_vm0, %v3683_v6  ;;  %3267 = vmatprep.mubr.msk.f32.mxu1 %vm3682_vm0, %v3683_v6 }
  0xcb   :  { %3101 = vmatmul.mubr.msk.f32.gmra.mrb[90].mxu0 %vm73_vm4, %v69_v45  ;;  %3268 = vmatmul.mubr.msk.f32.gmra.mrb[90].mxu1 %vm73_vm4, %v2456_v46 }
  0xcc   :  { %3103 = vmatprep.mubr.msk.f32.mxu0 %vm3682_vm0, %v3683_v6  ;;  %3270 = vmatprep.mubr.msk.f32.mxu1 %vm3682_vm0, %v3683_v6 }
  0xcf   :  { %3104 = vmatmul.mubr.msk.f32.gmra.mrb[92].mxu0 %vm73_vm4, %v70_v47  ;;  %3271 = vmatmul.mubr.msk.f32.gmra.mrb[92].mxu1 %vm73_vm4, %v2457_v48  ;;  %v2521_v47 = vld [vmem:[%s5586_s0 + $0x368] sm:$0xff]  ;;  %v2620_v48 = vld [vmem:[%s5586_s0 + $0x4f0] sm:$0xff] }
  0xd0   :  { %3106 = vmatprep.mubr.msk.f32.mxu0 %vm3682_vm0, %v3683_v6  ;;  %3273 = vmatprep.mubr.msk.f32.mxu1 %vm3682_vm0, %v3683_v6 }
  0xd3   :  { %3107 = vmatmul.mubr.msk.f32.gmra.mrb[94].mxu0 %vm73_vm4, %v71_v49  ;;  %3274 = vmatmul.mubr.msk.f32.gmra.mrb[94].mxu1 %vm73_vm4, %v2458_v50 }
  0xd4   :  { %3109 = vmatprep.mubr.msk.f32.mxu0 %vm3682_vm0, %v3683_v6  ;;  %3276 = vmatprep.mubr.msk.f32.mxu1 %vm3682_vm0, %v3683_v6 }
  0xd7   :  { %3110 = vmatmul.mubr.msk.f32.gmra.mrb[96].mxu0 %vm73_vm4, %v72_v51  ;;  %3277 = vmatmul.mubr.msk.f32.gmra.mrb[96].mxu1 %vm73_vm4, %v2459_v52  ;;  %v2539_v51 = vld [vmem:[%s5586_s0 + $0x3f8] sm:$0xff] }
  0xd8   :  { %3299 = vmatprep.mubr.msk.f32.mxu0 %vm3682_vm0, %v3683_v6  ;;  %3466 = vmatprep.mubr.msk.f32.mxu1 %vm3682_vm0, %v3683_v6 }
  0xdb   :  { %3300 = vmatmul.mubr.msk.f32.vlgmr.msra.gmra.mrb[98].mxu0 %vm73_vm4, %v2510_v53  ;;  %3467 = vmatmul.mubr.msk.f32.vlgmr.msra.gmra.mrb[98].mxu1 %vm73_vm4, %v2609_v54  ;;  %v2522_v54 = vld [vmem:[%s5586_s0 + $0x370] sm:$0xff] }
  0xdc   :  { %3302 = vmatprep.mubr.msk.f32.mxu0 %vm3682_vm0, %v3683_v6  ;;  %3469 = vmatprep.mubr.msk.f32.mxu1 %vm3682_vm0, %v3683_v6 }
  0xdf   :  { %3303 = vmatmul.mubr.msk.f32.gmra.mrb[100].mxu0 %vm73_vm4, %v2511_v55  ;;  %3470 = vmatmul.mubr.msk.f32.gmra.mrb[100].mxu1 %vm73_vm4, %v2610_v56  ;;  %v2621_v55 = vld [vmem:[%s5586_s0 + $0x4f8] sm:$0xff] }
  0xe0   :  { %3305 = vmatprep.mubr.msk.f32.mxu0 %vm3682_vm0, %v3683_v6  ;;  %3472 = vmatprep.mubr.msk.f32.mxu1 %vm3682_vm0, %v3683_v6 }
  0xe3   :  { %3306 = vmatmul.mubr.msk.f32.gmra.mrb[102].mxu0 %vm73_vm4, %v2512_v57  ;;  %3473 = vmatmul.mubr.msk.f32.gmra.mrb[102].mxu1 %vm73_vm4, %v2611_v58 }
  0xe4   :  { %3308 = vmatprep.mubr.msk.f32.mxu0 %vm3682_vm0, %v3683_v6  ;;  %3475 = vmatprep.mubr.msk.f32.mxu1 %vm3682_vm0, %v3683_v6 }
  0xe7   :  { %3309 = vmatmul.mubr.msk.f32.gmra.mrb[104].mxu0 %vm73_vm4, %v2513_v59  ;;  %3476 = vmatmul.mubr.msk.f32.gmra.mrb[104].mxu1 %vm73_vm4, %v2612_v60 }
  0xe8   :  { %3311 = vmatprep.mubr.msk.f32.mxu0 %vm3682_vm0, %v3683_v6  ;;  %3478 = vmatprep.mubr.msk.f32.mxu1 %vm3682_vm0, %v3683_v6 }
  0xea   :  { %v4413_v63 = vpop.f32.mrb[0].mxu0  ;;  %v4415_v0 = vpop.f32.mrb[0].mxu1 }
  0xeb   :  { %v2967_v2 = vpop.f32.mrb[1].mxu0  ;;  %v3134_v3 = vpop.f32.mrb[1].mxu1  ;;  %3312 = vmatmul.mubr.msk.f32.gmra.mrb[106].mxu0 %vm73_vm4, %v2514_v61  ;;  %3479 = vmatmul.mubr.msk.f32.gmra.mrb[106].mxu1 %vm73_vm4, %v2613_v62  ;;  %v2523_v61 = vld [vmem:[%s5586_s0 + $0x378] sm:$0xff]  ;;  %v2622_v62 = vld [vmem:[%s5586_s0 + $0x500] sm:$0xff] }
  0xec   :  { %3314 = vmatprep.mubr.msk.f32.mxu0 %vm3682_vm0, %v3683_v6  ;;  %3481 = vmatprep.mubr.msk.f32.mxu1 %vm3682_vm0, %v3683_v6 }
  0xee   :  { %v4431_v7 = vpop.f32.mrb[2].mxu0  ;;  %v4433_v8 = vpop.f32.mrb[2].mxu1 }
  0xef   :  { %v2970_v10 = vpop.f32.mrb[3].mxu0  ;;  %v3137_v11 = vpop.f32.mrb[3].mxu1  ;;  %3315 = vmatmul.mubr.msk.f32.gmra.mrb[108].mxu0 %vm73_vm4, %v2515_v4  ;;  %3482 = vmatmul.mubr.msk.f32.gmra.mrb[108].mxu1 %vm73_vm4, %v2614_v5  ;;  %v2538_v4 = vld [vmem:[%s5586_s0 + $0x3f0] sm:$0xff] }
  0xf0   :  { %3317 = vmatprep.mubr.msk.f32.mxu0 %vm3682_vm0, %v3683_v6  ;;  %3484 = vmatprep.mubr.msk.f32.mxu1 %vm3682_vm0, %v3683_v6  ;;  %v2524_v11 = vld [vmem:[%s5586_s0 + $0x380] sm:$0xff] }
  0xf2   :  { %v4449_v14 = vpop.f32.mrb[4].mxu0  ;;  %v4451_v15 = vpop.f32.mrb[4].mxu1 }
  0xf3   :  { %v2973_v17 = vpop.f32.mrb[5].mxu0  ;;  %v3140_v18 = vpop.f32.mrb[5].mxu1  ;;  %3318 = vmatmul.mubr.msk.f32.gmra.mrb[110].mxu0 %vm73_vm4, %v2516_v12  ;;  %3485 = vmatmul.mubr.msk.f32.gmra.mrb[110].mxu1 %vm73_vm4, %v2615_v13  ;;  %v2623_v12 = vld [vmem:[%s5586_s0 + $0x508] sm:$0xff] }
  0xf4   :  { %3320 = vmatprep.mubr.msk.f32.mxu0 %vm3682_vm0, %v3683_v6  ;;  %3487 = vmatprep.mubr.msk.f32.mxu1 %vm3682_vm0, %v3683_v6 }
  0xf6   :  { %v4467_v21 = vpop.f32.mrb[6].mxu0  ;;  %v4469_v22 = vpop.f32.mrb[6].mxu1 }
  0xf7   :  { %v2976_v24 = vpop.f32.mrb[7].mxu0  ;;  %v3143_v25 = vpop.f32.mrb[7].mxu1  ;;  %3321 = vmatmul.mubr.msk.f32.gmra.mrb[112].mxu0 %vm73_vm4, %v2517_v19  ;;  %3488 = vmatmul.mubr.msk.f32.gmra.mrb[112].mxu1 %vm73_vm4, %v2616_v20 }
  0xf8   :  { %3323 = vmatprep.mubr.msk.f32.mxu0 %vm3682_vm0, %v3683_v6  ;;  %3490 = vmatprep.mubr.msk.f32.mxu1 %vm3682_vm0, %v3683_v6  ;;  %v2525_v24 = vld [vmem:[%s5586_s0 + $0x388] sm:$0xff]  ;;  %v2624_v25 = vld [vmem:[%s5586_s0 + $0x510] sm:$0xff] }
  0xfa   :  { %v4485_v28 = vpop.f32.mrb[8].mxu0  ;;  %v4487_v29 = vpop.f32.mrb[8].mxu1 }
  0xfb   :  { %v2979_v31 = vpop.f32.mrb[9].mxu0  ;;  %v3146_v32 = vpop.f32.mrb[9].mxu1  ;;  %3324 = vmatmul.mubr.msk.f32.gmra.mrb[114].mxu0 %vm73_vm4, %v2518_v26  ;;  %3491 = vmatmul.mubr.msk.f32.gmra.mrb[114].mxu1 %vm73_vm4, %v2617_v27 }
  0xfc   :  { %3326 = vmatprep.mubr.msk.f32.mxu0 %vm3682_vm0, %v3683_v6  ;;  %3493 = vmatprep.mubr.msk.f32.mxu1 %vm3682_vm0, %v3683_v6  ;;  %v2537_v31 = vld [vmem:[%s5586_s0 + $0x3e8] sm:$0xff] }
  0xfe   :  { %v4503_v35 = vpop.f32.mrb[10].mxu0  ;;  %v4505_v36 = vpop.f32.mrb[10].mxu1 }
  0xff   :  { %v2982_v38 = vpop.f32.mrb[11].mxu0  ;;  %v3149_v39 = vpop.f32.mrb[11].mxu1  ;;  %3327 = vmatmul.mubr.msk.f32.gmra.mrb[116].mxu0 %vm73_vm4, %v2519_v33  ;;  %3494 = vmatmul.mubr.msk.f32.gmra.mrb[116].mxu1 %vm73_vm4, %v2618_v34  ;;  %v2526_v34 = vld [vmem:[%s5586_s0 + $0x390] sm:$0xff] }
 0x100   :  { %3329 = vmatprep.mubr.msk.f32.mxu0 %vm3682_vm0, %v3683_v6  ;;  %3496 = vmatprep.mubr.msk.f32.mxu1 %vm3682_vm0, %v3683_v6  ;;  %v2625_v38 = vld [vmem:[%s5586_s0 + $0x518] sm:$0xff] }
 0x102   :  { %v4521_v42 = vpop.f32.mrb[12].mxu0  ;;  %v4523_v43 = vpop.f32.mrb[12].mxu1 }
 0x103   :  { %v2985_v45 = vpop.f32.mrb[13].mxu0  ;;  %v3152_v46 = vpop.f32.mrb[13].mxu1  ;;  %3330 = vmatmul.mubr.msk.f32.gmra.mrb[118].mxu0 %vm73_vm4, %v2520_v40  ;;  %3497 = vmatmul.mubr.msk.f32.gmra.mrb[118].mxu1 %vm73_vm4, %v2619_v41 }
 0x104   :  { %3332 = vmatprep.mubr.msk.f32.mxu0 %vm3682_vm0, %v3683_v6  ;;  %3499 = vmatprep.mubr.msk.f32.mxu1 %vm3682_vm0, %v3683_v6 }
 0x106   :  { %v4539_v49 = vpop.f32.mrb[14].mxu0  ;;  %v4541_v50 = vpop.f32.mrb[14].mxu1 }
 0x107   :  { %v2988_v52 = vpop.f32.mrb[15].mxu0  ;;  %v3155_v53 = vpop.f32.mrb[15].mxu1  ;;  %3333 = vmatmul.mubr.msk.f32.gmra.mrb[120].mxu0 %vm73_vm4, %v2521_v47  ;;  %3500 = vmatmul.mubr.msk.f32.gmra.mrb[120].mxu1 %vm73_vm4, %v2620_v48  ;;  %v2527_v47 = vld [vmem:[%s5586_s0 + $0x398] sm:$0xff]  ;;  %v2626_v48 = vld [vmem:[%s5586_s0 + $0x520] sm:$0xff] }
 0x108   :  { %3335 = vmatprep.mubr.msk.f32.mxu0 %vm3682_vm0, %v3683_v6  ;;  %3502 = vmatprep.mubr.msk.f32.mxu1 %vm3682_vm0, %v3683_v6 }
 0x10a   :  { %v4557_v56 = vpop.f32.mrb[16].mxu0  ;;  %v4559_v57 = vpop.f32.mrb[16].mxu1 }
 0x10b   :  { %v2991_v59 = vpop.f32.mrb[17].mxu0  ;;  %v3158_v60 = vpop.f32.mrb[17].mxu1  ;;  %3336 = vmatmul.mubr.msk.f32.gmra.mrb[122].mxu0 %vm73_vm4, %v2522_v54  ;;  %3503 = vmatmul.mubr.msk.f32.gmra.mrb[122].mxu1 %vm73_vm4, %v2621_v55  ;;  %v2536_v54 = vld [vmem:[%s5586_s0 + $0x3e0] sm:$0xff] }
 0x10c   :  { %3338 = vmatprep.mubr.msk.f32.mxu0 %vm3682_vm0, %v3683_v6  ;;  %3505 = vmatprep.mubr.msk.f32.mxu1 %vm3682_vm0, %v3683_v6  ;;  %v2528_v60 = vld [vmem:[%s5586_s0 + $0x3a0] sm:$0xff] }
 0x10e   :  { %v4575_v2 = vpop.f32.mrb[18].mxu0  ;;  %v4577_v3 = vpop.f32.mrb[18].mxu1 }
 0x10f   :  { %v2994_v5 = vpop.f32.mrb[19].mxu0  ;;  %v3161_v10 = vpop.f32.mrb[19].mxu1  ;;  %3339 = vmatmul.mubr.msk.f32.gmra.mrb[124].mxu0 %vm73_vm4, %v2523_v61  ;;  %3506 = vmatmul.mubr.msk.f32.gmra.mrb[124].mxu1 %vm73_vm4, %v2622_v62  ;;  %v2627_v61 = vld [vmem:[%s5586_s0 + $0x528] sm:$0xff] }
 0x110   :  { %3341 = vmatprep.mubr.msk.f32.mxu0 %vm3682_vm0, %v3683_v6  ;;  %3508 = vmatprep.mubr.msk.f32.mxu1 %vm3682_vm0, %v3683_v6 }
 0x112   :  { %v4593_v13 = vpop.f32.mrb[20].mxu0  ;;  %v4595_v17 = vpop.f32.mrb[20].mxu1 }
 0x113   :  { %v2997_v19 = vpop.f32.mrb[21].mxu0  ;;  %v3164_v20 = vpop.f32.mrb[21].mxu1  ;;  %3342 = vmatmul.mubr.msk.f32.gmra.mrb[126].mxu0 %vm73_vm4, %v2524_v11  ;;  %3509 = vmatmul.mubr.msk.f32.gmra.mrb[126].mxu1 %vm73_vm4, %v2623_v12 }
 0x114   :  { %3344 = vmatprep.mubr.msk.f32.mxu0 %vm3682_vm0, %v3683_v6  ;;  %3511 = vmatprep.mubr.msk.f32.mxu1 %vm3682_vm0, %v3683_v6  ;;  %v2529_v19 = vld [vmem:[%s5586_s0 + $0x3a8] sm:$0xff]  ;;  %v2628_v20 = vld [vmem:[%s5586_s0 + $0x530] sm:$0xff] }
 0x116   :  { %v4611_v26 = vpop.f32.mrb[22].mxu0  ;;  %v4613_v27 = vpop.f32.mrb[22].mxu1 }
 0x117   :  { %v3000_v32 = vpop.f32.mrb[23].mxu0  ;;  %v3167_v33 = vpop.f32.mrb[23].mxu1  ;;  %3345 = vmatmul.mubr.msk.f32.gmra.mrb[128].mxu0 %vm73_vm4, %v2525_v24  ;;  %3512 = vmatmul.mubr.msk.f32.gmra.mrb[128].mxu1 %vm73_vm4, %v2624_v25 }
 0x118   :  { %3347 = vmatprep.mubr.msk.f32.mxu0 %vm3682_vm0, %v3683_v6  ;;  %3514 = vmatprep.mubr.msk.f32.mxu1 %vm3682_vm0, %v3683_v6  ;;  %v2535_v32 = vld [vmem:[%s5586_s0 + $0x3d8] sm:$0xff] }
 0x11a   :  { %v4629_v39 = vpop.f32.mrb[24].mxu0  ;;  %v4631_v40 = vpop.f32.mrb[24].mxu1 }
 0x11b   :  { %v3003_v45 = vpop.f32.mrb[25].mxu0  ;;  %v3170_v46 = vpop.f32.mrb[25].mxu1  ;;  %3348 = vmatmul.mubr.msk.f32.gmra.mrb[130].mxu0 %vm73_vm4, %v2526_v34  ;;  %3515 = vmatmul.mubr.msk.f32.gmra.mrb[130].mxu1 %vm73_vm4, %v2625_v38  ;;  %v2530_v38 = vld [vmem:[%s5586_s0 + $0x3b0] sm:$0xff] }
 0x11c   :  { %3350 = vmatprep.mubr.msk.f32.mxu0 %vm3682_vm0, %v3683_v6  ;;  %3517 = vmatprep.mubr.msk.f32.mxu1 %vm3682_vm0, %v3683_v6  ;;  %v2629_v45 = vld [vmem:[%s5586_s0 + $0x538] sm:$0xff] }
 0x11e   :  { %v4647_v52 = vpop.f32.mrb[26].mxu0  ;;  %v4649_v53 = vpop.f32.mrb[26].mxu1 }
 0x11f   :  { %v3006_v55 = vpop.f32.mrb[27].mxu0  ;;  %v3173_v59 = vpop.f32.mrb[27].mxu1  ;;  %3351 = vmatmul.mubr.msk.f32.gmra.mrb[132].mxu0 %vm73_vm4, %v2527_v47  ;;  %3518 = vmatmul.mubr.msk.f32.gmra.mrb[132].mxu1 %vm73_vm4, %v2626_v48 }
 0x120   :  { %3353 = vmatprep.mubr.msk.f32.mxu0 %vm3682_vm0, %v3683_v6  ;;  %3520 = vmatprep.mubr.msk.f32.mxu1 %vm3682_vm0, %v3683_v6 }
 0x122   :  { %v4665_v62 = vpop.f32.mrb[28].mxu0  ;;  %v4667_v5 = vpop.f32.mrb[28].mxu1 }
 0x123   :  { %v3009_v11 = vpop.f32.mrb[29].mxu0  ;;  %v3176_v12 = vpop.f32.mrb[29].mxu1  ;;  %3354 = vmatmul.mubr.msk.f32.gmra.mrb[134].mxu0 %vm73_vm4, %v2528_v60  ;;  %3521 = vmatmul.mubr.msk.f32.gmra.mrb[134].mxu1 %vm73_vm4, %v2627_v61  ;;  %v2531_v60 = vld [vmem:[%s5586_s0 + $0x3b8] sm:$0xff]  ;;  %v2630_v61 = vld [vmem:[%s5586_s0 + $0x540] sm:$0xff] }
 0x124   :  { %3356 = vmatprep.mubr.msk.f32.mxu0 %vm3682_vm0, %v3683_v6  ;;  %3523 = vmatprep.mubr.msk.f32.mxu1 %vm3682_vm0, %v3683_v6 }
 0x126   :  { %v4683_v24 = vpop.f32.mrb[30].mxu0  ;;  %v4685_v25 = vpop.f32.mrb[30].mxu1 }
 0x127   :  { %v3012_v33 = vpop.f32.mrb[31].mxu0  ;;  %v3179_v34 = vpop.f32.mrb[31].mxu1  ;;  %3357 = vmatmul.mubr.msk.f32.gmra.mrb[136].mxu0 %vm73_vm4, %v2529_v19  ;;  %3524 = vmatmul.mubr.msk.f32.gmra.mrb[136].mxu1 %vm73_vm4, %v2628_v20  ;;  %v2534_v19 = vld [vmem:[%s5586_s0 + $0x3d0] sm:$0xff] }
 0x128   :  { %3359 = vmatprep.mubr.msk.f32.mxu0 %vm3682_vm0, %v3683_v6  ;;  %3526 = vmatprep.mubr.msk.f32.mxu1 %vm3682_vm0, %v3683_v6  ;;  %v2532_v34 = vld [vmem:[%s5586_s0 + $0x3c0] sm:$0xff] }
 0x12a   :  { %v4701_v46 = vpop.f32.mrb[32].mxu0  ;;  %v4703_v47 = vpop.f32.mrb[32].mxu1 }
 0x12b   :  { %v3015_v55 = vpop.f32.mrb[33].mxu0  ;;  %v3182_v59 = vpop.f32.mrb[33].mxu1  ;;  %3360 = vmatmul.mubr.msk.f32.gmra.mrb[138].mxu0 %vm73_vm4, %v2530_v38  ;;  %3527 = vmatmul.mubr.msk.f32.gmra.mrb[138].mxu1 %vm73_vm4, %v2629_v45  ;;  %v2631_v38 = vld [vmem:[%s5586_s0 + $0x548] sm:$0xff] }
 0x12c   :  { %3362 = vmatprep.mubr.msk.f32.mxu0 %vm3682_vm0, %v3683_v6  ;;  %3529 = vmatprep.mubr.msk.f32.mxu1 %vm3682_vm0, %v3683_v6 }
 0x12e   :  { %v4719_v11 = vpop.f32.mrb[34].mxu0  ;;  %v4721_v12 = vpop.f32.mrb[34].mxu1 }
 0x12f   :  { %v3018_v20 = vpop.f32.mrb[35].mxu0  ;;  %v3185_v33 = vpop.f32.mrb[35].mxu1  ;;  %3363 = vmatmul.mubr.msk.f32.gmra.mrb[140].mxu0 %vm73_vm4, %v2531_v60  ;;  %3530 = vmatmul.mubr.msk.f32.gmra.mrb[140].mxu1 %vm73_vm4, %v2630_v61 }
 0x130   :  { %3365 = vmatprep.mubr.msk.f32.mxu0 %vm3682_vm0, %v3683_v6  ;;  %3532 = vmatprep.mubr.msk.f32.mxu1 %vm3682_vm0, %v3683_v6  ;;  %v2533_v20 = vld [vmem:[%s5586_s0 + $0x3c8] sm:$0xff]  ;;  %v2632_v33 = vld [vmem:[%s5586_s0 + $0x550] sm:$0xff] }
 0x132   :  { %v4737_v45 = vpop.f32.mrb[36].mxu0  ;;  %v4739_v55 = vpop.f32.mrb[36].mxu1 }
 0x133   :  { %v3021_v60 = vpop.f32.mrb[37].mxu0  ;;  %v3188_v61 = vpop.f32.mrb[37].mxu1  ;;  %3366 = vmatmul.mubr.msk.f32.gmra.mrb[142].mxu0 %vm73_vm4, %v2532_v34  ;;  %3533 = vmatmul.mubr.msk.f32.gmra.mrb[142].mxu1 %vm73_vm4, %v2631_v38  ;;  %v2633_v34 = vld [vmem:[%s5586_s0 + $0x558] sm:$0xff] }
 0x134   :  { %3368 = vmatprep.mubr.msk.f32.mxu0 %vm3682_vm0, %v3683_v6  ;;  %3535 = vmatprep.mubr.msk.f32.mxu1 %vm3682_vm0, %v3683_v6 }
 0x136   :  { %v4755_v60 = vpop.f32.mrb[38].mxu0  ;;  %v4757_v61 = vpop.f32.mrb[38].mxu1 }
 0x137   :  { %v3024_v38 = vpop.f32.mrb[39].mxu0  ;;  %v3191_v59 = vpop.f32.mrb[39].mxu1  ;;  %3369 = vmatmul.mubr.msk.f32.gmra.mrb[144].mxu0 %vm73_vm4, %v2533_v20  ;;  %3536 = vmatmul.mubr.msk.f32.gmra.mrb[144].mxu1 %vm73_vm4, %v2632_v33  ;;  %v2634_v20 = vld [vmem:[%s5586_s0 + $0x560] sm:$0xff] }
 0x138   :  { %3371 = vmatprep.mubr.msk.f32.mxu0 %vm3682_vm0, %v3683_v6  ;;  %3538 = vmatprep.mubr.msk.f32.mxu1 %vm3682_vm0, %v3683_v6 }
 0x13a   :  { %v4773_v38 = vpop.f32.mrb[40].mxu0  ;;  %v4775_v59 = vpop.f32.mrb[40].mxu1 }
 0x13b   :  { %v3027_v33 = vpop.f32.mrb[41].mxu0  ;;  %v3194_v48 = vpop.f32.mrb[41].mxu1  ;;  %3372 = vmatmul.mubr.msk.f32.gmra.mrb[146].mxu0 %vm73_vm4, %v2534_v19  ;;  %3539 = vmatmul.mubr.msk.f32.gmra.mrb[146].mxu1 %vm73_vm4, %v2633_v34  ;;  %v2635_v19 = vld [vmem:[%s5586_s0 + $0x568] sm:$0xff] }
 0x13c   :  { %3374 = vmatprep.mubr.msk.f32.mxu0 %vm3682_vm0, %v3683_v6  ;;  %3541 = vmatprep.mubr.msk.f32.mxu1 %vm3682_vm0, %v3683_v6 }
 0x13e   :  { %v4791_v33 = vpop.f32.mrb[42].mxu0  ;;  %v4793_v48 = vpop.f32.mrb[42].mxu1 }
 0x13f   :  { %v3030_v34 = vpop.f32.mrb[43].mxu0  ;;  %v3197_v10 = vpop.f32.mrb[43].mxu1  ;;  %3375 = vmatmul.mubr.msk.f32.gmra.mrb[148].mxu0 %vm73_vm4, %v2535_v32  ;;  %3542 = vmatmul.mubr.msk.f32.gmra.mrb[148].mxu1 %vm73_vm4, %v2634_v20  ;;  %v2636_v32 = vld [vmem:[%s5586_s0 + $0x570] sm:$0xff] }
 0x140   :  { %3377 = vmatprep.mubr.msk.f32.mxu0 %vm3682_vm0, %v3683_v6  ;;  %3544 = vmatprep.mubr.msk.f32.mxu1 %vm3682_vm0, %v3683_v6 }
 0x142   :  { %v4809_v34 = vpop.f32.mrb[44].mxu0  ;;  %v4811_v10 = vpop.f32.mrb[44].mxu1 }
 0x143   :  { %v3033_v20 = vpop.f32.mrb[45].mxu0  ;;  %v3200_v41 = vpop.f32.mrb[45].mxu1  ;;  %3378 = vmatmul.mubr.msk.f32.gmra.mrb[150].mxu0 %vm73_vm4, %v2536_v54  ;;  %3545 = vmatmul.mubr.msk.f32.gmra.mrb[150].mxu1 %vm73_vm4, %v2635_v19  ;;  %v2637_v54 = vld [vmem:[%s5586_s0 + $0x578] sm:$0xff] }
 0x144   :  { %3380 = vmatprep.mubr.msk.f32.mxu0 %vm3682_vm0, %v3683_v6  ;;  %3547 = vmatprep.mubr.msk.f32.mxu1 %vm3682_vm0, %v3683_v6 }
 0x146   :  { %v4827_v20 = vpop.f32.mrb[46].mxu0  ;;  %v4829_v41 = vpop.f32.mrb[46].mxu1 }
 0x147   :  { %v3036_v19 = vpop.f32.mrb[47].mxu0  ;;  %v3203_v18 = vpop.f32.mrb[47].mxu1  ;;  %3381 = vmatmul.mubr.msk.f32.gmra.mrb[152].mxu0 %vm73_vm4, %v2537_v31  ;;  %3548 = vmatmul.mubr.msk.f32.gmra.mrb[152].mxu1 %vm73_vm4, %v2636_v32  ;;  %v2638_v31 = vld [vmem:[%s5586_s0 + $0x580] sm:$0xff] }
 0x148   :  { %3383 = vmatprep.mubr.msk.f32.mxu0 %vm3682_vm0, %v3683_v6  ;;  %3550 = vmatprep.mubr.msk.f32.mxu1 %vm3682_vm0, %v3683_v6 }
 0x14a   :  { %v4845_v19 = vpop.f32.mrb[48].mxu0  ;;  %v4847_v18 = vpop.f32.mrb[48].mxu1 }
 0x14b   :  { %5640 = vst [vmem:[#allocation2_spill] sm:$0xff] %v4847_v18  ;;  %v3039_v32 = vpop.f32.mrb[49].mxu0  ;;  %v3206_v58 = vpop.f32.mrb[49].mxu1  ;;  %3384 = vmatmul.mubr.msk.f32.gmra.mrb[154].mxu0 %vm73_vm4, %v2538_v4  ;;  %3551 = vmatmul.mubr.msk.f32.gmra.mrb[154].mxu1 %vm73_vm4, %v2637_v54  ;;  %v2639_v4 = vld [vmem:[%s5586_s0 + $0x588] sm:$0xff] }
 0x14c   :  { %3386 = vmatprep.mubr.msk.f32.mxu0 %vm3682_vm0, %v3683_v6  ;;  %3553 = vmatprep.mubr.msk.f32.mxu1 %vm3682_vm0, %v3683_v6 }
 0x14e   :  { %v4863_v32 = vpop.f32.mrb[50].mxu0  ;;  %v4865_v58 = vpop.f32.mrb[50].mxu1 }
 0x14f   :  { %5641 = vst [vmem:[#allocation3_spill] sm:$0xff] %v4863_v32  ;;  %5642 = vst [vmem:[#allocation4_spill] sm:$0xff] %v4865_v58  ;;  %v3042_v54 = vpop.f32.mrb[51].mxu0  ;;  %v3209_v44 = vpop.f32.mrb[51].mxu1  ;;  %3387 = vmatmul.mubr.msk.f32.gmra.mrb[156].mxu0 %vm73_vm4, %v2539_v51  ;;  %3554 = vmatmul.mubr.msk.f32.gmra.mrb[156].mxu1 %vm73_vm4, %v2638_v31  ;;  %v2640_v51 = vld [vmem:[%s5586_s0 + $0x590] sm:$0xff] }
 0x150   :  { %3389 = vmatprep.mubr.msk.f32.mxu0 %vm3682_vm0, %v3683_v6  ;;  %3556 = vmatprep.mubr.msk.f32.mxu1 %vm3682_vm0, %v3683_v6 }
 0x152   :  { %v4881_v54 = vpop.f32.mrb[52].mxu0  ;;  %v4883_v44 = vpop.f32.mrb[52].mxu1 }
 0x153   :  { %5643 = vst [vmem:[#allocation5_spill] sm:$0xff] %v4881_v54  ;;  %5644 = vst [vmem:[#allocation6_spill] sm:$0xff] %v4883_v44  ;;  %v3045_v31 = vpop.f32.mrb[53].mxu0  ;;  %v3212_v30 = vpop.f32.mrb[53].mxu1  ;;  %3390 = vmatmul.mubr.msk.f32.gmra.mrb[158].mxu0 %vm73_vm4, %v2540_v37  ;;  %3557 = vmatmul.mubr.msk.f32.gmra.mrb[158].mxu1 %vm73_vm4, %v2639_v4  ;;  %v2641_v37 = vld [vmem:[%s5586_s0 + $0x598] sm:$0xff] }
 0x154   :  { %3392 = vmatprep.mubr.msk.f32.mxu0 %vm3682_vm0, %v3683_v6  ;;  %3559 = vmatprep.mubr.msk.f32.mxu1 %vm3682_vm0, %v3683_v6 }
 0x156   :  { %v4899_v31 = vpop.f32.mrb[54].mxu0  ;;  %v4901_v30 = vpop.f32.mrb[54].mxu1 }
 0x157   :  { %5645 = vst [vmem:[#allocation7_spill] sm:$0xff] %v4899_v31  ;;  %5646 = vst [vmem:[#allocation8_spill] sm:$0xff] %v4901_v30  ;;  %v3048_v4 = vpop.f32.mrb[55].mxu0  ;;  %v3215_v16 = vpop.f32.mrb[55].mxu1  ;;  %3393 = vmatmul.mubr.msk.f32.gmra.mrb[160].mxu0 %vm73_vm4, %v2541_v23  ;;  %3560 = vmatmul.mubr.msk.f32.gmra.mrb[160].mxu1 %vm73_vm4, %v2640_v51  ;;  %v2543_v30 = vld [vmem:[%s5586_s0 + $0x418] sm:$0xff]  ;;  %v2642_v23 = vld [vmem:[%s5586_s0 + $0x5a0] sm:$0xff] }
 0x158   :  { %3395 = vmatprep.mubr.msk.f32.mxu0 %vm3682_vm0, %v3683_v6  ;;  %3562 = vmatprep.mubr.msk.f32.mxu1 %vm3682_vm0, %v3683_v6 }
 0x15a   :  { %v4917_v4 = vpop.f32.mrb[56].mxu0  ;;  %v4919_v16 = vpop.f32.mrb[56].mxu1 }
 0x15b   :  { %5647 = vst [vmem:[#allocation9_spill] sm:$0xff] %v4917_v4  ;;  %5648 = vst [vmem:[#allocation10_spill] sm:$0xff] %v4919_v16  ;;  %v3051_v51 = vpop.f32.mrb[57].mxu0  ;;  %v3218_v1 = vpop.f32.mrb[57].mxu1  ;;  %3396 = vmatmul.mubr.msk.f32.gmra.mrb[162].mxu0 %vm73_vm4, %v2542_v9  ;;  %3563 = vmatmul.mubr.msk.f32.gmra.mrb[162].mxu1 %vm73_vm4, %v2641_v37  ;;  %v2544_v4 = vld [vmem:[%s5586_s0 + $0x420] sm:$0xff]  ;;  %v2643_v9 = vld [vmem:[%s5586_s0 + $0x5a8] sm:$0xff] }
 0x15c   :  { %3398 = vmatprep.mubr.msk.f32.mxu0 %vm3682_vm0, %v3683_v6  ;;  %3565 = vmatprep.mubr.msk.f32.mxu1 %vm3682_vm0, %v3683_v6 }
 0x15e   :  { %v4935_v51 = vpop.f32.mrb[58].mxu0  ;;  %v4937_v1 = vpop.f32.mrb[58].mxu1 }
 0x15f   :  { %5649 = vst [vmem:[#allocation11_spill] sm:$0xff] %v4935_v51  ;;  %5650 = vst [vmem:[#allocation12_spill] sm:$0xff] %v4937_v1  ;;  %v3054_v37 = vpop.f32.mrb[59].mxu0  ;;  %v3221_v16 = vpop.f32.mrb[59].mxu1  ;;  %3399 = vmatmul.mubr.msk.f32.gmra.mrb[164].mxu0 %vm73_vm4, %v2543_v30  ;;  %3566 = vmatmul.mubr.msk.f32.gmra.mrb[164].mxu1 %vm73_vm4, %v2642_v23  ;;  %v2545_v51 = vld [vmem:[%s5586_s0 + $0x428] sm:$0xff]  ;;  %v2644_v30 = vld [vmem:[%s5586_s0 + $0x5b0] sm:$0xff] }
 0x160   :  { %3401 = vmatprep.mubr.msk.f32.mxu0 %vm3682_vm0, %v3683_v6  ;;  %3568 = vmatprep.mubr.msk.f32.mxu1 %vm3682_vm0, %v3683_v6 }
 0x162   :  { %v4953_v37 = vpop.f32.mrb[60].mxu0  ;;  %v4955_v16 = vpop.f32.mrb[60].mxu1 }
 0x163   :  { %5651 = vst [vmem:[#allocation13_spill] sm:$0xff] %v4953_v37  ;;  %5652 = vst [vmem:[#allocation14_spill] sm:$0xff] %v4955_v16  ;;  %v3057_v23 = vpop.f32.mrb[61].mxu0  ;;  %v3224_v1 = vpop.f32.mrb[61].mxu1  ;;  %3402 = vmatmul.mubr.msk.f32.gmra.mrb[166].mxu0 %vm73_vm4, %v2544_v4  ;;  %3569 = vmatmul.mubr.msk.f32.gmra.mrb[166].mxu1 %vm73_vm4, %v2643_v9  ;;  %v2546_v37 = vld [vmem:[%s5586_s0 + $0x430] sm:$0xff]  ;;  %v2645_v4 = vld [vmem:[%s5586_s0 + $0x5b8] sm:$0xff] }
 0x164   :  { %3404 = vmatprep.mubr.msk.f32.mxu0 %vm3682_vm0, %v3683_v6  ;;  %3571 = vmatprep.mubr.msk.f32.mxu1 %vm3682_vm0, %v3683_v6 }
 0x166   :  { %v4971_v23 = vpop.f32.mrb[62].mxu0  ;;  %v4973_v1 = vpop.f32.mrb[62].mxu1 }
 0x167   :  { %5653 = vst [vmem:[#allocation15_spill] sm:$0xff] %v4971_v23  ;;  %5654 = vst [vmem:[#allocation16_spill] sm:$0xff] %v4973_v1  ;;  %v3060_v9 = vpop.f32.mrb[63].mxu0  ;;  %v3227_v16 = vpop.f32.mrb[63].mxu1  ;;  %3405 = vmatmul.mubr.msk.f32.gmra.mrb[168].mxu0 %vm73_vm4, %v2545_v51  ;;  %3572 = vmatmul.mubr.msk.f32.gmra.mrb[168].mxu1 %vm73_vm4, %v2644_v30  ;;  %v2547_v23 = vld [vmem:[%s5586_s0 + $0x438] sm:$0xff]  ;;  %v2646_v51 = vld [vmem:[%s5586_s0 + $0x5c0] sm:$0xff] }
 0x168   :  { %3407 = vmatprep.mubr.msk.f32.mxu0 %vm3682_vm0, %v3683_v6  ;;  %3574 = vmatprep.mubr.msk.f32.mxu1 %vm3682_vm0, %v3683_v6 }
 0x16a   :  { %v4989_v9 = vpop.f32.mrb[64].mxu0  ;;  %v4991_v16 = vpop.f32.mrb[64].mxu1 }
 0x16b   :  { %5655 = vst [vmem:[#allocation17_spill] sm:$0xff] %v4989_v9  ;;  %5656 = vst [vmem:[#allocation18_spill] sm:$0xff] %v4991_v16  ;;  %v3063_v30 = vpop.f32.mrb[65].mxu0  ;;  %v3230_v1 = vpop.f32.mrb[65].mxu1  ;;  %3408 = vmatmul.mubr.msk.f32.gmra.mrb[170].mxu0 %vm73_vm4, %v2546_v37  ;;  %3575 = vmatmul.mubr.msk.f32.gmra.mrb[170].mxu1 %vm73_vm4, %v2645_v4  ;;  %v2548_v9 = vld [vmem:[%s5586_s0 + $0x440] sm:$0xff]  ;;  %v2647_v37 = vld [vmem:[%s5586_s0 + $0x5c8] sm:$0xff] }
 0x16c   :  { %3410 = vmatprep.mubr.msk.f32.mxu0 %vm3682_vm0, %v3683_v6  ;;  %3577 = vmatprep.mubr.msk.f32.mxu1 %vm3682_vm0, %v3683_v6 }
 0x16e   :  { %v5007_v30 = vpop.f32.mrb[66].mxu0  ;;  %v5009_v1 = vpop.f32.mrb[66].mxu1 }
 0x16f   :  { %5657 = vst [vmem:[#allocation19_spill] sm:$0xff] %v5007_v30  ;;  %5658 = vst [vmem:[#allocation20_spill] sm:$0xff] %v5009_v1  ;;  %v3066_v4 = vpop.f32.mrb[67].mxu0  ;;  %v3233_v16 = vpop.f32.mrb[67].mxu1  ;;  %3411 = vmatmul.mubr.msk.f32.gmra.mrb[172].mxu0 %vm73_vm4, %v2547_v23  ;;  %3578 = vmatmul.mubr.msk.f32.gmra.mrb[172].mxu1 %vm73_vm4, %v2646_v51  ;;  %v2549_v30 = vld [vmem:[%s5586_s0 + $0x448] sm:$0xff]  ;;  %v2648_v23 = vld [vmem:[%s5586_s0 + $0x5d0] sm:$0xff] }
 0x170   :  { %3413 = vmatprep.mubr.msk.f32.mxu0 %vm3682_vm0, %v3683_v6  ;;  %3580 = vmatprep.mubr.msk.f32.mxu1 %vm3682_vm0, %v3683_v6 }
 0x172   :  { %v5025_v4 = vpop.f32.mrb[68].mxu0  ;;  %v5027_v16 = vpop.f32.mrb[68].mxu1 }
 0x173   :  { %5659 = vst [vmem:[#allocation21_spill] sm:$0xff] %v5025_v4  ;;  %5660 = vst [vmem:[#allocation22_spill] sm:$0xff] %v5027_v16  ;;  %v3069_v51 = vpop.f32.mrb[69].mxu0  ;;  %v3236_v1 = vpop.f32.mrb[69].mxu1  ;;  %3414 = vmatmul.mubr.msk.f32.gmra.mrb[174].mxu0 %vm73_vm4, %v2548_v9  ;;  %3581 = vmatmul.mubr.msk.f32.gmra.mrb[174].mxu1 %vm73_vm4, %v2647_v37  ;;  %v2550_v4 = vld [vmem:[%s5586_s0 + $0x450] sm:$0xff]  ;;  %v2649_v9 = vld [vmem:[%s5586_s0 + $0x5d8] sm:$0xff] }
 0x174   :  { %3416 = vmatprep.mubr.msk.f32.mxu0 %vm3682_vm0, %v3683_v6  ;;  %3583 = vmatprep.mubr.msk.f32.mxu1 %vm3682_vm0, %v3683_v6 }
 0x176   :  { %v5043_v51 = vpop.f32.mrb[70].mxu0  ;;  %v5045_v1 = vpop.f32.mrb[70].mxu1 }
 0x177   :  { %5661 = vst [vmem:[#allocation23_spill] sm:$0xff] %v5043_v51  ;;  %5662 = vst [vmem:[#allocation24_spill] sm:$0xff] %v5045_v1  ;;  %v3072_v37 = vpop.f32.mrb[71].mxu0  ;;  %v3239_v16 = vpop.f32.mrb[71].mxu1  ;;  %3417 = vmatmul.mubr.msk.f32.gmra.mrb[176].mxu0 %vm73_vm4, %v2549_v30  ;;  %3584 = vmatmul.mubr.msk.f32.gmra.mrb[176].mxu1 %vm73_vm4, %v2648_v23  ;;  %v2551_v51 = vld [vmem:[%s5586_s0 + $0x458] sm:$0xff]  ;;  %v2650_v30 = vld [vmem:[%s5586_s0 + $0x5e0] sm:$0xff] }
 0x178   :  { %3419 = vmatprep.mubr.msk.f32.mxu0 %vm3682_vm0, %v3683_v6  ;;  %3586 = vmatprep.mubr.msk.f32.mxu1 %vm3682_vm0, %v3683_v6 }
 0x17a   :  { %v5061_v37 = vpop.f32.mrb[72].mxu0  ;;  %v5063_v16 = vpop.f32.mrb[72].mxu1 }
 0x17b   :  { %5663 = vst [vmem:[#allocation25_spill] sm:$0xff] %v5061_v37  ;;  %5664 = vst [vmem:[#allocation26_spill] sm:$0xff] %v5063_v16  ;;  %v3075_v23 = vpop.f32.mrb[73].mxu0  ;;  %v3242_v1 = vpop.f32.mrb[73].mxu1  ;;  %3420 = vmatmul.mubr.msk.f32.gmra.mrb[178].mxu0 %vm73_vm4, %v2550_v4  ;;  %3587 = vmatmul.mubr.msk.f32.gmra.mrb[178].mxu1 %vm73_vm4, %v2649_v9  ;;  %v2552_v37 = vld [vmem:[%s5586_s0 + $0x460] sm:$0xff]  ;;  %v2651_v4 = vld [vmem:[%s5586_s0 + $0x5e8] sm:$0xff] }
 0x17c   :  { %3422 = vmatprep.mubr.msk.f32.mxu0 %vm3682_vm0, %v3683_v6  ;;  %3589 = vmatprep.mubr.msk.f32.mxu1 %vm3682_vm0, %v3683_v6 }
 0x17e   :  { %v5079_v23 = vpop.f32.mrb[74].mxu0  ;;  %v5081_v1 = vpop.f32.mrb[74].mxu1 }
 0x17f   :  { %5665 = vst [vmem:[#allocation27_spill] sm:$0xff] %v5079_v23  ;;  %5666 = vst [vmem:[#allocation28_spill] sm:$0xff] %v5081_v1  ;;  %v3078_v9 = vpop.f32.mrb[75].mxu0  ;;  %v3245_v16 = vpop.f32.mrb[75].mxu1  ;;  %3423 = vmatmul.mubr.msk.f32.gmra.mrb[180].mxu0 %vm73_vm4, %v2551_v51  ;;  %3590 = vmatmul.mubr.msk.f32.gmra.mrb[180].mxu1 %vm73_vm4, %v2650_v30  ;;  %v2553_v23 = vld [vmem:[%s5586_s0 + $0x468] sm:$0xff]  ;;  %v2652_v51 = vld [vmem:[%s5586_s0 + $0x5f0] sm:$0xff] }
 0x180   :  { %3425 = vmatprep.mubr.msk.f32.mxu0 %vm3682_vm0, %v3683_v6  ;;  %3592 = vmatprep.mubr.msk.f32.mxu1 %vm3682_vm0, %v3683_v6 }
 0x182   :  { %v5097_v9 = vpop.f32.mrb[76].mxu0  ;;  %v5099_v16 = vpop.f32.mrb[76].mxu1 }
 0x183   :  { %5667 = vst [vmem:[#allocation29_spill] sm:$0xff] %v5097_v9  ;;  %5668 = vst [vmem:[#allocation30_spill] sm:$0xff] %v5099_v16  ;;  %v3081_v30 = vpop.f32.mrb[77].mxu0  ;;  %v3248_v1 = vpop.f32.mrb[77].mxu1  ;;  %3426 = vmatmul.mubr.msk.f32.gmra.mrb[182].mxu0 %vm73_vm4, %v2552_v37  ;;  %3593 = vmatmul.mubr.msk.f32.gmra.mrb[182].mxu1 %vm73_vm4, %v2651_v4  ;;  %v2554_v9 = vld [vmem:[%s5586_s0 + $0x470] sm:$0xff]  ;;  %v2653_v37 = vld [vmem:[%s5586_s0 + $0x5f8] sm:$0xff] }
 0x184   :  { %3428 = vmatprep.mubr.msk.f32.mxu0 %vm3682_vm0, %v3683_v6  ;;  %3595 = vmatprep.mubr.msk.f32.mxu1 %vm3682_vm0, %v3683_v6 }
 0x186   :  { %v5115_v30 = vpop.f32.mrb[78].mxu0  ;;  %v5117_v1 = vpop.f32.mrb[78].mxu1 }
 0x187   :  { %5669 = vst [vmem:[#allocation31_spill] sm:$0xff] %v5115_v30  ;;  %5670 = vst [vmem:[#allocation32_spill] sm:$0xff] %v5117_v1  ;;  %v3084_v4 = vpop.f32.mrb[79].mxu0  ;;  %v3251_v16 = vpop.f32.mrb[79].mxu1  ;;  %3429 = vmatmul.mubr.msk.f32.gmra.mrb[184].mxu0 %vm73_vm4, %v2553_v23  ;;  %3596 = vmatmul.mubr.msk.f32.gmra.mrb[184].mxu1 %vm73_vm4, %v2652_v51  ;;  %v2555_v30 = vld [vmem:[%s5586_s0 + $0x478] sm:$0xff]  ;;  %v2654_v23 = vld [vmem:[%s5586_s0 + $0x600] sm:$0xff] }
 0x188   :  { %3431 = vmatprep.mubr.msk.f32.mxu0 %vm3682_vm0, %v3683_v6  ;;  %3598 = vmatprep.mubr.msk.f32.mxu1 %vm3682_vm0, %v3683_v6 }
 0x18a   :  { %v5133_v4 = vpop.f32.mrb[80].mxu0  ;;  %v5135_v16 = vpop.f32.mrb[80].mxu1 }
 0x18b   :  { %5671 = vst [vmem:[#allocation33_spill] sm:$0xff] %v5133_v4  ;;  %5672 = vst [vmem:[#allocation34_spill] sm:$0xff] %v5135_v16  ;;  %v3087_v51 = vpop.f32.mrb[81].mxu0  ;;  %v3254_v1 = vpop.f32.mrb[81].mxu1  ;;  %3432 = vmatmul.mubr.msk.f32.gmra.mrb[186].mxu0 %vm73_vm4, %v2554_v9  ;;  %3599 = vmatmul.mubr.msk.f32.gmra.mrb[186].mxu1 %vm73_vm4, %v2653_v37  ;;  %v2556_v4 = vld [vmem:[%s5586_s0 + $0x480] sm:$0xff]  ;;  %v2655_v9 = vld [vmem:[%s5586_s0 + $0x608] sm:$0xff] }
 0x18c   :  { %3434 = vmatprep.mubr.msk.f32.mxu0 %vm3682_vm0, %v3683_v6  ;;  %3601 = vmatprep.mubr.msk.f32.mxu1 %vm3682_vm0, %v3683_v6 }
 0x18e   :  { %v5151_v51 = vpop.f32.mrb[82].mxu0  ;;  %v5153_v1 = vpop.f32.mrb[82].mxu1 }
 0x18f   :  { %5673 = vst [vmem:[#allocation35_spill] sm:$0xff] %v5151_v51  ;;  %5674 = vst [vmem:[#allocation36_spill] sm:$0xff] %v5153_v1  ;;  %v3090_v37 = vpop.f32.mrb[83].mxu0  ;;  %v3257_v16 = vpop.f32.mrb[83].mxu1  ;;  %3435 = vmatmul.mubr.msk.f32.gmra.mrb[188].mxu0 %vm73_vm4, %v2555_v30  ;;  %3602 = vmatmul.mubr.msk.f32.gmra.mrb[188].mxu1 %vm73_vm4, %v2654_v23  ;;  %v2557_v51 = vld [vmem:[%s5586_s0 + $0x488] sm:$0xff]  ;;  %v2656_v30 = vld [vmem:[%s5586_s0 + $0x610] sm:$0xff] }
 0x190   :  { %3437 = vmatprep.mubr.msk.f32.mxu0 %vm3682_vm0, %v3683_v6  ;;  %3604 = vmatprep.mubr.msk.f32.mxu1 %vm3682_vm0, %v3683_v6 }
 0x192   :  { %v5169_v37 = vpop.f32.mrb[84].mxu0  ;;  %v5171_v16 = vpop.f32.mrb[84].mxu1 }
 0x193   :  { %5675 = vst [vmem:[#allocation37_spill] sm:$0xff] %v5169_v37  ;;  %5676 = vst [vmem:[#allocation38_spill] sm:$0xff] %v5171_v16  ;;  %v3093_v23 = vpop.f32.mrb[85].mxu0  ;;  %v3260_v1 = vpop.f32.mrb[85].mxu1  ;;  %3438 = vmatmul.mubr.msk.f32.gmra.mrb[190].mxu0 %vm73_vm4, %v2556_v4  ;;  %3605 = vmatmul.mubr.msk.f32.gmra.mrb[190].mxu1 %vm73_vm4, %v2655_v9  ;;  %v2558_v37 = vld [vmem:[%s5586_s0 + $0x490] sm:$0xff]  ;;  %v2657_v4 = vld [vmem:[%s5586_s0 + $0x618] sm:$0xff] }
 0x194   :  { %3440 = vmatprep.mubr.msk.f32.mxu0 %vm3682_vm0, %v3683_v6  ;;  %3607 = vmatprep.mubr.msk.f32.mxu1 %vm3682_vm0, %v3683_v6 }
 0x196   :  { %v5187_v23 = vpop.f32.mrb[86].mxu0  ;;  %v5189_v1 = vpop.f32.mrb[86].mxu1 }
 0x197   :  { %5677 = vst [vmem:[#allocation39_spill] sm:$0xff] %v5187_v23  ;;  %5678 = vst [vmem:[#allocation40_spill] sm:$0xff] %v5189_v1  ;;  %v3096_v9 = vpop.f32.mrb[87].mxu0  ;;  %v3263_v16 = vpop.f32.mrb[87].mxu1  ;;  %3441 = vmatmul.mubr.msk.f32.gmra.mrb[192].mxu0 %vm73_vm4, %v2557_v51  ;;  %3608 = vmatmul.mubr.msk.f32.gmra.mrb[192].mxu1 %vm73_vm4, %v2656_v30 }
 0x198   :  { %3443 = vmatprep.mubr.msk.f32.mxu0 %vm3682_vm0, %v3683_v6  ;;  %3610 = vmatprep.mubr.msk.f32.mxu1 %vm3682_vm0, %v3683_v6 }
 0x19a   :  { %v5205_v9 = vpop.f32.mrb[88].mxu0  ;;  %v5207_v16 = vpop.f32.mrb[88].mxu1 }
 0x19b   :  { %5679 = vst [vmem:[#allocation41_spill] sm:$0xff] %v5205_v9  ;;  %5680 = vst [vmem:[#allocation42_spill] sm:$0xff] %v5207_v16  ;;  %v3099_v30 = vpop.f32.mrb[89].mxu0  ;;  %v3266_v1 = vpop.f32.mrb[89].mxu1  ;;  %3444 = vmatmul.mubr.msk.f32.gmra.mrb[194].mxu0 %vm73_vm4, %v2558_v37  ;;  %3611 = vmatmul.mubr.msk.f32.gmra.mrb[194].mxu1 %vm73_vm4, %v2657_v4  ;;  %v5240_v16 = vld [vmem:[%s5587_s2] ss:$0 sm:$0xff] }
 0x19e   :  { %v5213_v6 = vpop.f32.mrb[90].mxu0  ;;  %v5215_v23 = vpop.f32.mrb[90].mxu1 }
 0x19f   :  { %5681 = vst [vmem:[#allocation43_spill] sm:$0xff] %v5213_v6  ;;  %5682 = vst [vmem:[#allocation44_spill] sm:$0xff] %v5215_v23  ;;  %v3102_v44 = vpop.f32.mrb[91].mxu0  ;;  %v3269_v54 = vpop.f32.mrb[91].mxu1 }
 0x1a2   :  { %v5219_v58 = vpop.f32.mrb[92].mxu0  ;;  %v5221_v32 = vpop.f32.mrb[92].mxu1 }
 0x1a3   :  { %5683 = vst [vmem:[#allocation45_spill] sm:$0xff] %v5219_v58  ;;  %5684 = vst [vmem:[#allocation46_spill] sm:$0xff] %v5221_v32  ;;  %v3105_v30 = vpop.f32.mrb[93].mxu0  ;;  %v3272_v37 = vpop.f32.mrb[93].mxu1 }
 0x1a6   :  { %v5225_v51 = vpop.f32.mrb[94].mxu0  ;;  %v5227_v4 = vpop.f32.mrb[94].mxu1 }
 0x1a7   :  { %5685 = vst [vmem:[#allocation47_spill] sm:$0xff] %v5225_v51  ;;  %5686 = vst [vmem:[#allocation48_spill] sm:$0xff] %v5227_v4  ;;  %v3108_v9 = vpop.f32.mrb[95].mxu0  ;;  %v3275_v31 = vpop.f32.mrb[95].mxu1 }
 0x1a8   :  { %v5689_v31 = vmax.f32 %v4413_v63, %v4415_v0 }
 0x1aa   :  { %v5231_v44 = vpop.f32.mrb[96].mxu0  ;;  %v5233_v54 = vpop.f32.mrb[96].mxu1 }
 0x1ab   :  { %5687 = vst [vmem:[#allocation49_spill] sm:$0xff] %v5231_v44  ;;  %5688 = vst [vmem:[#allocation50_spill] sm:$0xff] %v5233_v54  ;;  %v3111_v6 = vpop.f32.mrb[97].mxu0  ;;  %v3278_v1 = vpop.f32.mrb[97].mxu1 }
 0x1ae   :  { %v1305_v30 = vpop.f32.mrb[98].mxu0  ;;  %v1812_v37 = vpop.f32.mrb[98].mxu1 }
 0x1af   :  { %v2105_v32 = vmax.f32 %v1305_v30, %v1812_v37  ;;  %v3301_v58 = vpop.f32.mrb[99].mxu0  ;;  %v3468_v18 = vpop.f32.mrb[99].mxu1 }
 0x1b0   :  { %v5690_v18 = vmax.f32 %v4431_v7, %v4433_v8 }
 0x1b1   :  { %v2154_v9 = vmax.f32 %v5689_v31, %v2105_v32 }
 0x1b2   :  { %v1310_v4 = vpop.f32.mrb[100].mxu0  ;;  %v1817_v51 = vpop.f32.mrb[100].mxu1 }
 0x1b3   :  { %v2210_v23 = vadd.f32 %v5240_v16, %v2154_v9  ;;  %v2106_v6 = vmax.f32 %v1310_v4, %v1817_v51  ;;  %v3304_v1 = vpop.f32.mrb[101].mxu0  ;;  %v3471_v54 = vpop.f32.mrb[101].mxu1  ;;  %v5691_v51 = vmax.f32 %v4449_v14, %v4451_v15 }
 0x1b5   :  { %v2259_v44 = vmax.f32 %v2210_v23, 0.0  ;;  %v2155_v58 = vmax.f32 %v5690_v18, %v2106_v6  ;;  %v5692_v18 = vmax.f32 %v4467_v21, %v4469_v22 }
 0x1b6   :  { %v1315_v30 = vpop.f32.mrb[102].mxu0  ;;  %v1822_v37 = vpop.f32.mrb[102].mxu1 }
 0x1b7   :  { %2308 = vst [vmem:[%s5588_s3] sm:$0xff] %v2259_v44  ;;  %v2211_v63 = vadd.f32 %v5240_v16, %v2155_v58  ;;  %v2107_v0 = vmax.f32 %v1315_v30, %v1822_v37  ;;  %v3307_v32 = vpop.f32.mrb[103].mxu0  ;;  %v3474_v31 = vpop.f32.mrb[103].mxu1 }
 0x1b8   :  { %v5693_v31 = vmax.f32 %v4485_v28, %v4487_v29 }
 0x1b9   :  { %v2260_v9 = vmax.f32 %v2211_v63, 0.0  ;;  %v2156_v23 = vmax.f32 %v5691_v51, %v2107_v0 }
 0x1ba   :  { %v1320_v4 = vpop.f32.mrb[104].mxu0  ;;  %v1827_v54 = vpop.f32.mrb[104].mxu1 }
 0x1bb   :  { %2309 = vst [vmem:[%s5588_s3 + $0x8] sm:$0xff] %v2260_v9  ;;  %v2212_v7 = vadd.f32 %v5240_v16, %v2156_v23  ;;  %v2108_v8 = vmax.f32 %v1320_v4, %v1827_v54  ;;  %v3310_v44 = vpop.f32.mrb[105].mxu0  ;;  %v3477_v6 = vpop.f32.mrb[105].mxu1 }
 0x1bd   :  { %v2261_v1 = vmax.f32 %v2212_v7, 0.0  ;;  %v2157_v58 = vmax.f32 %v5692_v18, %v2108_v8  ;;  %v5694_v8 = vmax.f32 %v4503_v35, %v4505_v36 }
 0x1be   :  { %v1325_v30 = vpop.f32.mrb[106].mxu0  ;;  %v1832_v37 = vpop.f32.mrb[106].mxu1 }
 0x1bf   :  { %2310 = vst [vmem:[%s5588_s3 + $0x10] sm:$0xff] %v2261_v1  ;;  %v2213_v14 = vadd.f32 %v5240_v16, %v2157_v58  ;;  %v2109_v15 = vmax.f32 %v1325_v30, %v1832_v37  ;;  %v3313_v63 = vpop.f32.mrb[107].mxu0  ;;  %v3480_v0 = vpop.f32.mrb[107].mxu1  ;;  %v5695_v37 = vmax.f32 %v4521_v42, %v4523_v43 }
 0x1c1   :  { %v2262_v32 = vmax.f32 %v2213_v14, 0.0  ;;  %v2158_v9 = vmax.f32 %v5693_v31, %v2109_v15 }
 0x1c2   :  { %v1330_v51 = vpop.f32.mrb[108].mxu0  ;;  %v1837_v23 = vpop.f32.mrb[108].mxu1 }
 0x1c3   :  { %2311 = vst [vmem:[%s5588_s3 + $0x18] sm:$0xff] %v2262_v32  ;;  %v2214_v21 = vadd.f32 %v5240_v16, %v2158_v9  ;;  %v2110_v22 = vmax.f32 %v1330_v51, %v1837_v23  ;;  %v3316_v4 = vpop.f32.mrb[109].mxu0  ;;  %v3483_v54 = vpop.f32.mrb[109].mxu1  ;;  %v5696_v9 = vmax.f32 %v4539_v49, %v4541_v50 }
 0x1c5   :  { %v2263_v7 = vmax.f32 %v2214_v21, 0.0  ;;  %v2159_v44 = vmax.f32 %v5694_v8, %v2110_v22 }
 0x1c6   :  { %v1335_v6 = vpop.f32.mrb[110].mxu0  ;;  %v1842_v1 = vpop.f32.mrb[110].mxu1 }
 0x1c7   :  { %2312 = vst [vmem:[%s5588_s3 + $0x20] sm:$0xff] %v2263_v7  ;;  %v2215_v28 = vadd.f32 %v5240_v16, %v2159_v44  ;;  %v2111_v29 = vmax.f32 %v1335_v6, %v1842_v1  ;;  %v3319_v18 = vpop.f32.mrb[111].mxu0  ;;  %v3486_v58 = vpop.f32.mrb[111].mxu1  ;;  %v5697_v7 = vmax.f32 %v4557_v56, %v4559_v57 }
 0x1c8   :  { %v5698_v18 = vmax.f32 %v4575_v2, %v4577_v3 }
 0x1c9   :  { %v2264_v30 = vmax.f32 %v2215_v28, 0.0  ;;  %v2160_v14 = vmax.f32 %v5695_v37, %v2111_v29 }
 0x1ca   :  { %v1340_v15 = vpop.f32.mrb[112].mxu0  ;;  %v1847_v63 = vpop.f32.mrb[112].mxu1 }
 0x1cb   :  { %2313 = vst [vmem:[%s5588_s3 + $0x28] sm:$0xff] %v2264_v30  ;;  %v2216_v35 = vadd.f32 %v5240_v16, %v2160_v14  ;;  %v2112_v36 = vmax.f32 %v1340_v15, %v1847_v63  ;;  %v3322_v0 = vpop.f32.mrb[113].mxu0  ;;  %v3489_v32 = vpop.f32.mrb[113].mxu1 }
 0x1cd   :  { %v2265_v31 = vmax.f32 %v2216_v35, 0.0  ;;  %v2161_v51 = vmax.f32 %v5696_v9, %v2112_v36  ;;  %v5699_v35 = vmax.f32 %v4593_v13, %v4595_v17 }
 0x1ce   :  { %v1345_v23 = vpop.f32.mrb[114].mxu0  ;;  %v1852_v21 = vpop.f32.mrb[114].mxu1 }
 0x1cf   :  { %2314 = vst [vmem:[%s5588_s3 + $0x30] sm:$0xff] %v2265_v31  ;;  %v2217_v42 = vadd.f32 %v5240_v16, %v2161_v51  ;;  %v2113_v43 = vmax.f32 %v1345_v23, %v1852_v21  ;;  %v3325_v22 = vpop.f32.mrb[115].mxu0  ;;  %v3492_v4 = vpop.f32.mrb[115].mxu1  ;;  %v5700_v23 = vmax.f32 %v4611_v26, %v4613_v27 }
 0x1d1   :  { %v2266_v54 = vmax.f32 %v2217_v42, 0.0  ;;  %v2162_v8 = vmax.f32 %v5697_v7, %v2113_v43  ;;  %v5701_v7 = vmax.f32 %v4629_v39, %v4631_v40 }
 0x1d2   :  { %v1350_v44 = vpop.f32.mrb[116].mxu0  ;;  %v1857_v6 = vpop.f32.mrb[116].mxu1 }
 0x1d3   :  { %2315 = vst [vmem:[%s5588_s3 + $0x38] sm:$0xff] %v2266_v54  ;;  %v2218_v49 = vadd.f32 %v5240_v16, %v2162_v8  ;;  %v2114_v50 = vmax.f32 %v1350_v44, %v1857_v6  ;;  %v3328_v1 = vpop.f32.mrb[117].mxu0  ;;  %v3495_v28 = vpop.f32.mrb[117].mxu1 }
 0x1d4   :  { %v5702_v28 = vmax.f32 %v4647_v52, %v4649_v53 }
 0x1d5   :  { %v2267_v29 = vmax.f32 %v2218_v49, 0.0  ;;  %v2163_v58 = vmax.f32 %v5698_v18, %v2114_v50 }
 0x1d6   :  { %v1355_v30 = vpop.f32.mrb[118].mxu0  ;;  %v1862_v37 = vpop.f32.mrb[118].mxu1 }
 0x1d7   :  { %2316 = vst [vmem:[%s5588_s3 + $0x40] sm:$0xff] %v2267_v29  ;;  %v2219_v56 = vadd.f32 %v5240_v16, %v2163_v58  ;;  %v2115_v57 = vmax.f32 %v1355_v30, %v1862_v37  ;;  %v3331_v14 = vpop.f32.mrb[119].mxu0  ;;  %v3498_v15 = vpop.f32.mrb[119].mxu1 }
 0x1d9   :  { %v2268_v63 = vmax.f32 %v2219_v56, 0.0  ;;  %v2164_v36 = vmax.f32 %v5699_v35, %v2115_v57  ;;  %v5703_v57 = vmax.f32 %v4665_v62, %v4667_v5 }
 0x1da   :  { %v1360_v0 = vpop.f32.mrb[120].mxu0  ;;  %v1867_v32 = vpop.f32.mrb[120].mxu1 }
 0x1db   :  { %2317 = vst [vmem:[%s5588_s3 + $0x48] sm:$0xff] %v2268_v63  ;;  %v2220_v2 = vadd.f32 %v5240_v16, %v2164_v36  ;;  %v2116_v3 = vmax.f32 %v1360_v0, %v1867_v32  ;;  %v3334_v31 = vpop.f32.mrb[121].mxu0  ;;  %v3501_v9 = vpop.f32.mrb[121].mxu1  ;;  %v5704_v32 = vmax.f32 %v4683_v24, %v4685_v25 }
 0x1dd   :  { %v2269_v51 = vmax.f32 %v2220_v2, 0.0  ;;  %v2165_v21 = vmax.f32 %v5700_v23, %v2116_v3 }
 0x1de   :  { %v1365_v42 = vpop.f32.mrb[122].mxu0  ;;  %v1872_v43 = vpop.f32.mrb[122].mxu1 }
 0x1df   :  { %2318 = vst [vmem:[%s5588_s3 + $0x50] sm:$0xff] %v2269_v51  ;;  %v2221_v13 = vadd.f32 %v5240_v16, %v2165_v21  ;;  %v2117_v17 = vmax.f32 %v1365_v42, %v1872_v43  ;;  %v3337_v22 = vpop.f32.mrb[123].mxu0  ;;  %v3504_v4 = vpop.f32.mrb[123].mxu1  ;;  %v5705_v21 = vmax.f32 %v4701_v46, %v4703_v47 }
 0x1e1   :  { %v2270_v54 = vmax.f32 %v2221_v13, 0.0  ;;  %v2166_v8 = vmax.f32 %v5701_v7, %v2117_v17 }
 0x1e2   :  { %v1370_v44 = vpop.f32.mrb[124].mxu0  ;;  %v1877_v6 = vpop.f32.mrb[124].mxu1 }
 0x1e3   :  { %2319 = vst [vmem:[%s5588_s3 + $0x58] sm:$0xff] %v2270_v54  ;;  %v2222_v26 = vadd.f32 %v5240_v16, %v2166_v8  ;;  %v2118_v27 = vmax.f32 %v1370_v44, %v1877_v6  ;;  %v3340_v49 = vpop.f32.mrb[125].mxu0  ;;  %v3507_v50 = vpop.f32.mrb[125].mxu1  ;;  %v5706_v54 = vmax.f32 %v4719_v11, %v4721_v12 }
 0x1e4   :  { %v5707_v49 = vmax.f32 %v4737_v45, %v4739_v55 }
 0x1e5   :  { %v2271_v1 = vmax.f32 %v2222_v26, 0.0  ;;  %v2167_v29 = vmax.f32 %v5702_v28, %v2118_v27 }
 0x1e6   :  { %v1375_v18 = vpop.f32.mrb[126].mxu0  ;;  %v1882_v58 = vpop.f32.mrb[126].mxu1 }
 0x1e7   :  { %2320 = vst [vmem:[%s5588_s3 + $0x60] sm:$0xff] %v2271_v1  ;;  %v2223_v39 = vadd.f32 %v5240_v16, %v2167_v29  ;;  %v2119_v40 = vmax.f32 %v1375_v18, %v1882_v58  ;;  %v3343_v30 = vpop.f32.mrb[127].mxu0  ;;  %v3510_v37 = vpop.f32.mrb[127].mxu1 }
 0x1e9   :  { %v2272_v56 = vmax.f32 %v2223_v39, 0.0  ;;  %v2168_v14 = vmax.f32 %v5703_v57, %v2119_v40  ;;  %v5708_v39 = vmax.f32 %v4755_v60, %v4757_v61 }
 0x1ea   :  { %v1380_v15 = vpop.f32.mrb[128].mxu0  ;;  %v1887_v63 = vpop.f32.mrb[128].mxu1 }
 0x1eb   :  { %2321 = vst [vmem:[%s5588_s3 + $0x68] sm:$0xff] %v2272_v56  ;;  %v2224_v52 = vadd.f32 %v5240_v16, %v2168_v14  ;;  %v2120_v53 = vmax.f32 %v1380_v15, %v1887_v63  ;;  %v3346_v35 = vpop.f32.mrb[129].mxu0  ;;  %v3513_v36 = vpop.f32.mrb[129].mxu1  ;;  %v5709_v15 = vmax.f32 %v4773_v38, %v4775_v59 }
 0x1ed   :  { %v2273_v0 = vmax.f32 %v2224_v52, 0.0  ;;  %v2169_v2 = vmax.f32 %v5704_v32, %v2120_v53  ;;  %v5710_v32 = vmax.f32 %v4791_v33, %v4793_v48 }
 0x1ee   :  { %v1385_v3 = vpop.f32.mrb[130].mxu0  ;;  %v1892_v31 = vpop.f32.mrb[130].mxu1 }
 0x1ef   :  { %2322 = vst [vmem:[%s5588_s3 + $0x70] sm:$0xff] %v2273_v0  ;;  %v2225_v62 = vadd.f32 %v5240_v16, %v2169_v2  ;;  %v2121_v5 = vmax.f32 %v1385_v3, %v1892_v31  ;;  %v3349_v9 = vpop.f32.mrb[131].mxu0  ;;  %v3516_v51 = vpop.f32.mrb[131].mxu1 }
 0x1f0   :  { %v5711_v51 = vmax.f32 %v4809_v34, %v4811_v10 }
 0x1f1   :  { %v2274_v23 = vmax.f32 %v2225_v62, 0.0  ;;  %v2170_v42 = vmax.f32 %v5705_v21, %v2121_v5 }
 0x1f2   :  { %v1390_v43 = vpop.f32.mrb[132].mxu0  ;;  %v1897_v13 = vpop.f32.mrb[132].mxu1 }
 0x1f3   :  { %2323 = vst [vmem:[%s5588_s3 + $0x78] sm:$0xff] %v2274_v23  ;;  %v2226_v24 = vadd.f32 %v5240_v16, %v2170_v42  ;;  %v2122_v25 = vmax.f32 %v1390_v43, %v1897_v13  ;;  %v3352_v17 = vpop.f32.mrb[133].mxu0  ;;  %v3519_v22 = vpop.f32.mrb[133].mxu1 }
 0x1f5   :  { %v2275_v4 = vmax.f32 %v2226_v24, 0.0  ;;  %v2171_v7 = vmax.f32 %v5706_v54, %v2122_v25  ;;  %v5712_v25 = vmax.f32 %v4827_v20, %v4829_v41 }
 0x1f6   :  { %v1395_v8 = vpop.f32.mrb[134].mxu0  ;;  %v1902_v44 = vpop.f32.mrb[134].mxu1 }
 0x1f7   :  { %2324 = vst [vmem:[%s5588_s3 + $0x80] sm:$0xff] %v2275_v4  ;;  %v2227_v46 = vadd.f32 %v5240_v16, %v2171_v7  ;;  %v2123_v47 = vmax.f32 %v1395_v8, %v1902_v44  ;;  %v3355_v6 = vpop.f32.mrb[135].mxu0  ;;  %v3522_v26 = vpop.f32.mrb[135].mxu1  ;;  %v5713_v44 = vld [vmem:[#allocation2_spill] sm:$0xff] }
 0x1f9   :  { %v2276_v27 = vmax.f32 %v2227_v46, 0.0  ;;  %v2172_v50 = vmax.f32 %v5707_v49, %v2123_v47  ;;  %v5714_v46 = vmax.f32 %v4845_v19, %v5713_v44 }
 0x1fa   :  { %v1400_v1 = vpop.f32.mrb[136].mxu0  ;;  %v1907_v28 = vpop.f32.mrb[136].mxu1 }
 0x1fb   :  { %2325 = vst [vmem:[%s5588_s3 + $0x88] sm:$0xff] %v2276_v27  ;;  %v2228_v11 = vadd.f32 %v5240_v16, %v2172_v50  ;;  %v2124_v12 = vmax.f32 %v1400_v1, %v1907_v28  ;;  %v3358_v29 = vpop.f32.mrb[137].mxu0  ;;  %v3525_v18 = vpop.f32.mrb[137].mxu1  ;;  %v5715_v1 = vld [vmem:[#allocation3_spill] sm:$0xff]  ;;  %v5716_v28 = vld [vmem:[#allocation4_spill] sm:$0xff] }
 0x1fd   :  { %v2277_v58 = vmax.f32 %v2228_v11, 0.0  ;;  %v2173_v40 = vmax.f32 %v5708_v39, %v2124_v12  ;;  %v5717_v11 = vmax.f32 %v5715_v1, %v5716_v28 }
 0x1fe   :  { %v1405_v30 = vpop.f32.mrb[138].mxu0  ;;  %v1912_v37 = vpop.f32.mrb[138].mxu1 }
 0x1ff   :  { %2326 = vst [vmem:[%s5588_s3 + $0x90] sm:$0xff] %v2277_v58  ;;  %v2229_v45 = vadd.f32 %v5240_v16, %v2173_v40  ;;  %v2125_v55 = vmax.f32 %v1405_v30, %v1912_v37  ;;  %v3361_v56 = vpop.f32.mrb[139].mxu0  ;;  %v3528_v57 = vpop.f32.mrb[139].mxu1  ;;  %v5718_v37 = vld [vmem:[#allocation5_spill] sm:$0xff] }
 0x201   :  { %v2278_v14 = vmax.f32 %v2229_v45, 0.0  ;;  %v2174_v63 = vmax.f32 %v5709_v15, %v2125_v55  ;;  %v5719_v45 = vld [vmem:[#allocation6_spill] sm:$0xff] }
 0x202   :  { %v1410_v52 = vpop.f32.mrb[140].mxu0  ;;  %v1917_v53 = vpop.f32.mrb[140].mxu1  ;;  %v5720_v55 = vmax.f32 %v5718_v37, %v5719_v45 }
 0x203   :  { %2327 = vst [vmem:[%s5588_s3 + $0x98] sm:$0xff] %v2278_v14  ;;  %v2230_v60 = vadd.f32 %v5240_v16, %v2174_v63  ;;  %v2126_v61 = vmax.f32 %v1410_v52, %v1917_v53  ;;  %v3364_v35 = vpop.f32.mrb[141].mxu0  ;;  %v3531_v36 = vpop.f32.mrb[141].mxu1 }
 0x204   :  { %v5722_v35 = vld [vmem:[#allocation8_spill] sm:$0xff] }
 0x205   :  { %v2279_v0 = vmax.f32 %v2230_v60, 0.0  ;;  %v2175_v2 = vmax.f32 %v5710_v32, %v2126_v61  ;;  %v5721_v61 = vld [vmem:[#allocation7_spill] sm:$0xff] }
 0x206   :  { %v1415_v3 = vpop.f32.mrb[142].mxu0  ;;  %v1922_v31 = vpop.f32.mrb[142].mxu1  ;;  %v5723_v36 = vmax.f32 %v5721_v61, %v5722_v35 }
 0x207   :  { %2328 = vst [vmem:[%s5588_s3 + $0xa0] sm:$0xff] %v2279_v0  ;;  %v2231_v38 = vadd.f32 %v5240_v16, %v2175_v2  ;;  %v2127_v59 = vmax.f32 %v1415_v3, %v1922_v31  ;;  %v3367_v62 = vpop.f32.mrb[143].mxu0  ;;  %v3534_v5 = vpop.f32.mrb[143].mxu1 }
 0x208   :  { %v5724_v5 = vld [vmem:[#allocation9_spill] sm:$0xff] }
 0x209   :  { %v2280_v9 = vmax.f32 %v2231_v38, 0.0  ;;  %v2176_v23 = vmax.f32 %v5711_v51, %v2127_v59 }
 0x20a   :  { %v1420_v21 = vpop.f32.mrb[144].mxu0  ;;  %v1927_v42 = vpop.f32.mrb[144].mxu1 }
 0x20b   :  { %2329 = vst [vmem:[%s5588_s3 + $0xa8] sm:$0xff] %v2280_v9  ;;  %v2232_v33 = vadd.f32 %v5240_v16, %v2176_v23  ;;  %v2128_v48 = vmax.f32 %v1420_v21, %v1927_v42  ;;  %v3370_v43 = vpop.f32.mrb[145].mxu0  ;;  %v3537_v13 = vpop.f32.mrb[145].mxu1  ;;  %v5725_v9 = vld [vmem:[#allocation10_spill] sm:$0xff] }
 0x20c   :  { %v5726_v51 = vmax.f32 %v5724_v5, %v5725_v9 }
 0x20d   :  { %v2281_v24 = vmax.f32 %v2232_v33, 0.0  ;;  %v2177_v17 = vmax.f32 %v5712_v25, %v2128_v48  ;;  %v5727_v25 = vld [vmem:[#allocation11_spill] sm:$0xff] }
 0x20e   :  { %v1425_v22 = vpop.f32.mrb[146].mxu0  ;;  %v1932_v4 = vpop.f32.mrb[146].mxu1 }
 0x20f   :  { %2330 = vst [vmem:[%s5588_s3 + $0xb0] sm:$0xff] %v2281_v24  ;;  %v2233_v34 = vadd.f32 %v5240_v16, %v2177_v17  ;;  %v2129_v10 = vmax.f32 %v1425_v22, %v1932_v4  ;;  %v3373_v54 = vpop.f32.mrb[147].mxu0  ;;  %v3540_v7 = vpop.f32.mrb[147].mxu1  ;;  %v5728_v17 = vld [vmem:[#allocation12_spill] sm:$0xff] }
 0x210   :  { %v5729_v22 = vmax.f32 %v5727_v25, %v5728_v17 }
 0x211   :  { %v2282_v8 = vmax.f32 %v2233_v34, 0.0  ;;  %v2178_v47 = vmax.f32 %v5714_v46, %v2129_v10 }
 0x212   :  { %v1430_v6 = vpop.f32.mrb[148].mxu0  ;;  %v1937_v26 = vpop.f32.mrb[148].mxu1 }
 0x213   :  { %2331 = vst [vmem:[%s5588_s3 + $0xb8] sm:$0xff] %v2282_v8  ;;  %v2234_v20 = vadd.f32 %v5240_v16, %v2178_v47  ;;  %v2130_v41 = vmax.f32 %v1430_v6, %v1937_v26  ;;  %v3376_v27 = vpop.f32.mrb[149].mxu0  ;;  %v3543_v49 = vpop.f32.mrb[149].mxu1  ;;  %v5730_v47 = vld [vmem:[#allocation13_spill] sm:$0xff]  ;;  %v5731_v6 = vld [vmem:[#allocation14_spill] sm:$0xff] }
 0x214   :  { %v5732_v26 = vmax.f32 %v5730_v47, %v5731_v6 }
 0x215   :  { %v2283_v50 = vmax.f32 %v2234_v20, 0.0  ;;  %v2179_v12 = vmax.f32 %v5717_v11, %v2130_v41 }
 0x216   :  { %v1435_v29 = vpop.f32.mrb[150].mxu0  ;;  %v1942_v18 = vpop.f32.mrb[150].mxu1 }
 0x217   :  { %2332 = vst [vmem:[%s5588_s3 + $0xc0] sm:$0xff] %v2283_v50  ;;  %v2235_v19 = vadd.f32 %v5240_v16, %v2179_v12  ;;  %v2131_v58 = vmax.f32 %v1435_v29, %v1942_v18  ;;  %v3379_v39 = vpop.f32.mrb[151].mxu0  ;;  %v3546_v40 = vpop.f32.mrb[151].mxu1  ;;  %v5733_v12 = vld [vmem:[#allocation15_spill] sm:$0xff]  ;;  %v5734_v29 = vld [vmem:[#allocation16_spill] sm:$0xff] }
 0x218   :  { %v5735_v18 = vmax.f32 %v5733_v12, %v5734_v29 }
 0x219   :  { %v2284_v30 = vmax.f32 %v2235_v19, 0.0  ;;  %v2180_v56 = vmax.f32 %v5720_v55, %v2131_v58 }
 0x21a   :  { %v1440_v57 = vpop.f32.mrb[152].mxu0  ;;  %v1947_v14 = vpop.f32.mrb[152].mxu1 }
 0x21b   :  { %2333 = vst [vmem:[%s5588_s3 + $0xc8] sm:$0xff] %v2284_v30  ;;  %v2236_v15 = vadd.f32 %v5240_v16, %v2180_v56  ;;  %v2132_v63 = vmax.f32 %v1440_v57, %v1947_v14  ;;  %v3382_v52 = vpop.f32.mrb[153].mxu0  ;;  %v3549_v53 = vpop.f32.mrb[153].mxu1  ;;  %v5736_v56 = vld [vmem:[#allocation17_spill] sm:$0xff]  ;;  %v5737_v57 = vld [vmem:[#allocation18_spill] sm:$0xff] }
 0x21c   :  { %v5738_v14 = vmax.f32 %v5736_v56, %v5737_v57 }
 0x21d   :  { %v2285_v60 = vmax.f32 %v2236_v15, 0.0  ;;  %v2181_v0 = vmax.f32 %v5723_v36, %v2132_v63 }
 0x21e   :  { %v1445_v32 = vpop.f32.mrb[154].mxu0  ;;  %v1952_v2 = vpop.f32.mrb[154].mxu1 }
 0x21f   :  { %2334 = vst [vmem:[%s5588_s3 + $0xd0] sm:$0xff] %v2285_v60  ;;  %v2237_v3 = vadd.f32 %v5240_v16, %v2181_v0  ;;  %v2133_v31 = vmax.f32 %v1445_v32, %v1952_v2  ;;  %v3385_v38 = vpop.f32.mrb[155].mxu0  ;;  %v3552_v59 = vpop.f32.mrb[155].mxu1  ;;  %v5739_v0 = vld [vmem:[#allocation19_spill] sm:$0xff]  ;;  %v5740_v32 = vld [vmem:[#allocation20_spill] sm:$0xff] }
 0x220   :  { %v5741_v2 = vmax.f32 %v5739_v0, %v5740_v32 }
 0x221   :  { %v2286_v62 = vmax.f32 %v2237_v3, 0.0  ;;  %v2182_v23 = vmax.f32 %v5726_v51, %v2133_v31 }
 0x222   :  { %v1450_v21 = vpop.f32.mrb[156].mxu0  ;;  %v1957_v42 = vpop.f32.mrb[156].mxu1 }
 0x223   :  { %2335 = vst [vmem:[%s5588_s3 + $0xd8] sm:$0xff] %v2286_v62  ;;  %v2238_v33 = vadd.f32 %v5240_v16, %v2182_v23  ;;  %v2134_v48 = vmax.f32 %v1450_v21, %v1957_v42  ;;  %v3388_v43 = vpop.f32.mrb[157].mxu0  ;;  %v3555_v13 = vpop.f32.mrb[157].mxu1  ;;  %v5742_v23 = vld [vmem:[#allocation21_spill] sm:$0xff]  ;;  %v5743_v21 = vld [vmem:[#allocation22_spill] sm:$0xff] }
 0x224   :  { %v5744_v42 = vmax.f32 %v5742_v23, %v5743_v21 }
 0x225   :  { %v2287_v24 = vmax.f32 %v2238_v33, 0.0  ;;  %v2183_v4 = vmax.f32 %v5729_v22, %v2134_v48 }
 0x226   :  { %v1455_v34 = vpop.f32.mrb[158].mxu0  ;;  %v1962_v10 = vpop.f32.mrb[158].mxu1 }
 0x227   :  { %2336 = vst [vmem:[%s5588_s3 + $0xe0] sm:$0xff] %v2287_v24  ;;  %v2239_v54 = vadd.f32 %v5240_v16, %v2183_v4  ;;  %v2135_v7 = vmax.f32 %v1455_v34, %v1962_v10  ;;  %v3391_v8 = vpop.f32.mrb[159].mxu0  ;;  %v3558_v44 = vpop.f32.mrb[159].mxu1  ;;  %v5745_v4 = vld [vmem:[#allocation23_spill] sm:$0xff]  ;;  %v5746_v34 = vld [vmem:[#allocation24_spill] sm:$0xff] }
 0x228   :  { %v5747_v10 = vmax.f32 %v5745_v4, %v5746_v34 }
 0x229   :  { %v2288_v46 = vmax.f32 %v2239_v54, 0.0  ;;  %v2184_v20 = vmax.f32 %v5732_v26, %v2135_v7 }
 0x22a   :  { %v1460_v41 = vpop.f32.mrb[160].mxu0  ;;  %v1967_v27 = vpop.f32.mrb[160].mxu1 }
 0x22b   :  { %2337 = vst [vmem:[%s5588_s3 + $0xe8] sm:$0xff] %v2288_v46  ;;  %v2240_v49 = vadd.f32 %v5240_v16, %v2184_v20  ;;  %v2136_v50 = vmax.f32 %v1460_v41, %v1967_v27  ;;  %v3394_v1 = vpop.f32.mrb[161].mxu0  ;;  %v3561_v28 = vpop.f32.mrb[161].mxu1  ;;  %v5748_v20 = vld [vmem:[#allocation25_spill] sm:$0xff]  ;;  %v5749_v41 = vld [vmem:[#allocation26_spill] sm:$0xff] }
 0x22c   :  { %v5750_v27 = vmax.f32 %v5748_v20, %v5749_v41 }
 0x22d   :  { %v2289_v11 = vmax.f32 %v2240_v49, 0.0  ;;  %v2185_v19 = vmax.f32 %v5735_v18, %v2136_v50 }
 0x22e   :  { %v1465_v58 = vpop.f32.mrb[162].mxu0  ;;  %v1972_v39 = vpop.f32.mrb[162].mxu1 }
 0x22f   :  { %2338 = vst [vmem:[%s5588_s3 + $0xf0] sm:$0xff] %v2289_v11  ;;  %v2241_v40 = vadd.f32 %v5240_v16, %v2185_v19  ;;  %v2137_v30 = vmax.f32 %v1465_v58, %v1972_v39  ;;  %v3397_v37 = vpop.f32.mrb[163].mxu0  ;;  %v3564_v45 = vpop.f32.mrb[163].mxu1  ;;  %v5751_v19 = vld [vmem:[#allocation27_spill] sm:$0xff]  ;;  %v5752_v58 = vld [vmem:[#allocation28_spill] sm:$0xff] }
 0x230   :  { %v5753_v39 = vmax.f32 %v5751_v19, %v5752_v58 }
 0x231   :  { %v2290_v55 = vmax.f32 %v2241_v40, 0.0  ;;  %v2186_v15 = vmax.f32 %v5738_v14, %v2137_v30 }
 0x232   :  { %v1470_v63 = vpop.f32.mrb[164].mxu0  ;;  %v1977_v52 = vpop.f32.mrb[164].mxu1 }
 0x233   :  { %2339 = vst [vmem:[%s5588_s3 + $0xf8] sm:$0xff] %v2290_v55  ;;  %v2242_v53 = vadd.f32 %v5240_v16, %v2186_v15  ;;  %v2138_v60 = vmax.f32 %v1470_v63, %v1977_v52  ;;  %v3400_v61 = vpop.f32.mrb[165].mxu0  ;;  %v3567_v35 = vpop.f32.mrb[165].mxu1  ;;  %v5754_v15 = vld [vmem:[#allocation29_spill] sm:$0xff]  ;;  %v5755_v63 = vld [vmem:[#allocation30_spill] sm:$0xff] }
 0x234   :  { %v5756_v52 = vmax.f32 %v5754_v15, %v5755_v63 }
 0x235   :  { %v2291_v36 = vmax.f32 %v2242_v53, 0.0  ;;  %v2187_v3 = vmax.f32 %v5741_v2, %v2138_v60 }
 0x236   :  { %v1475_v31 = vpop.f32.mrb[166].mxu0  ;;  %v1982_v38 = vpop.f32.mrb[166].mxu1 }
 0x237   :  { %2340 = vst [vmem:[%s5588_s3 + $0x100] sm:$0xff] %v2291_v36  ;;  %v2243_v59 = vadd.f32 %v5240_v16, %v2187_v3  ;;  %v2139_v62 = vmax.f32 %v1475_v31, %v1982_v38  ;;  %v3403_v5 = vpop.f32.mrb[167].mxu0  ;;  %v3570_v9 = vpop.f32.mrb[167].mxu1  ;;  %v5757_v3 = vld [vmem:[#allocation31_spill] sm:$0xff]  ;;  %v5758_v31 = vld [vmem:[#allocation32_spill] sm:$0xff] }
 0x238   :  { %v5759_v38 = vmax.f32 %v5757_v3, %v5758_v31 }
 0x239   :  { %v2292_v51 = vmax.f32 %v2243_v59, 0.0  ;;  %v2188_v33 = vmax.f32 %v5744_v42, %v2139_v62 }
 0x23a   :  { %v1480_v48 = vpop.f32.mrb[168].mxu0  ;;  %v1987_v43 = vpop.f32.mrb[168].mxu1 }
 0x23b   :  { %2341 = vst [vmem:[%s5588_s3 + $0x108] sm:$0xff] %v2292_v51  ;;  %v2244_v13 = vadd.f32 %v5240_v16, %v2188_v33  ;;  %v2140_v24 = vmax.f32 %v1480_v48, %v1987_v43  ;;  %v3406_v25 = vpop.f32.mrb[169].mxu0  ;;  %v3573_v17 = vpop.f32.mrb[169].mxu1  ;;  %v5760_v33 = vld [vmem:[#allocation33_spill] sm:$0xff]  ;;  %v5761_v48 = vld [vmem:[#allocation34_spill] sm:$0xff] }
 0x23c   :  { %v5762_v43 = vmax.f32 %v5760_v33, %v5761_v48 }
 0x23d   :  { %v2293_v22 = vmax.f32 %v2244_v13, 0.0  ;;  %v2189_v54 = vmax.f32 %v5747_v10, %v2140_v24 }
 0x23e   :  { %v1485_v7 = vpop.f32.mrb[170].mxu0  ;;  %v1992_v8 = vpop.f32.mrb[170].mxu1 }
 0x23f   :  { %2342 = vst [vmem:[%s5588_s3 + $0x110] sm:$0xff] %v2293_v22  ;;  %v2245_v44 = vadd.f32 %v5240_v16, %v2189_v54  ;;  %v2141_v46 = vmax.f32 %v1485_v7, %v1992_v8  ;;  %v3409_v47 = vpop.f32.mrb[171].mxu0  ;;  %v3576_v6 = vpop.f32.mrb[171].mxu1  ;;  %v5763_v54 = vld [vmem:[#allocation35_spill] sm:$0xff]  ;;  %v5764_v7 = vld [vmem:[#allocation36_spill] sm:$0xff] }
 0x240   :  { %v5765_v8 = vmax.f32 %v5763_v54, %v5764_v7 }
 0x241   :  { %v2294_v26 = vmax.f32 %v2245_v44, 0.0  ;;  %v2190_v49 = vmax.f32 %v5750_v27, %v2141_v46 }
 0x242   :  { %v1490_v50 = vpop.f32.mrb[172].mxu0  ;;  %v1997_v1 = vpop.f32.mrb[172].mxu1 }
 0x243   :  { %2343 = vst [vmem:[%s5588_s3 + $0x118] sm:$0xff] %v2294_v26  ;;  %v2246_v28 = vadd.f32 %v5240_v16, %v2190_v49  ;;  %v2142_v11 = vmax.f32 %v1490_v50, %v1997_v1  ;;  %v3412_v12 = vpop.f32.mrb[173].mxu0  ;;  %v3579_v29 = vpop.f32.mrb[173].mxu1  ;;  %v5766_v49 = vld [vmem:[#allocation37_spill] sm:$0xff]  ;;  %v5767_v50 = vld [vmem:[#allocation38_spill] sm:$0xff] }
 0x244   :  { %v5768_v1 = vmax.f32 %v5766_v49, %v5767_v50 }
 0x245   :  { %v2295_v18 = vmax.f32 %v2246_v28, 0.0  ;;  %v2191_v40 = vmax.f32 %v5753_v39, %v2142_v11 }
 0x246   :  { %v1495_v30 = vpop.f32.mrb[174].mxu0  ;;  %v2002_v37 = vpop.f32.mrb[174].mxu1 }
 0x247   :  { %2344 = vst [vmem:[%s5588_s3 + $0x120] sm:$0xff] %v2295_v18  ;;  %v2247_v45 = vadd.f32 %v5240_v16, %v2191_v40  ;;  %v2143_v55 = vmax.f32 %v1495_v30, %v2002_v37  ;;  %v3415_v56 = vpop.f32.mrb[175].mxu0  ;;  %v3582_v57 = vpop.f32.mrb[175].mxu1  ;;  %v5769_v40 = vld [vmem:[#allocation39_spill] sm:$0xff]  ;;  %v5770_v30 = vld [vmem:[#allocation40_spill] sm:$0xff] }
 0x248   :  { %v5771_v37 = vmax.f32 %v5769_v40, %v5770_v30 }
 0x249   :  { %v2296_v14 = vmax.f32 %v2247_v45, 0.0  ;;  %v2192_v53 = vmax.f32 %v5756_v52, %v2143_v55 }
 0x24a   :  { %v1500_v60 = vpop.f32.mrb[176].mxu0  ;;  %v2007_v61 = vpop.f32.mrb[176].mxu1 }
 0x24b   :  { %2345 = vst [vmem:[%s5588_s3 + $0x128] sm:$0xff] %v2296_v14  ;;  %v2248_v35 = vadd.f32 %v5240_v16, %v2192_v53  ;;  %v2144_v36 = vmax.f32 %v1500_v60, %v2007_v61  ;;  %v3418_v0 = vpop.f32.mrb[177].mxu0  ;;  %v3585_v32 = vpop.f32.mrb[177].mxu1  ;;  %v5772_v53 = vld [vmem:[#allocation41_spill] sm:$0xff]  ;;  %v5773_v60 = vld [vmem:[#allocation42_spill] sm:$0xff] }
 0x24c   :  { %v5774_v61 = vmax.f32 %v5772_v53, %v5773_v60 }
 0x24d   :  { %v2297_v2 = vmax.f32 %v2248_v35, 0.0  ;;  %v2193_v59 = vmax.f32 %v5759_v38, %v2144_v36 }
 0x24e   :  { %v1505_v62 = vpop.f32.mrb[178].mxu0  ;;  %v2012_v5 = vpop.f32.mrb[178].mxu1 }
 0x24f   :  { %2346 = vst [vmem:[%s5588_s3 + $0x130] sm:$0xff] %v2297_v2  ;;  %v2249_v9 = vadd.f32 %v5240_v16, %v2193_v59  ;;  %v2145_v51 = vmax.f32 %v1505_v62, %v2012_v5  ;;  %v3421_v23 = vpop.f32.mrb[179].mxu0  ;;  %v3588_v21 = vpop.f32.mrb[179].mxu1  ;;  %v5775_v59 = vld [vmem:[#allocation43_spill] sm:$0xff]  ;;  %v5776_v62 = vld [vmem:[#allocation44_spill] sm:$0xff] }
 0x250   :  { %v5777_v5 = vmax.f32 %v5775_v59, %v5776_v62 }
 0x251   :  { %v2298_v42 = vmax.f32 %v2249_v9, 0.0  ;;  %v2194_v13 = vmax.f32 %v5762_v43, %v2145_v51 }
 0x252   :  { %v1510_v24 = vpop.f32.mrb[180].mxu0  ;;  %v2017_v25 = vpop.f32.mrb[180].mxu1 }
 0x253   :  { %2347 = vst [vmem:[%s5588_s3 + $0x138] sm:$0xff] %v2298_v42  ;;  %v2250_v17 = vadd.f32 %v5240_v16, %v2194_v13  ;;  %v2146_v22 = vmax.f32 %v1510_v24, %v2017_v25  ;;  %v3424_v4 = vpop.f32.mrb[181].mxu0  ;;  %v3591_v34 = vpop.f32.mrb[181].mxu1  ;;  %v5778_v13 = vld [vmem:[#allocation45_spill] sm:$0xff]  ;;  %v5779_v24 = vld [vmem:[#allocation46_spill] sm:$0xff] }
 0x254   :  { %v5780_v25 = vmax.f32 %v5778_v13, %v5779_v24 }
 0x255   :  { %v2299_v10 = vmax.f32 %v2250_v17, 0.0  ;;  %v2195_v44 = vmax.f32 %v5765_v8, %v2146_v22 }
 0x256   :  { %v1515_v46 = vpop.f32.mrb[182].mxu0  ;;  %v2022_v47 = vpop.f32.mrb[182].mxu1 }
 0x257   :  { %2348 = vst [vmem:[%s5588_s3 + $0x140] sm:$0xff] %v2299_v10  ;;  %v2251_v6 = vadd.f32 %v5240_v16, %v2195_v44  ;;  %v2147_v26 = vmax.f32 %v1515_v46, %v2022_v47  ;;  %v3427_v20 = vpop.f32.mrb[183].mxu0  ;;  %v3594_v41 = vpop.f32.mrb[183].mxu1  ;;  %v5781_v44 = vld [vmem:[#allocation47_spill] sm:$0xff]  ;;  %v5782_v46 = vld [vmem:[#allocation48_spill] sm:$0xff] }
 0x258   :  { %v5783_v47 = vmax.f32 %v5781_v44, %v5782_v46 }
 0x259   :  { %v2300_v27 = vmax.f32 %v2251_v6, 0.0  ;;  %v2196_v28 = vmax.f32 %v5768_v1, %v2147_v26 }
 0x25a   :  { %v1520_v11 = vpop.f32.mrb[184].mxu0  ;;  %v2027_v12 = vpop.f32.mrb[184].mxu1 }
 0x25b   :  { %2349 = vst [vmem:[%s5588_s3 + $0x148] sm:$0xff] %v2300_v27  ;;  %v2252_v29 = vadd.f32 %v5240_v16, %v2196_v28  ;;  %v2148_v18 = vmax.f32 %v1520_v11, %v2027_v12  ;;  %v3430_v19 = vpop.f32.mrb[185].mxu0  ;;  %v3597_v58 = vpop.f32.mrb[185].mxu1  ;;  %v5784_v28 = vld [vmem:[#allocation49_spill] sm:$0xff]  ;;  %v5785_v11 = vld [vmem:[#allocation50_spill] sm:$0xff] }
 0x25c   :  { %v5786_v12 = vmax.f32 %v5784_v28, %v5785_v11 }
 0x25d   :  { %v2301_v39 = vmax.f32 %v2252_v29, 0.0  ;;  %v2197_v45 = vmax.f32 %v5771_v37, %v2148_v18 }
 0x25e   :  { %v1525_v55 = vpop.f32.mrb[186].mxu0  ;;  %v2032_v56 = vpop.f32.mrb[186].mxu1 }
 0x25f   :  { %2350 = vst [vmem:[%s5588_s3 + $0x150] sm:$0xff] %v2301_v39  ;;  %v2253_v57 = vadd.f32 %v5240_v16, %v2197_v45  ;;  %v2149_v14 = vmax.f32 %v1525_v55, %v2032_v56  ;;  %v3433_v15 = vpop.f32.mrb[187].mxu0  ;;  %v3600_v63 = vpop.f32.mrb[187].mxu1 }
 0x261   :  { %v2302_v52 = vmax.f32 %v2253_v57, 0.0  ;;  %v2198_v35 = vmax.f32 %v5774_v61, %v2149_v14 }
 0x262   :  { %v1530_v36 = vpop.f32.mrb[188].mxu0  ;;  %v2037_v0 = vpop.f32.mrb[188].mxu1 }
 0x263   :  { %2351 = vst [vmem:[%s5588_s3 + $0x158] sm:$0xff] %v2302_v52  ;;  %v2254_v32 = vadd.f32 %v5240_v16, %v2198_v35  ;;  %v2150_v2 = vmax.f32 %v1530_v36, %v2037_v0  ;;  %v3436_v3 = vpop.f32.mrb[189].mxu0  ;;  %v3603_v31 = vpop.f32.mrb[189].mxu1 }
 0x265   :  { %v2303_v38 = vmax.f32 %v2254_v32, 0.0  ;;  %v2199_v9 = vmax.f32 %v5777_v5, %v2150_v2 }
 0x266   :  { %v1535_v51 = vpop.f32.mrb[190].mxu0  ;;  %v2042_v23 = vpop.f32.mrb[190].mxu1 }
 0x267   :  { %2352 = vst [vmem:[%s5588_s3 + $0x160] sm:$0xff] %v2303_v38  ;;  %v2255_v21 = vadd.f32 %v5240_v16, %v2199_v9  ;;  %v2151_v42 = vmax.f32 %v1535_v51, %v2042_v23  ;;  %v3439_v33 = vpop.f32.mrb[191].mxu0  ;;  %v3606_v48 = vpop.f32.mrb[191].mxu1 }
 0x269   :  { %v2304_v43 = vmax.f32 %v2255_v21, 0.0  ;;  %v2200_v17 = vmax.f32 %v5780_v25, %v2151_v42 }
 0x26a   :  { %v1540_v22 = vpop.f32.mrb[192].mxu0  ;;  %v2047_v4 = vpop.f32.mrb[192].mxu1 }
 0x26b   :  { %2353 = vst [vmem:[%s5588_s3 + $0x168] sm:$0xff] %v2304_v43  ;;  %v2256_v34 = vadd.f32 %v5240_v16, %v2200_v17  ;;  %v2152_v10 = vmax.f32 %v1540_v22, %v2047_v4  ;;  %v3442_v54 = vpop.f32.mrb[193].mxu0  ;;  %v3609_v7 = vpop.f32.mrb[193].mxu1 }
 0x26d   :  { %v2305_v8 = vmax.f32 %v2256_v34, 0.0  ;;  %v2201_v6 = vmax.f32 %v5783_v47, %v2152_v10 }
 0x26e   :  { %v1545_v26 = vpop.f32.mrb[194].mxu0  ;;  %v2052_v20 = vpop.f32.mrb[194].mxu1 }
 0x26f   :  { %2354 = vst [vmem:[%s5588_s3 + $0x170] sm:$0xff] %v2305_v8  ;;  %v2257_v41 = vadd.f32 %v5240_v16, %v2201_v6  ;;  %v2153_v27 = vmax.f32 %v1545_v26, %v2052_v20  ;;  %v3445_v49 = vpop.f32.mrb[195].mxu0  ;;  %v3612_v50 = vpop.f32.mrb[195].mxu1 }
 0x271   :  { %v2306_v1 = vmax.f32 %v2257_v41, 0.0  ;;  %v2202_v29 = vmax.f32 %v5786_v12, %v2153_v27 }
 0x273   :  { %2355 = vst [vmem:[%s5588_s3 + $0x178] sm:$0xff] %v2306_v1  ;;  %v2258_v18 = vadd.f32 %v5240_v16, %v2202_v29 }
 0x275   :  { %v2307_v19 = vmax.f32 %v2258_v18, 0.0 }
 0x277   :  { %2356 = vst [vmem:[%s5588_s3 + $0x180] sm:$0xff] %v2307_v19 }

// kernel: net_forward.4
= control target key start
LH: loop header
LB: loop body
LE: loop exit
PB: predicated region body
PF: predicated region fallthrough
CT: control target
= control target key end

     0   :  { %v819_v0 = vmov 0.0|0.0   ;;  %vm47_vm0 = vcmask 179200   ;;  %v820_v30 = vmov 0.0   ;;  %vm69_vm1 = vcmask 1045504   ;;  %s1234_s1 = inlined_call_operand.vmem [shape: f32[150,128], index: 1, kind: input, shape index: {}]   ;;  %s1235_s0 = inlined_call_operand.vmem [shape: f32[4,50,150], index: 0, kind: input, shape index: {}]   ;;  %s1236_s2 = inlined_call_operand.vmem [shape: f32[1,128], index: 2, kind: input, shape index: {}]   ;;  %s1237_s3 = inlined_call_operand.vmem [shape: f32[50,128], index: 3, kind: output, shape index: {}]  }
   0x1   :  { %709 = vmatprep.subr.bf16.mxu0 %v819_v0  ;;  %736 = vmatprep.subr.bf16.mxu1 %v819_v0  ;;  %v14_v1 = vld [vmem:[%s1234_s1] sm:$0xff]  ;;  %v15_v2 = vld [vmem:[%s1234_s1 + $0x8] sm:$0xff]  ;;  %v16_v3 = vld [vmem:[%s1234_s1 + $0x10] sm:$0xff] }
   0x2   :  { %v852_v4 = vpack.c.bf16 %v15_v2, %v14_v1  ;;  %v17_v5 = vld [vmem:[%s1234_s1 + $0x18] sm:$0xff]  ;;  %v18_v7 = vld [vmem:[%s1234_s1 + $0x20] sm:$0xff]  ;;  %v19_v8 = vld [vmem:[%s1234_s1 + $0x28] sm:$0xff] }
   0x3   :  { %v859_v6 = vpack.c.bf16 %v17_v5, %v16_v3  ;;  %v34_v9 = vld [vmem:[%s1235_s0 + $0x8] sm:$0xff]  ;;  %v643_v10 = vld [vmem:[%s1235_s0 + $0x78] sm:$0xff]  ;;  %v877_v11 = vpack.c.bf16 %v19_v8, %v18_v7  ;;  %v20_v12 = vld [vmem:[%s1234_s1 + $0x30] sm:$0xff] }
   0x4   :  { %711 = vmatpush1.bf16.msra.mxu0 %v852_v4  ;;  %738 = vmatpush1.bf16.msra.mxu1 %v852_v4  ;;  %v21_v13 = vld [vmem:[%s1234_s1 + $0x38] sm:$0xff]  ;;  %v22_v15 = vld [vmem:[%s1234_s1 + $0x40] sm:$0xff]  ;;  %v23_v16 = vld [vmem:[%s1234_s1 + $0x48] sm:$0xff] }
   0x5   :  { %712 = vmatprep.subr.bf16.mxu0 %v819_v0  ;;  %739 = vmatprep.subr.bf16.mxu1 %v819_v0  ;;  %v891_v14 = vpack.c.bf16 %v21_v13, %v20_v12  ;;  %v903_v17 = vpack.c.bf16 %v23_v16, %v22_v15  ;;  %v24_v18 = vld [vmem:[%s1234_s1 + $0x50] sm:$0xff]  ;;  %v25_v19 = vld [vmem:[%s1234_s1 + $0x58] sm:$0xff]  ;;  %v26_v21 = vld [vmem:[%s1234_s1 + $0x60] sm:$0xff] }
   0x6   :  { %635 = vmatprep.mubr.msk.f32.mxu0 %vm47_vm0, %v34_v9  ;;  %657 = vmatprep.mubr.msk.f32.mxu1 %vm47_vm0, %v643_v10  ;;  %v915_v20 = vpack.c.bf16 %v25_v19, %v24_v18  ;;  %v27_v22 = vld [vmem:[%s1234_s1 + $0x68] sm:$0xff]  ;;  %v28_v24 = vld [vmem:[%s1234_s1 + $0x70] sm:$0xff]  ;;  %v29_v25 = vld [vmem:[%s1234_s1 + $0x78] sm:$0xff] }
   0x7   :  { %v927_v23 = vpack.c.bf16 %v27_v22, %v26_v21  ;;  %v939_v26 = vpack.c.bf16 %v29_v25, %v28_v24  ;;  %v30_v27 = vld [vmem:[%s1234_s1 + $0x80] sm:$0xff]  ;;  %v31_v28 = vld [vmem:[%s1234_s1 + $0x88] sm:$0xff]  ;;  %v962_v31 = vld [vmem:[%s1234_s1 + $0x90] sm:$0x3f] }
   0x8   :  { %714 = vmatpush1.bf16.msra.mxu0 %v859_v6  ;;  %741 = vmatpush1.bf16.msra.mxu1 %v859_v6  ;;  %v951_v29 = vpack.c.bf16 %v31_v28, %v30_v27  ;;  %v33_v32 = vld [vmem:[%s1235_s0] sm:$0xff]  ;;  %v642_v33 = vld [vmem:[%s1235_s0 + $0x70] sm:$0xff]  ;;  %v36_v34 = vld [vmem:[%s1235_s0 + $0x18] sm:$0xff] }
   0x9   :  { %715 = vmatprep.subr.bf16.mxu0 %v819_v0  ;;  %742 = vmatprep.subr.bf16.mxu1 %v819_v0  ;;  %v645_v35 = vld [vmem:[%s1235_s0 + $0x88] sm:$0xff]  ;;  %v35_v36 = vld [vmem:[%s1235_s0 + $0x10] sm:$0xff]  ;;  %v644_v37 = vld [vmem:[%s1235_s0 + $0x80] sm:$0xff] }
   0xa   :  { %v38_v38 = vld [vmem:[%s1235_s0 + $0x28] sm:$0xff]  ;;  %v647_v39 = vld [vmem:[%s1235_s0 + $0x98] sm:$0xff]  ;;  %v37_v40 = vld [vmem:[%s1235_s0 + $0x20] sm:$0xff] }
   0xb   :  { %v646_v41 = vld [vmem:[%s1235_s0 + $0x90] sm:$0xff]  ;;  %v40_v42 = vld [vmem:[%s1235_s0 + $0x38] sm:$0xff]  ;;  %v649_v43 = vld [vmem:[%s1235_s0 + $0xa8] sm:$0xff] }
   0xc   :  { %717 = vmatpush1.bf16.msra.mxu0 %v877_v11  ;;  %744 = vmatpush1.bf16.msra.mxu1 %v877_v11  ;;  %v39_v44 = vld [vmem:[%s1235_s0 + $0x30] sm:$0xff]  ;;  %v648_v45 = vld [vmem:[%s1235_s0 + $0xa0] sm:$0xff]  ;;  %v42_v46 = vld [vmem:[%s1235_s0 + $0x48] sm:$0xff] }
   0xd   :  { %718 = vmatprep.subr.bf16.mxu0 %v819_v0  ;;  %745 = vmatprep.subr.bf16.mxu1 %v819_v0  ;;  %v651_v47 = vld [vmem:[%s1235_s0 + $0xb8] sm:$0xff]  ;;  %v41_v48 = vld [vmem:[%s1235_s0 + $0x40] sm:$0xff]  ;;  %v650_v49 = vld [vmem:[%s1235_s0 + $0xb0] sm:$0xff] }
   0xe   :  { %v44_v50 = vld [vmem:[%s1235_s0 + $0x58] sm:$0xff]  ;;  %v653_v51 = vld [vmem:[%s1235_s0 + $0xc8] sm:$0xff]  ;;  %v43_v52 = vld [vmem:[%s1235_s0 + $0x50] sm:$0xff] }
   0xf   :  { %v652_v53 = vld [vmem:[%s1235_s0 + $0xc0] sm:$0xff]  ;;  %v46_v54 = vld [vmem:[%s1235_s0 + $0x68] sm:$0x3]  ;;  %v655_v55 = vld [vmem:[%s1235_s0 + $0xd8] sm:$0x3] }
  0x10   :  { %720 = vmatpush1.bf16.msra.mxu0 %v891_v14  ;;  %747 = vmatpush1.bf16.msra.mxu1 %v891_v14  ;;  %v45_v56 = vld [vmem:[%s1235_s0 + $0x60] sm:$0x3]  ;;  %v654_v57 = vld [vmem:[%s1235_s0 + $0xd0] sm:$0x3]  ;;  %v665_v58 = vld [vmem:[%s1235_s0 + $0xe8] sm:$0xff] }
  0x11   :  { %721 = vmatprep.subr.bf16.mxu0 %v819_v0  ;;  %748 = vmatprep.subr.bf16.mxu1 %v819_v0  ;;  %v687_v59 = vld [vmem:[%s1235_s0 + $0x158] sm:$0xff]  ;;  %v664_v60 = vld [vmem:[%s1235_s0 + $0xe0] sm:$0xff]  ;;  %v686_v61 = vld [vmem:[%s1235_s0 + $0x150] sm:$0xff] }
  0x12   :  { %v667_v62 = vld [vmem:[%s1235_s0 + $0xf8] sm:$0xff]  ;;  %v689_v63 = vld [vmem:[%s1235_s0 + $0x168] sm:$0xff]  ;;  %v688_v1 = vld [vmem:[%s1235_s0 + $0x160] sm:$0xff] }
  0x13   :  { %v669_v2 = vld [vmem:[%s1235_s0 + $0x108] sm:$0xff]  ;;  %v691_v3 = vld [vmem:[%s1235_s0 + $0x178] sm:$0xff]  ;;  %v690_v5 = vld [vmem:[%s1235_s0 + $0x170] sm:$0xff] }
  0x14   :  { %723 = vmatpush1.bf16.msra.mxu0 %v903_v17  ;;  %750 = vmatpush1.bf16.msra.mxu1 %v903_v17  ;;  %v693_v7 = vld [vmem:[%s1235_s0 + $0x188] sm:$0xff]  ;;  %v670_v8 = vld [vmem:[%s1235_s0 + $0x110] sm:$0xff]  ;;  %v692_v9 = vld [vmem:[%s1235_s0 + $0x180] sm:$0xff] }
  0x15   :  { %724 = vmatprep.subr.bf16.mxu0 %v819_v0  ;;  %751 = vmatprep.subr.bf16.mxu1 %v819_v0  ;;  %v673_v10 = vld [vmem:[%s1235_s0 + $0x128] sm:$0xff]  ;;  %v672_v12 = vld [vmem:[%s1235_s0 + $0x120] sm:$0xff]  ;;  %v694_v13 = vld [vmem:[%s1235_s0 + $0x190] sm:$0xff] }
  0x16   :  { %v697_v15 = vld [vmem:[%s1235_s0 + $0x1a8] sm:$0xff]  ;;  %v674_v16 = vld [vmem:[%s1235_s0 + $0x130] sm:$0xff]  ;;  %v699_v19 = vld [vmem:[%s1235_s0 + $0x1b8] sm:$0x3] }
  0x17   :  { %v677_v18 = vld [vmem:[%s1235_s0 + $0x148] sm:$0x3]  ;;  %v698_v21 = vld [vmem:[%s1235_s0 + $0x1b0] sm:$0x3] }
  0x18   :  { %726 = vmatpush1.bf16.msra.mxu0 %v915_v20  ;;  %753 = vmatpush1.bf16.msra.mxu1 %v915_v20 }
  0x19   :  { %727 = vmatprep.subr.bf16.mxu0 %v819_v0  ;;  %754 = vmatprep.subr.bf16.mxu1 %v819_v0 }
  0x1c   :  { %729 = vmatpush1.bf16.msra.mxu0 %v927_v23  ;;  %756 = vmatpush1.bf16.msra.mxu1 %v927_v23 }
  0x1d   :  { %730 = vmatprep.subr.bf16.mxu0 %v819_v0  ;;  %757 = vmatprep.subr.bf16.mxu1 %v819_v0 }
  0x20   :  { %732 = vmatpush1.bf16.msra.mxu0 %v939_v26  ;;  %759 = vmatpush1.bf16.msra.mxu1 %v939_v26 }
  0x21   :  { %733 = vmatprep.subr.bf16.mxu0 %v819_v0  ;;  %760 = vmatprep.subr.bf16.mxu1 %v819_v0 }
  0x24   :  { %735 = vmatpush1.bf16.msra.mxu0 %v951_v29  ;;  %762 = vmatpush1.bf16.msra.mxu1 %v951_v29 }
  0x25   :  { %109 = vmatprep.subr.mxu0 %v820_v30  ;;  %245 = vmatprep.subr.mxu1 %v820_v30 }
  0x28   :  { %634 = vmatpush1.msk.msra.mxu0 %vm69_vm1, %v962_v31  ;;  %656 = vmatpush1.msk.msra.mxu1 %vm69_vm1, %v962_v31 }
  0x29   :  { %138 = vmatmul.mubr.f32.vlgmr.msra.gmra.mrb[0].mxu0 %v33_v32  ;;  %274 = vmatmul.mubr.f32.vlgmr.msra.gmra.mrb[0].mxu1 %v642_v33 }
  0x2a   :  { %763 = vmatprep.subr.bf16.mxu0 %v819_v0  ;;  %790 = vmatprep.subr.bf16.mxu1 %v819_v0 }
  0x2b   :  { %765 = vmatpush1.bf16.msra.mxu0 %v852_v4  ;;  %792 = vmatpush1.bf16.msra.mxu1 %v852_v4  ;;  %v668_v4 = vld [vmem:[%s1235_s0 + $0x100] sm:$0xff] }
  0x2c   :  { %766 = vmatprep.subr.bf16.mxu0 %v819_v0  ;;  %793 = vmatprep.subr.bf16.mxu1 %v819_v0 }
  0x2d   :  { %636 = vmatprep.mubr.msk.f32.mxu0 %vm47_vm0, %v36_v34  ;;  %658 = vmatprep.mubr.msk.f32.mxu1 %vm47_vm0, %v645_v35 }
  0x2e   :  { %143 = vmatmul.mubr.f32.gmra.mrb[2].mxu0 %v35_v36  ;;  %279 = vmatmul.mubr.f32.gmra.mrb[2].mxu1 %v644_v37 }
  0x2f   :  { %768 = vmatpush1.bf16.msra.mxu0 %v859_v6  ;;  %795 = vmatpush1.bf16.msra.mxu1 %v859_v6  ;;  %v671_v6 = vld [vmem:[%s1235_s0 + $0x118] sm:$0xff] }
  0x30   :  { %769 = vmatprep.subr.bf16.mxu0 %v819_v0  ;;  %796 = vmatprep.subr.bf16.mxu1 %v819_v0 }
  0x31   :  { %637 = vmatprep.mubr.msk.f32.mxu0 %vm47_vm0, %v38_v38  ;;  %659 = vmatprep.mubr.msk.f32.mxu1 %vm47_vm0, %v647_v39 }
  0x32   :  { %148 = vmatmul.mubr.f32.gmra.mrb[4].mxu0 %v37_v40  ;;  %284 = vmatmul.mubr.f32.gmra.mrb[4].mxu1 %v646_v41 }
  0x33   :  { %771 = vmatpush1.bf16.msra.mxu0 %v877_v11  ;;  %798 = vmatpush1.bf16.msra.mxu1 %v877_v11  ;;  %v695_v11 = vld [vmem:[%s1235_s0 + $0x198] sm:$0xff] }
  0x34   :  { %772 = vmatprep.subr.bf16.mxu0 %v819_v0  ;;  %799 = vmatprep.subr.bf16.mxu1 %v819_v0 }
  0x35   :  { %638 = vmatprep.mubr.msk.f32.mxu0 %vm47_vm0, %v40_v42  ;;  %660 = vmatprep.mubr.msk.f32.mxu1 %vm47_vm0, %v649_v43 }
  0x36   :  { %153 = vmatmul.mubr.f32.gmra.mrb[6].mxu0 %v39_v44  ;;  %289 = vmatmul.mubr.f32.gmra.mrb[6].mxu1 %v648_v45 }
  0x37   :  { %774 = vmatpush1.bf16.msra.mxu0 %v891_v14  ;;  %801 = vmatpush1.bf16.msra.mxu1 %v891_v14  ;;  %v675_v14 = vld [vmem:[%s1235_s0 + $0x138] sm:$0xff] }
  0x38   :  { %775 = vmatprep.subr.bf16.mxu0 %v819_v0  ;;  %802 = vmatprep.subr.bf16.mxu1 %v819_v0 }
  0x39   :  { %639 = vmatprep.mubr.msk.f32.mxu0 %vm47_vm0, %v42_v46  ;;  %661 = vmatprep.mubr.msk.f32.mxu1 %vm47_vm0, %v651_v47 }
  0x3a   :  { %158 = vmatmul.mubr.f32.gmra.mrb[8].mxu0 %v41_v48  ;;  %294 = vmatmul.mubr.f32.gmra.mrb[8].mxu1 %v650_v49 }
  0x3b   :  { %777 = vmatpush1.bf16.msra.mxu0 %v903_v17  ;;  %804 = vmatpush1.bf16.msra.mxu1 %v903_v17  ;;  %v696_v17 = vld [vmem:[%s1235_s0 + $0x1a0] sm:$0xff] }
  0x3c   :  { %778 = vmatprep.subr.bf16.mxu0 %v819_v0  ;;  %805 = vmatprep.subr.bf16.mxu1 %v819_v0 }
  0x3d   :  { %640 = vmatprep.mubr.msk.f32.mxu0 %vm47_vm0, %v44_v50  ;;  %662 = vmatprep.mubr.msk.f32.mxu1 %vm47_vm0, %v653_v51 }
  0x3e   :  { %163 = vmatmul.mubr.f32.gmra.mrb[10].mxu0 %v43_v52  ;;  %299 = vmatmul.mubr.f32.gmra.mrb[10].mxu1 %v652_v53 }
  0x3f   :  { %780 = vmatpush1.bf16.msra.mxu0 %v915_v20  ;;  %807 = vmatpush1.bf16.msra.mxu1 %v915_v20  ;;  %v676_v20 = vld [vmem:[%s1235_s0 + $0x140] sm:$0x3] }
  0x40   :  { %781 = vmatprep.subr.bf16.mxu0 %v819_v0  ;;  %808 = vmatprep.subr.bf16.mxu1 %v819_v0 }
  0x41   :  { %641 = vmatprep.mubr.msk.f32.mxu0 %vm47_vm0, %v46_v54  ;;  %663 = vmatprep.mubr.msk.f32.mxu1 %vm47_vm0, %v655_v55 }
  0x42   :  { %168 = vmatmul.mubr.f32.gmra.mrb[12].mxu0 %v45_v56  ;;  %304 = vmatmul.mubr.f32.gmra.mrb[12].mxu1 %v654_v57 }
  0x43   :  { %783 = vmatpush1.bf16.msra.mxu0 %v927_v23  ;;  %810 = vmatpush1.bf16.msra.mxu1 %v927_v23 }
  0x44   :  { %784 = vmatprep.subr.bf16.mxu0 %v819_v0  ;;  %811 = vmatprep.subr.bf16.mxu1 %v819_v0 }
  0x45   :  { %679 = vmatprep.mubr.msk.f32.mxu0 %vm47_vm0, %v665_v58  ;;  %701 = vmatprep.mubr.msk.f32.mxu1 %vm47_vm0, %v687_v59 }
  0x47   :  { %786 = vmatpush1.bf16.msra.mxu0 %v939_v26  ;;  %813 = vmatpush1.bf16.msra.mxu1 %v939_v26 }
  0x48   :  { %787 = vmatprep.subr.bf16.mxu0 %v819_v0  ;;  %814 = vmatprep.subr.bf16.mxu1 %v819_v0  ;;  %v666_v0 = vld [vmem:[%s1235_s0 + $0xf0] sm:$0xff] }
  0x4b   :  { %789 = vmatpush1.bf16.msra.mxu0 %v951_v29  ;;  %816 = vmatpush1.bf16.msra.mxu1 %v951_v29 }
  0x4c   :  { %381 = vmatprep.subr.mxu0 %v820_v30  ;;  %517 = vmatprep.subr.mxu1 %v820_v30 }
  0x4f   :  { %678 = vmatpush1.msk.msra.mxu0 %vm69_vm1, %v962_v31  ;;  %700 = vmatpush1.msk.msra.mxu1 %vm69_vm1, %v962_v31 }
  0x50   :  { %410 = vmatmul.mubr.f32.vlgmr.msra.gmra.mrb[14].mxu0 %v664_v60  ;;  %546 = vmatmul.mubr.f32.vlgmr.msra.gmra.mrb[14].mxu1 %v686_v61 }
  0x51   :  { %680 = vmatprep.mubr.msk.f32.mxu0 %vm47_vm0, %v667_v62  ;;  %702 = vmatprep.mubr.msk.f32.mxu1 %vm47_vm0, %v689_v63  ;;  %v708_v62 = vld [vmem:[%s1236_s2] ss:$0 sm:$0xff] }
  0x54   :  { %415 = vmatmul.mubr.f32.gmra.mrb[16].mxu0 %v666_v0  ;;  %551 = vmatmul.mubr.f32.gmra.mrb[16].mxu1 %v688_v1 }
  0x55   :  { %681 = vmatprep.mubr.msk.f32.mxu0 %vm47_vm0, %v669_v2  ;;  %703 = vmatprep.mubr.msk.f32.mxu1 %vm47_vm0, %v691_v3 }
  0x58   :  { %420 = vmatmul.mubr.f32.gmra.mrb[18].mxu0 %v668_v4  ;;  %556 = vmatmul.mubr.f32.gmra.mrb[18].mxu1 %v690_v5 }
  0x59   :  { %682 = vmatprep.mubr.msk.f32.mxu0 %vm47_vm0, %v671_v6  ;;  %704 = vmatprep.mubr.msk.f32.mxu1 %vm47_vm0, %v693_v7 }
  0x5c   :  { %425 = vmatmul.mubr.f32.gmra.mrb[20].mxu0 %v670_v8  ;;  %561 = vmatmul.mubr.f32.gmra.mrb[20].mxu1 %v692_v9 }
  0x5d   :  { %683 = vmatprep.mubr.msk.f32.mxu0 %vm47_vm0, %v673_v10  ;;  %705 = vmatprep.mubr.msk.f32.mxu1 %vm47_vm0, %v695_v11 }
  0x60   :  { %430 = vmatmul.mubr.f32.gmra.mrb[22].mxu0 %v672_v12  ;;  %566 = vmatmul.mubr.f32.gmra.mrb[22].mxu1 %v694_v13 }
  0x61   :  { %684 = vmatprep.mubr.msk.f32.mxu0 %vm47_vm0, %v675_v14  ;;  %706 = vmatprep.mubr.msk.f32.mxu1 %vm47_vm0, %v697_v15 }
  0x64   :  { %435 = vmatmul.mubr.f32.gmra.mrb[24].mxu0 %v674_v16  ;;  %571 = vmatmul.mubr.f32.gmra.mrb[24].mxu1 %v696_v17 }
  0x65   :  { %685 = vmatprep.mubr.msk.f32.mxu0 %vm47_vm0, %v677_v18  ;;  %707 = vmatprep.mubr.msk.f32.mxu1 %vm47_vm0, %v699_v19 }
  0x68   :  { %440 = vmatmul.mubr.f32.gmra.mrb[26].mxu0 %v676_v20  ;;  %576 = vmatmul.mubr.f32.gmra.mrb[26].mxu1 %v698_v21 }
  0xfc   :  { %v139_v22 = vpop.f32.mrb[0].mxu0  ;;  %v275_v23 = vpop.f32.mrb[0].mxu1 }
  0xfd   :  { %v581_v24 = vmax.f32 %v139_v22, %v275_v23  ;;  %v141_v25 = vpop.f32.mrb[1].mxu0  ;;  %v277_v26 = vpop.f32.mrb[1].mxu1 }
 0x101   :  { %v144_v27 = vpop.f32.mrb[2].mxu0  ;;  %v280_v28 = vpop.f32.mrb[2].mxu1 }
 0x102   :  { %v582_v29 = vmax.f32 %v144_v27, %v280_v28  ;;  %v146_v30 = vpop.f32.mrb[3].mxu0  ;;  %v282_v31 = vpop.f32.mrb[3].mxu1 }
 0x105   :  { %v149_v32 = vpop.f32.mrb[4].mxu0  ;;  %v285_v33 = vpop.f32.mrb[4].mxu1 }
 0x106   :  { %v583_v34 = vmax.f32 %v149_v32, %v285_v33  ;;  %v151_v35 = vpop.f32.mrb[5].mxu0  ;;  %v287_v36 = vpop.f32.mrb[5].mxu1 }
 0x109   :  { %v154_v37 = vpop.f32.mrb[6].mxu0  ;;  %v290_v38 = vpop.f32.mrb[6].mxu1 }
 0x10a   :  { %v584_v39 = vmax.f32 %v154_v37, %v290_v38  ;;  %v156_v40 = vpop.f32.mrb[7].mxu0  ;;  %v292_v41 = vpop.f32.mrb[7].mxu1 }
 0x10d   :  { %v159_v42 = vpop.f32.mrb[8].mxu0  ;;  %v295_v43 = vpop.f32.mrb[8].mxu1 }
 0x10e   :  { %v585_v44 = vmax.f32 %v159_v42, %v295_v43  ;;  %v161_v45 = vpop.f32.mrb[9].mxu0  ;;  %v297_v46 = vpop.f32.mrb[9].mxu1 }
 0x111   :  { %v1198_v47 = vpop.f32.mrb[10].mxu0  ;;  %v300_v48 = vpop.f32.mrb[10].mxu1 }
 0x112   :  { %v586_v49 = vmax.f32 %v1198_v47, %v300_v48  ;;  %v166_v50 = vpop.f32.mrb[11].mxu0  ;;  %v302_v51 = vpop.f32.mrb[11].mxu1 }
 0x115   :  { %v1201_v52 = vpop.f32.mrb[12].mxu0  ;;  %v1203_v53 = vpop.f32.mrb[12].mxu1 }
 0x116   :  { %v587_v54 = vmax.f32 %v1201_v52, %v1203_v53  ;;  %v171_v55 = vpop.f32.mrb[13].mxu0  ;;  %v307_v56 = vpop.f32.mrb[13].mxu1 }
 0x123   :  { %v411_v57 = vpop.f32.mrb[14].mxu0  ;;  %v547_v58 = vpop.f32.mrb[14].mxu1 }
 0x124   :  { %v588_v59 = vmax.f32 %v411_v57, %v547_v58  ;;  %v413_v60 = vpop.f32.mrb[15].mxu0  ;;  %v549_v61 = vpop.f32.mrb[15].mxu1 }
 0x126   :  { %v595_v63 = vmax.f32 %v581_v24, %v588_v59 }
 0x127   :  { %v416_v0 = vpop.f32.mrb[16].mxu0  ;;  %v552_v1 = vpop.f32.mrb[16].mxu1 }
 0x128   :  { %v609_v2 = vadd.f32 %v708_v62, %v595_v63  ;;  %v589_v3 = vmax.f32 %v416_v0, %v552_v1  ;;  %v418_v4 = vpop.f32.mrb[17].mxu0  ;;  %v554_v5 = vpop.f32.mrb[17].mxu1 }
 0x12a   :  { %v616_v6 = vmax.f32 %v609_v2, 0.0  ;;  %v596_v7 = vmax.f32 %v582_v29, %v589_v3 }
 0x12b   :  { %v421_v8 = vpop.f32.mrb[18].mxu0  ;;  %v557_v9 = vpop.f32.mrb[18].mxu1 }
 0x12c   :  { %623 = vst [vmem:[%s1237_s3] sm:$0xff] %v616_v6  ;;  %v610_v10 = vadd.f32 %v708_v62, %v596_v7  ;;  %v590_v11 = vmax.f32 %v421_v8, %v557_v9  ;;  %v423_v12 = vpop.f32.mrb[19].mxu0  ;;  %v559_v13 = vpop.f32.mrb[19].mxu1 }
 0x12e   :  { %v617_v14 = vmax.f32 %v610_v10, 0.0  ;;  %v597_v15 = vmax.f32 %v583_v34, %v590_v11 }
 0x12f   :  { %v426_v16 = vpop.f32.mrb[20].mxu0  ;;  %v562_v17 = vpop.f32.mrb[20].mxu1 }
 0x130   :  { %624 = vst [vmem:[%s1237_s3 + $0x8] sm:$0xff] %v617_v14  ;;  %v611_v18 = vadd.f32 %v708_v62, %v597_v15  ;;  %v591_v19 = vmax.f32 %v426_v16, %v562_v17  ;;  %v428_v20 = vpop.f32.mrb[21].mxu0  ;;  %v564_v21 = vpop.f32.mrb[21].mxu1 }
 0x132   :  { %v618_v22 = vmax.f32 %v611_v18, 0.0  ;;  %v598_v23 = vmax.f32 %v584_v39, %v591_v19 }
 0x133   :  { %v431_v24 = vpop.f32.mrb[22].mxu0  ;;  %v567_v25 = vpop.f32.mrb[22].mxu1 }
 0x134   :  { %625 = vst [vmem:[%s1237_s3 + $0x10] sm:$0xff] %v618_v22  ;;  %v612_v26 = vadd.f32 %v708_v62, %v598_v23  ;;  %v592_v27 = vmax.f32 %v431_v24, %v567_v25  ;;  %v433_v28 = vpop.f32.mrb[23].mxu0  ;;  %v569_v29 = vpop.f32.mrb[23].mxu1 }
 0x136   :  { %v619_v30 = vmax.f32 %v612_v26, 0.0  ;;  %v599_v31 = vmax.f32 %v585_v44, %v592_v27 }
 0x137   :  { %v436_v32 = vpop.f32.mrb[24].mxu0  ;;  %v572_v33 = vpop.f32.mrb[24].mxu1 }
 0x138   :  { %626 = vst [vmem:[%s1237_s3 + $0x18] sm:$0xff] %v619_v30  ;;  %v613_v34 = vadd.f32 %v708_v62, %v599_v31  ;;  %v593_v35 = vmax.f32 %v436_v32, %v572_v33  ;;  %v438_v36 = vpop.f32.mrb[25].mxu0  ;;  %v574_v37 = vpop.f32.mrb[25].mxu1 }
 0x13a   :  { %v620_v38 = vmax.f32 %v613_v34, 0.0  ;;  %v600_v39 = vmax.f32 %v586_v49, %v593_v35 }
 0x13b   :  { %v441_v40 = vpop.f32.mrb[26].mxu0  ;;  %v577_v41 = vpop.f32.mrb[26].mxu1 }
 0x13c   :  { %627 = vst [vmem:[%s1237_s3 + $0x20] sm:$0xff] %v620_v38  ;;  %v614_v42 = vadd.f32 %v708_v62, %v600_v39  ;;  %v594_v43 = vmax.f32 %v441_v40, %v577_v41  ;;  %v443_v44 = vpop.f32.mrb[27].mxu0  ;;  %v579_v45 = vpop.f32.mrb[27].mxu1 }
 0x13e   :  { %v621_v46 = vmax.f32 %v614_v42, 0.0  ;;  %v601_v47 = vmax.f32 %v587_v54, %v594_v43 }
 0x140   :  { %628 = vst [vmem:[%s1237_s3 + $0x28] sm:$0xff] %v621_v46  ;;  %v615_v48 = vadd.f32 %v708_v62, %v601_v47 }
 0x142   :  { %v622_v49 = vmax.f32 %v615_v48, 0.0 }
 0x144   :  { %629 = vst [vmem:[%s1237_s3 + $0x30] sm:$0x3] %v622_v49 }

// kernel: net_forward.5
= control target key start
LH: loop header
LB: loop body
LE: loop exit
PB: predicated region body
PF: predicated region fallthrough
CT: control target
= control target key end

     0   :  { %v732_v4 = vmov 0.0|0.0   ;;  %v733_v26 = vmov 1983009808   ;;  %v90_v28 = vlaneseq  ;;  %vm106_vm0 = vcmask 130048   ;;  %s1072_s0 = inlined_call_operand.vmem [shape: f32[2,400], index: 0, kind: input, shape index: {}]   ;;  %s1073_s1 = inlined_call_operand.vmem [shape: f32[400,128], index: 1, kind: input, shape index: {}]   ;;  %s1074_s2 = inlined_call_operand.vmem [shape: f32[1,128], index: 2, kind: input, shape index: {}]   ;;  %s1075_s3 = inlined_call_operand.vmem [shape: f32[128,128], index: 3, kind: input, shape index: {}]   ;;  %s1076_s4 = inlined_call_operand.vmem [shape: f32[1,128], index: 4, kind: input, shape index: {}]   ;;  %s1077_s5 = inlined_call_operand.vmem [shape: f32[128,128], index: 5, kind: input, shape index: {}]   ;;  %s1078_s6 = inlined_call_operand.vmem [shape: f32[1,128], index: 6, kind: input, shape index: {}]   ;;  %s1079_s7 = inlined_call_operand.hbm [shape: f32[2,128], index: 7, kind: output, shape index: {}]  }
   0x1   :  { %v44_v0 = vld [vmem:[%s1073_s1 + $0x80] sm:$0xff]  ;;  %v45_v1 = vld [vmem:[%s1073_s1 + $0x88] sm:$0xff]  ;;  %627 = vmatprep.subr.bf16.mxu1 %v732_v4  ;;  %v46_v10 = vld [vmem:[%s1073_s1 + $0x90] sm:$0xff]  ;;  %v88_v27 = vunpack.c.l.s4 %v733_v26 }
   0x2   :  { %v28_v2 = vld [vmem:[%s1073_s1] sm:$0xff]  ;;  %v595_v3 = vpack.c.bf16 %v45_v1, %v44_v0  ;;  %v29_v5 = vld [vmem:[%s1073_s1 + $0x8] sm:$0xff]  ;;  %v47_v11 = vld [vmem:[%s1073_s1 + $0x98] sm:$0xff]  ;;  %v91_v39 = vshrl.u32 %v90_v28, 7 }
   0x3   :  { %v60_v6 = vld [vmem:[%s1073_s1 + $0x100] sm:$0xff]  ;;  %v61_v7 = vld [vmem:[%s1073_s1 + $0x108] sm:$0xff]  ;;  %v597_v8 = vpack.c.bf16 %v29_v5, %v28_v2  ;;  %v30_v12 = vld [vmem:[%s1073_s1 + $0x10] sm:$0xff]  ;;  %v599_v13 = vpack.c.bf16 %v47_v11, %v46_v10  ;;  %v89_v38 = vunpack.c.0.s8 %v88_v27 }
   0x4   :  { %v628_v9 = vpack.c.bf16 %v61_v7, %v60_v6  ;;  %596 = vmatprep.subr.bf16.mxu0 %v595_v3  ;;  %v31_v14 = vld [vmem:[%s1073_s1 + $0x18] sm:$0xff]  ;;  %v62_v15 = vld [vmem:[%s1073_s1 + $0x110] sm:$0xff]  ;;  %v48_v19 = vld [vmem:[%s1073_s1 + $0xa0] sm:$0xff] }
   0x5   :  { %v63_v16 = vld [vmem:[%s1073_s1 + $0x118] sm:$0xff]  ;;  %598 = vmatpush3.bf16.msra.mxu0 %v597_v8  ;;  %v601_v17 = vpack.c.bf16 %v31_v14, %v30_v12  ;;  %v49_v20 = vld [vmem:[%s1073_s1 + $0xa8] sm:$0xff]  ;;  %v32_v21 = vld [vmem:[%s1073_s1 + $0x20] sm:$0xff]  ;;  %v92_v49 = vsub.s32 %v89_v38, %v91_v39 }
   0x6   :  { %629 = vmatpush1.bf16.msra.mxu1 %v628_v9  ;;  %v631_v18 = vpack.c.bf16 %v63_v16, %v62_v15  ;;  %600 = vmatprep.subr.bf16.mxu0 %v599_v13  ;;  %v603_v22 = vpack.c.bf16 %v49_v20, %v48_v19  ;;  %v33_v23 = vld [vmem:[%s1073_s1 + $0x28] sm:$0xff]  ;;  %v64_v24 = vld [vmem:[%s1073_s1 + $0x120] sm:$0xff]  ;;  %v50_v29 = vld [vmem:[%s1073_s1 + $0xb0] sm:$0xff] }
   0x7   :  { %630 = vmatprep.subr.bf16.mxu1 %v732_v4  ;;  %v65_v25 = vld [vmem:[%s1073_s1 + $0x128] sm:$0xff]  ;;  %v51_v30 = vld [vmem:[%s1073_s1 + $0xb8] sm:$0xff]  ;;  %v605_v31 = vpack.c.bf16 %v33_v23, %v32_v21  ;;  %v34_v33 = vld [vmem:[%s1073_s1 + $0x30] sm:$0xff] }
   0x8   :  { %v634_v32 = vpack.c.bf16 %v65_v25, %v64_v24  ;;  %v607_v34 = vpack.c.bf16 %v51_v30, %v50_v29  ;;  %v35_v35 = vld [vmem:[%s1073_s1 + $0x38] sm:$0xff]  ;;  %v66_v36 = vld [vmem:[%s1073_s1 + $0x130] sm:$0xff]  ;;  %v52_v40 = vld [vmem:[%s1073_s1 + $0xc0] sm:$0xff] }
   0x9   :  { %602 = vmatpush3.bf16.msra.mxu0 %v601_v17  ;;  %v67_v37 = vld [vmem:[%s1073_s1 + $0x138] sm:$0xff]  ;;  %v53_v41 = vld [vmem:[%s1073_s1 + $0xc8] sm:$0xff]  ;;  %v609_v42 = vpack.c.bf16 %v35_v35, %v34_v33  ;;  %v36_v44 = vld [vmem:[%s1073_s1 + $0x40] sm:$0xff] }
   0xa   :  { %632 = vmatpush1.bf16.msra.mxu1 %v631_v18  ;;  %604 = vmatprep.subr.bf16.mxu0 %v603_v22  ;;  %v637_v43 = vpack.c.bf16 %v67_v37, %v66_v36  ;;  %v611_v45 = vpack.c.bf16 %v53_v41, %v52_v40  ;;  %v37_v46 = vld [vmem:[%s1073_s1 + $0x48] sm:$0xff]  ;;  %v68_v47 = vld [vmem:[%s1073_s1 + $0x140] sm:$0xff]  ;;  %v54_v50 = vld [vmem:[%s1073_s1 + $0xd0] sm:$0xff] }
   0xb   :  { %633 = vmatprep.subr.bf16.mxu1 %v732_v4  ;;  %v69_v48 = vld [vmem:[%s1073_s1 + $0x148] sm:$0xff]  ;;  %v55_v51 = vld [vmem:[%s1073_s1 + $0xd8] sm:$0xff]  ;;  %v613_v52 = vpack.c.bf16 %v37_v46, %v36_v44  ;;  %v38_v54 = vld [vmem:[%s1073_s1 + $0x50] sm:$0xff] }
   0xc   :  { %v640_v53 = vpack.c.bf16 %v69_v48, %v68_v47  ;;  %v27_v55 = vld [vmem:[%s1072_s0] sm:$0xff]  ;;  %v615_v56 = vpack.c.bf16 %v55_v51, %v54_v50  ;;  %v39_v57 = vld [vmem:[%s1073_s1 + $0x58] sm:$0xff]  ;;  %v70_v58 = vld [vmem:[%s1073_s1 + $0x150] sm:$0xff] }
   0xd   :  { %606 = vmatpush3.bf16.msra.mxu0 %v605_v31  ;;  %v71_v59 = vld [vmem:[%s1073_s1 + $0x158] sm:$0xff]  ;;  %v86_v60 = vcombine.high %v27_v55, %v27_v55  ;;  %v93_v61 = vrot.slane %v27_v55, %v92_v49  ;;  %v56_v62 = vld [vmem:[%s1073_s1 + $0xe0] sm:$0xff]  ;;  %v57_v63 = vld [vmem:[%s1073_s1 + $0xe8] sm:$0xff]  ;;  %v617_v2 = vpack.c.bf16 %v39_v57, %v38_v54 }
   0xe   :  { %635 = vmatpush1.bf16.msra.mxu1 %v634_v32  ;;  %608 = vmatprep.subr.bf16.mxu0 %v607_v34  ;;  %v643_v3 = vpack.c.bf16 %v71_v59, %v70_v58  ;;  %v40_v5 = vld [vmem:[%s1073_s1 + $0x60] sm:$0xff]  ;;  %v41_v6 = vld [vmem:[%s1073_s1 + $0x68] sm:$0xff]  ;;  %v619_v7 = vpack.c.bf16 %v57_v63, %v56_v62 }
   0xf   :  { %636 = vmatprep.subr.bf16.mxu1 %v732_v4  ;;  %v101_v0 = vcombine.high %v93_v61, %v93_v61  ;;  %v100_v1 = vrot.slane %v86_v60, %v92_v49  ;;  %v72_v8 = vld [vmem:[%s1073_s1 + $0x160] sm:$0xff]  ;;  %v73_v9 = vld [vmem:[%s1073_s1 + $0x168] sm:$0xff] }
  0x11   :  { %610 = vmatpush3.bf16.msra.mxu0 %v609_v42  ;;  %v102_v10 = vcombine.high %v100_v1, %v100_v1 }
  0x12   :  { %638 = vmatpush1.bf16.msra.mxu1 %v637_v43  ;;  %612 = vmatprep.subr.bf16.mxu0 %v611_v45 }
  0x13   :  { %639 = vmatprep.subr.bf16.mxu1 %v732_v4 }
  0x15   :  { %614 = vmatpush3.bf16.msra.mxu0 %v613_v52 }
  0x16   :  { %641 = vmatpush1.bf16.msra.mxu1 %v640_v53  ;;  %616 = vmatprep.subr.bf16.mxu0 %v615_v56 }
  0x17   :  { %642 = vmatprep.subr.bf16.mxu1 %v732_v4 }
  0x18   :  { %12 = vsyncpa [#allocation3], 0  ;;  %v58_v11 = vld [vmem:[%s1073_s1 + $0xf0] sm:$0xff]  ;;  %v59_v12 = vld [vmem:[%s1073_s1 + $0xf8] sm:$0xff]  ;;  %173 = vmatprep.mubr.f32.mxu0 %v101_v0  ;;  %453 = vmatprep.mubr.msk.f32.mxu1 %vm106_vm0, %v102_v10  ;;  %v621_v13 = vpack.c.bf16 %v41_v6, %v40_v5  ;;  %v646_v14 = vpack.c.bf16 %v73_v9, %v72_v8  ;;  %vm734_vm1 = vmmov 0   ;;  %v735_v49 = vmov 0.0  }
  0x19   :  { %618 = vmatpush3.bf16.msra.mxu0 %v617_v2  ;;  %v42_v15 = vld [vmem:[%s1073_s1 + $0x70] sm:$0xff]  ;;  %v623_v16 = vpack.c.bf16 %v59_v12, %v58_v11  ;;  %v43_v17 = vld [vmem:[%s1073_s1 + $0x78] sm:$0xff]  ;;  %v76_v22 = vld [vmem:[%s1073_s1 + $0x180] sm:$0xff]  ;;  %s736_s25 = smov [#allocation2]  }
  0x1a   :  { %644 = vmatpush1.bf16.msra.mxu1 %v643_v3  ;;  %620 = vmatprep.subr.bf16.mxu0 %v619_v7  ;;  %v74_v18 = vld [vmem:[%s1073_s1 + $0x170] sm:$0xff]  ;;  %v75_v19 = vld [vmem:[%s1073_s1 + $0x178] sm:$0xff]  ;;  %v625_v20 = vpack.c.bf16 %v43_v17, %v42_v15  ;;  %v77_v23 = vld [vmem:[%s1073_s1 + $0x188] sm:$0xff]  ;;  %s444_s26 = sshll.u32 %s736_s25, 4  ;;  %s445_s26 = int_to_ptr.vmem [resolvable:$true] %s444_s26 }
  0x1b   :  { %645 = vmatprep.subr.bf16.mxu1 %v732_v4  ;;  %v649_v21 = vpack.c.bf16 %v75_v19, %v74_v18  ;;  %v250_v24 = vld [vmem:[%s1075_s3] sm:$0xff]  ;;  %v251_v25 = vld [vmem:[%s1075_s3 + $0x8] sm:$0xff]  ;;  %v652_v26 = vpack.c.bf16 %v77_v23, %v76_v22  ;;  %v252_v28 = vld [vmem:[%s1075_s3 + $0x10] sm:$0xff]  ;;  %p713_p1 = scmp.lt.s32.totalorder %s445_s26, %s445_s26 }
  0x1c   :  { %v655_v27 = vpack.c.bf16 %v251_v25, %v250_v24  ;;  %v253_v29 = vld [vmem:[%s1075_s3 + $0x18] sm:$0xff]  ;;  %v254_v31 = vld [vmem:[%s1075_s3 + $0x20] sm:$0xff]  ;;  %v255_v32 = vld [vmem:[%s1075_s3 + $0x28] sm:$0xff] }
  0x1d   :  { %622 = vmatpush3.bf16.msra.mxu0 %v621_v13  ;;  %v658_v30 = vpack.c.bf16 %v253_v29, %v252_v28  ;;  %v661_v33 = vpack.c.bf16 %v255_v32, %v254_v31  ;;  %v256_v34 = vld [vmem:[%s1075_s3 + $0x30] sm:$0xff]  ;;  %v257_v35 = vld [vmem:[%s1075_s3 + $0x38] sm:$0xff]  ;;  %v258_v37 = vld [vmem:[%s1075_s3 + $0x40] sm:$0xff] }
  0x1e   :  { %647 = vmatpush1.bf16.msra.mxu1 %v646_v14  ;;  %624 = vmatprep.subr.bf16.mxu0 %v623_v16  ;;  %v664_v36 = vpack.c.bf16 %v257_v35, %v256_v34  ;;  %v259_v38 = vld [vmem:[%s1075_s3 + $0x48] sm:$0xff]  ;;  %v260_v40 = vld [vmem:[%s1075_s3 + $0x50] sm:$0xff]  ;;  %v261_v41 = vld [vmem:[%s1075_s3 + $0x58] sm:$0xff] }
  0x1f   :  { %648 = vmatprep.subr.bf16.mxu1 %v732_v4  ;;  %v667_v39 = vpack.c.bf16 %v259_v38, %v258_v37  ;;  %v670_v42 = vpack.c.bf16 %v261_v41, %v260_v40  ;;  %v262_v43 = vld [vmem:[%s1075_s3 + $0x60] sm:$0xff]  ;;  %v263_v44 = vld [vmem:[%s1075_s3 + $0x68] sm:$0xff]  ;;  %v264_v46 = vld [vmem:[%s1075_s3 + $0x70] sm:$0xff] }
  0x20   :  { %v673_v45 = vpack.c.bf16 %v263_v44, %v262_v43  ;;  %v265_v47 = vld [vmem:[%s1075_s3 + $0x78] sm:$0xff]  ;;  %v344_v50 = vld [vmem:[%s1077_s5] sm:$0xff]  ;;  %v345_v51 = vld [vmem:[%s1077_s5 + $0x8] sm:$0xff] }
  0x21   :  { %626 = vmatpush3.bf16.msra.mxu0 %v625_v20  ;;  %v676_v48 = vpack.c.bf16 %v265_v47, %v264_v46  ;;  %v346_v52 = vld [vmem:[%s1077_s5 + $0x10] sm:$0xff]  ;;  %v679_v53 = vpack.c.bf16 %v345_v51, %v344_v50  ;;  %v347_v54 = vld [vmem:[%s1077_s5 + $0x18] sm:$0xff]  ;;  %v348_v56 = vld [vmem:[%s1077_s5 + $0x20] sm:$0xff] }
  0x22   :  { %650 = vmatpush1.bf16.msra.mxu1 %v649_v21  ;;  %654 = vmatprep.subr.bf16.mxu0 %v732_v4  ;;  %v682_v55 = vpack.c.bf16 %v347_v54, %v346_v52  ;;  %v349_v57 = vld [vmem:[%s1077_s5 + $0x28] sm:$0xff]  ;;  %v350_v59 = vld [vmem:[%s1077_s5 + $0x30] sm:$0xff]  ;;  %v351_v60 = vld [vmem:[%s1077_s5 + $0x38] sm:$0xff] }
  0x23   :  { %651 = vmatprep.subr.bf16.mxu1 %v732_v4  ;;  %v685_v58 = vpack.c.bf16 %v349_v57, %v348_v56  ;;  %v352_v62 = vld [vmem:[%s1077_s5 + $0x40] sm:$0xff]  ;;  %v353_v63 = vld [vmem:[%s1077_s5 + $0x48] sm:$0xff]  ;;  %v355_v2 = vld [vmem:[%s1077_s5 + $0x58] sm:$0xff] }
  0x24   :  { %174 = vmatmul.mubr.f32.vlgmr.msra.gmra.mrb[0].mxu0 %v93_v61  ;;  %v688_v61 = vpack.c.bf16 %v351_v60, %v350_v59  ;;  %v691_v0 = vpack.c.bf16 %v353_v63, %v352_v62  ;;  %v356_v5 = vld [vmem:[%s1077_s5 + $0x60] sm:$0xff]  ;;  %v357_v6 = vld [vmem:[%s1077_s5 + $0x68] sm:$0xff]  ;;  %v358_v17 = vld [vmem:[%s1077_s5 + $0x70] sm:$0xff] }
  0x25   :  { %656 = vmatpush3.bf16.msra.mxu0 %v655_v27  ;;  %557 = vmatprep.mubr.msk.f32.mxu0 %vm734_vm1, %v735_v49  ;;  %v697_v7 = vpack.c.bf16 %v357_v6, %v356_v5  ;;  %v452_v10 = vld [vmem:[%s1074_s2] ss:$0 sm:$0xff] }
  0x26   :  { %653 = vmatpush1.bf16.msra.mxu1 %v652_v26  ;;  %657 = vmatprep.subr.bf16.mxu0 %v732_v4  ;;  %v454_v19 = vld [vmem:[%s1076_s4] ss:$0 sm:$0xff] }
  0x27   :  { %678 = vmatprep.subr.bf16.mxu1 %v732_v4  ;;  %v455_v24 = vld [vmem:[%s1078_s6] ss:$0 sm:$0xff] }
  0x29   :  { %244 = vmatmul.mubr.f32.vlgmr.msra.gmra.mrb[0].mxu1 %v100_v1  ;;  %659 = vmatpush3.bf16.msra.mxu0 %v658_v30  ;;  %v354_v1 = vld [vmem:[%s1077_s5 + $0x50] sm:$0xff] }
  0x2a   :  { %660 = vmatprep.subr.bf16.mxu0 %v732_v4  ;;  %592 = vmatprep.mubr.msk.f32.mxu1 %vm734_vm1, %v735_v49  ;;  %v694_v3 = vpack.c.bf16 %v355_v2, %v354_v1 }
  0x2b   :  { %680 = vmatpush3.bf16.msra.mxu1 %v679_v53 }
  0x2c   :  { %681 = vmatprep.subr.bf16.mxu1 %v732_v4 }
  0x2d   :  { %662 = vmatpush3.bf16.msra.mxu0 %v661_v33 }
  0x2e   :  { %663 = vmatprep.subr.bf16.mxu0 %v732_v4 }
  0x2f   :  { %683 = vmatpush3.bf16.msra.mxu1 %v682_v55 }
  0x30   :  { %684 = vmatprep.subr.bf16.mxu1 %v732_v4 }
  0x31   :  { %665 = vmatpush3.bf16.msra.mxu0 %v664_v36 }
  0x32   :  { %666 = vmatprep.subr.bf16.mxu0 %v732_v4 }
  0x33   :  { %686 = vmatpush3.bf16.msra.mxu1 %v685_v58 }
  0x34   :  { %687 = vmatprep.subr.bf16.mxu1 %v732_v4 }
  0x35   :  { %668 = vmatpush3.bf16.msra.mxu0 %v667_v39 }
  0x36   :  { %669 = vmatprep.subr.bf16.mxu0 %v732_v4 }
  0x37   :  { %689 = vmatpush3.bf16.msra.mxu1 %v688_v61 }
  0x38   :  { %690 = vmatprep.subr.bf16.mxu1 %v732_v4 }
  0x39   :  { %671 = vmatpush3.bf16.msra.mxu0 %v670_v42 }
  0x3a   :  { %672 = vmatprep.subr.bf16.mxu0 %v732_v4 }
  0x3b   :  { %692 = vmatpush3.bf16.msra.mxu1 %v691_v0 }
  0x3c   :  { %693 = vmatprep.subr.bf16.mxu1 %v732_v4 }
  0x3d   :  { %674 = vmatpush3.bf16.msra.mxu0 %v673_v45 }
  0x3e   :  { %675 = vmatprep.subr.bf16.mxu0 %v732_v4 }
  0x3f   :  { %695 = vmatpush3.bf16.msra.mxu1 %v694_v3 }
  0x40   :  { %696 = vmatprep.subr.bf16.mxu1 %v732_v4 }
  0x41   :  { %677 = vmatpush3.bf16.msra.mxu0 %v676_v48 }
  0x43   :  { %698 = vmatpush3.bf16.msra.mxu1 %v697_v7 }
  0x44   :  { %699 = vmatprep.subr.bf16.mxu1 %v732_v4  ;;  %v359_v4 = vld [vmem:[%s1077_s5 + $0x78] sm:$0xff]  ;;  %s708_s5 = scalar_lea.vmem %s445_s26, 32 }
  0x45   :  { %v700_v18 = vpack.c.bf16 %v359_v4, %v358_v17  ;;  %p709_p0 = scmp.ne.s32.totalorder %s445_s26, %s708_s5  ;;  %p714_p2 = scmp.lt.s32.totalorder %s708_s5, %s708_s5 }
  0x47   :  { %701 = vmatpush3.bf16.msra.mxu1 %v700_v18  ;;  %p715_p3 = por %p714_p2, %p713_p1 }
  0x49   :  { %p716_p4 = pnand %p715_p3, %p709_p0 }
  0xf7   :  { %v488_v8 = vpop.f32.mrb[0].mxu0 }
  0xf8   :  { %v489_v9 = vpop.f32.mrb[1].mxu0 }
  0xf9   :  { %v490_v11 = vadd.f32 %v489_v9, %v488_v8 }
  0xfb   :  { %v176_v12 = vadd.f32 %v490_v11, %v452_v10 }
  0xfc   :  { %v245_v13 = vpop.f32.mrb[0].mxu1 }
  0xfd   :  { %v247_v14 = vpop.f32.mrb[1].mxu1  ;;  %v246_v15 = vadd.f32 %v245_v13, %v176_v12 }
  0xff   :  { %v249_v16 = vmax.f32 %v246_v15, 0.0 }
 0x101   :  { %558 = vmatmul.mubr.f32.vlgmr.msra.gmra.mrb[2].mxu0 %v249_v16 }
 0x1d4   :  { %v339_v20 = vpop.f32.mrb[2].mxu0 }
 0x1d5   :  { %v340_v21 = vadd.f32 %v454_v19, %v339_v20  ;;  %v559_v22 = vpop.f32.mrb[3].mxu0 }
 0x1d7   :  { %v343_v23 = vmax.f32 %v340_v21, 0.0 }
 0x1d9   :  { %593 = vmatmul.mubr.f32.vlgmr.msra.gmra.mrb[2].mxu1 %v343_v23 }
 0x2ac   :  { %v433_v25 = vpop.f32.mrb[2].mxu1 }
 0x2ad   :  { %v434_v26 = vadd.f32 %v455_v24, %v433_v25  ;;  %v594_v27 = vpop.f32.mrb[3].mxu1 }
 0x2af   :  { %437 = vst [vmem:[#allocation2] sm:$0x3] %v434_v26 }
 0x2b0   :  { %719 = shalt.err (!%p716_p4)
}
 0x2b1   :  { %s720_s28 = scalar_lea.hbm %s1079_s7, 32 }
 0x2b2   :  { %p721_p5 = scmp.ne.s32.totalorder %s1079_s7, %s720_s28  ;;  %p724_p6 = scmp.lt.u32.totalorder %s720_s28, %s1079_s7 }
 0x2b4   :  { %p726_p7 = pnand %p724_p6, %p721_p5 }
 0x2b6   :  { %729 = shalt.err (!%p726_p7)
}
 0x2b7   :  { %447 = dma.vmem_to_hbm [thread:$0]  %s445_s26, 32, %s1079_s7, [#allocation3]  }
 0x2b8   :  { %730 = dma.done.wait [#allocation3], 32  }
 0x2b9   :  { %731 = vsyncadd [#allocation3], 4294967264 }
 0x2ba   :  { %451 = vsyncpa [#allocation3], 1 }

</bundles_post_ra>
